<compile_context>
chip_gen: v7x
topology: tpu7x:2x2x1
jax: 0.10.0
libtpu: 0.0.40
codegen_flags: <defaults>
</compile_context>

<pallas_src>
import math

import jax
import jax.numpy as jnp
from jax import lax
from jax.experimental import pallas as pl
from jax.experimental.pallas import tpu as pltpu

_NUM_LANES = 128


# ---------------------------------------------------------------------------
# helpers
# ---------------------------------------------------------------------------
def _pick_tile(n, cap):
    """Largest divisor of n that is <= cap and 8-aligned (or the full extent)."""
    for t in range(min(cap, n), 0, -1):
        if n % t == 0 and (t % 8 == 0 or t == n):
            return t
    return n


def _rep_lanes(x_rep, n):
    """Broadcast a (rows, 128) lane-replicated array to (rows, n)."""
    if n == _NUM_LANES:
        return x_rep
    if n < _NUM_LANES:
        return x_rep[:, :n]
    if n % _NUM_LANES == 0:
        return jnp.concatenate([x_rep] * (n // _NUM_LANES), axis=-1)
    return jnp.broadcast_to(x_rep[:, :1], (x_rep.shape[0], n))


# ---------------------------------------------------------------------------
# Kernel 0: single-pass GroupNorm statistics (per-channel sum & sum-of-squares)
# ---------------------------------------------------------------------------
def _stats_kernel(x_ref, s1_ref, s2_ref):
    @pl.when(pl.program_id(1) == 0)
    def _():
        s1_ref[...] = jnp.zeros_like(s1_ref)
        s2_ref[...] = jnp.zeros_like(s2_ref)

    xt = x_ref[0].astype(jnp.float32)                       # (TM, C)
    s1_ref[0] = s1_ref[0] + jnp.sum(xt, axis=0, keepdims=True)
    s2_ref[0] = s2_ref[0] + jnp.sum(xt * xt, axis=0, keepdims=True)


# ---------------------------------------------------------------------------
# Kernel 1: fused GroupNorm-apply + Q/K/V projection (1x1 convs == matmuls)
# ---------------------------------------------------------------------------
def _norm_qkv_kernel(x_ref, scale_ref, shift_ref,
                     wq_ref, wk_ref, wv_ref, bq_ref, bk_ref, bv_ref,
                     q_ref, k_ref, v_ref):
    # x_ref: (1, TM, C); scale/shift: (1, 1, C) f32; w*: (C, C) bf16 resident.
    h = (x_ref[0].astype(jnp.float32) * scale_ref[0]
         + shift_ref[0]).astype(wq_ref.dtype)                              # (TM, C) bf16
    q_ref[0] = (jnp.dot(h, wq_ref[...], preferred_element_type=jnp.float32)
                + bq_ref[...]).astype(q_ref.dtype)
    k_ref[0] = (jnp.dot(h, wk_ref[...], preferred_element_type=jnp.float32)
                + bk_ref[...]).astype(k_ref.dtype)
    v_ref[0] = (jnp.dot(h, wv_ref[...], preferred_element_type=jnp.float32)
                + bv_ref[...]).astype(v_ref.dtype)


# ---------------------------------------------------------------------------
# Kernel 2: single-head flash attention + fused proj_out + residual
# ---------------------------------------------------------------------------
def _flash_proj_kernel(q_ref, k_ref, v_ref, x_ref, wp_ref, bp_ref, o_ref,
                       m_sc, l_sc, acc_sc):
    kv = pl.program_id(2)
    hd = v_ref.shape[-1]                                   # head dim C

    @pl.when(kv == 0)
    def _():
        m_sc[...] = jnp.full_like(m_sc, -jnp.inf)
        l_sc[...] = jnp.zeros_like(l_sc)
        acc_sc[...] = jnp.zeros_like(acc_sc)

    # bf16 MXU operands, f32 accumulation.  1/sqrt(C) is folded into wq/bq.
    # TODO(synk): if the Mosaic bundle shows a per-kv-step vxpose of K here,
    # emit K pre-transposed as (B, C, S) from Kernel 1 instead.
    s = lax.dot_general(q_ref[0], k_ref[0], (((1,), (1,)), ((), ())),
                        preferred_element_type=jnp.float32)               # (tq, tk)

    m_prev = m_sc[...]                                     # (tq, 128) lane-replicated
    m_curr = jnp.max(s, axis=-1, keepdims=True)            # (tq, 1)
    m_next = jnp.maximum(m_prev, m_curr)                   # (tq, 128)
    alpha = jnp.exp(m_prev - m_next)                       # (tq, 128)
    p = jnp.exp(s - _rep_lanes(m_next, s.shape[-1]))       # (tq, tk)
    l_sc[...] = alpha * l_sc[...] + jnp.sum(p, axis=-1, keepdims=True)
    acc_sc[...] = (_rep_lanes(alpha, hd) * acc_sc[...]
                   + jnp.dot(p.astype(v_ref.dtype), v_ref[0],
                             preferred_element_type=jnp.float32))
    m_sc[...] = m_next

    @pl.when(kv == pl.num_programs(2) - 1)
    def _():
        inv_l = pl.reciprocal(l_sc[...], approx=True)                      # (tq, 128)
        attn = acc_sc[...] * _rep_lanes(inv_l, hd)                         # (tq, C) f32
        proj = jnp.dot(attn.astype(wp_ref.dtype), wp_ref[...],
                       preferred_element_type=jnp.float32)                 # (tq, C)
        o_ref[0] = (proj + bp_ref[...]
                    + x_ref[0].astype(jnp.float32)).astype(o_ref.dtype)


# ---------------------------------------------------------------------------
# Module wrapper
# ---------------------------------------------------------------------------
def init_attn_block_params(key, in_channels, dtype=jnp.float32):
    C = in_channels
    keys = jax.random.split(key, 10)
    bound = 1.0 / math.sqrt(C)  # PyTorch Conv2d(C, C, 1) default init range

    def conv_w(k):
        return jax.random.uniform(k, (C, C, 1, 1), dtype, minval=-bound, maxval=bound)

    def conv_b(k):
        return jax.random.uniform(k, (C,), dtype, minval=-bound, maxval=bound)

    return {
        "gn_gamma": (1.0 + 0.1 * jax.random.normal(keys[0], (C,))).astype(dtype),
        "gn_beta": (0.1 * jax.random.normal(keys[1], (C,))).astype(dtype),
        "wq": conv_w(keys[2]), "bq": conv_b(keys[3]),
        "wk": conv_w(keys[4]), "bk": conv_b(keys[5]),
        "wv": conv_w(keys[6]), "bv": conv_b(keys[7]),
        "wp": conv_w(keys[8]), "bp": conv_b(keys[9]),
    }


@jax.jit
def attn_block_forward(x, params):
    """x: NCHW, matching MemoryEfficientAttnBlock.forward. Returns NCHW."""
    B, C, H, W = x.shape
    S = H * W
    G = 32                      # GroupNorm num_groups fixed by the module
    assert C % G == 0, "in_channels must be divisible by 32 (GroupNorm groups)"
    out_dtype = x.dtype
    cdt = jnp.bfloat16          # MXU operand dtype

    x_bsc = jnp.transpose(x, (0, 2, 3, 1)).reshape(B, S, C)   # b (h w) c layout

    TM = _pick_tile(S, 256)

    # ---------------- Kernel 0: GroupNorm statistics (one pass over x) --------
    s1, s2 = pl.pallas_call(
        _stats_kernel,
        grid=(B, S // TM),
        in_specs=[pl.BlockSpec((1, TM, C), lambda b, i: (b, i, 0))],
        out_specs=(pl.BlockSpec((1, 1, C), lambda b, i: (b, 0, 0)),
                   pl.BlockSpec((1, 1, C), lambda b, i: (b, 0, 0))),
        out_shape=(jax.ShapeDtypeStruct((B, 1, C), jnp.float32),
                   jax.ShapeDtypeStruct((B, 1, C), jnp.float32)),
        compiler_params=pltpu.CompilerParams(
            dimension_semantics=("parallel", "arbitrary")),
    )(x_bsc)

    # Tiny (B, G) math: fold stats + affine into per-(batch, channel) scale/shift.
    Cg = C // G
    cnt = S * Cg
    s1g = s1.reshape(B, G, Cg).sum(-1)
    s2g = s2.reshape(B, G, Cg).sum(-1)
    mean = s1g / cnt
    var = jnp.maximum(s2g / cnt - mean * mean, 0.0)         # biased, like torch GN
    inv = lax.rsqrt(var + 1e-6)
    inv_c = jnp.repeat(inv, Cg, axis=1)                     # (B, C)
    mean_c = jnp.repeat(mean, Cg, axis=1)                   # (B, C)
    gamma = params["gn_gamma"].astype(jnp.float32)
    beta = params["gn_beta"].astype(jnp.float32)
    scale = (gamma[None, :] * inv_c).reshape(B, 1, C)
    shift = (beta[None, :] - mean_c * gamma[None, :] * inv_c).reshape(B, 1, C)

    # 1x1 conv weights (Cout, Cin, 1, 1) -> matmul weights (Cin, Cout)
    def w2d(w):
        return jnp.transpose(w[:, :, 0, 0], (1, 0))

    attn_scale = 1.0 / math.sqrt(C)
    wq = (w2d(params["wq"]).astype(jnp.float32) * attn_scale).astype(cdt)
    wk = w2d(params["wk"]).astype(cdt)
    wv = w2d(params["wv"]).astype(cdt)
    bq = (params["bq"].astype(jnp.float32) * attn_scale).reshape(1, C)
    bk = params["bk"].astype(jnp.float32).reshape(1, C)
    bv = params["bv"].astype(jnp.float32).reshape(1, C)

    # ---------------- Kernel 1: GroupNorm-apply + QKV (bf16 outputs) ----------
    row_spec = pl.BlockSpec((1, TM, C), lambda b, i: (b, i, 0))
    bc_spec = pl.BlockSpec((1, 1, C), lambda b, i: (b, 0, 0))
    const_cc = pl.BlockSpec((C, C), lambda b, i: (0, 0))
    const_1c = pl.BlockSpec((1, C), lambda b, i: (0, 0))
    q, k, v = pl.pallas_call(
        _norm_qkv_kernel,
        grid=(B, S // TM),
        in_specs=[row_spec, bc_spec, bc_spec,
                  const_cc, const_cc, const_cc,
                  const_1c, const_1c, const_1c],
        out_specs=(row_spec, row_spec, row_spec),
        out_shape=tuple(jax.ShapeDtypeStruct((B, S, C), cdt) for _ in range(3)),
        compiler_params=pltpu.CompilerParams(
            dimension_semantics=("parallel", "parallel")),
    )(x_bsc, scale, shift, wq, wk, wv, bq, bk, bv)

    # ---------------- Kernel 2: flash attention + proj_out + residual ---------
    tq = _pick_tile(S, 256)
    tk = _pick_tile(S, 256)
    wp = w2d(params["wp"]).astype(cdt)
    bp = params["bp"].astype(jnp.float32).reshape(1, C)
    out_bsc = pl.pallas_call(
        _flash_proj_kernel,
        grid=(B, S // tq, S // tk),
        in_specs=[
            pl.BlockSpec((1, tq, C), lambda b, qi, ki: (b, qi, 0)),   # q
            pl.BlockSpec((1, tk, C), lambda b, qi, ki: (b, ki, 0)),   # k
            pl.BlockSpec((1, tk, C), lambda b, qi, ki: (b, ki, 0)),   # v
            pl.BlockSpec((1, tq, C), lambda b, qi, ki: (b, qi, 0)),   # residual x
            pl.BlockSpec((C, C), lambda b, qi, ki: (0, 0)),           # proj weight
            pl.BlockSpec((1, C), lambda b, qi, ki: (0, 0)),           # proj bias
        ],
        out_specs=pl.BlockSpec((1, tq, C), lambda b, qi, ki: (b, qi, 0)),
        out_shape=jax.ShapeDtypeStruct((B, S, C), out_dtype),
        scratch_shapes=[
            pltpu.VMEM((tq, _NUM_LANES), jnp.float32),   # running max (lane-replicated)
            pltpu.VMEM((tq, _NUM_LANES), jnp.float32),   # running denom (lane-replicated)
            pltpu.VMEM((tq, C), jnp.float32),            # f32 output accumulator
        ],
        compiler_params=pltpu.CompilerParams(
            dimension_semantics=("parallel", "parallel", "arbitrary")),
    )(q, k, v, x_bsc, wp, bp)

    # Back to NCHW like the PyTorch module.
    return out_bsc.reshape(B, H, W, C).transpose(0, 3, 1, 2)


# ---------------------------------------------------------------------------
# Pure-JAX reference (f32) for a correctness check
# ---------------------------------------------------------------------------
def _ref_forward(x, params):
    B, C, H, W = x.shape
    G = 32
    xf = x.astype(jnp.float32)
    xg = xf.reshape(B, G, C // G, H, W)
    mean = xg.mean(axis=(2, 3, 4), keepdims=True)
    var = xg.var(axis=(2, 3, 4), keepdims=True)
    hn = ((xg - mean) / jnp.sqrt(var + 1e-6)).reshape(B, C, H, W)
    hn = hn * params["gn_gamma"][None, :, None, None] + params["gn_beta"][None, :, None, None]

    def conv1x1(h, w, b):
        return jnp.einsum("bchw,oc->bohw", h, w[:, :, 0, 0]) + b[None, :, None, None]

    q = conv1x1(hn, params["wq"], params["bq"])
    k = conv1x1(hn, params["wk"], params["bk"])
    v = conv1x1(hn, params["wv"], params["bv"])
    qs = q.reshape(B, C, H * W).transpose(0, 2, 1)
    ks = k.reshape(B, C, H * W).transpose(0, 2, 1)
    vs = v.reshape(B, C, H * W).transpose(0, 2, 1)
    logits = jnp.einsum("bqc,bkc->bqk", qs, ks) / math.sqrt(C)
    attn = jax.nn.softmax(logits, axis=-1)
    o = jnp.einsum("bqk,bkc->bqc", attn, vs)
    o = o.transpose(0, 2, 1).reshape(B, C, H, W)
    o = conv1x1(o, params["wp"], params["bp"])
    return x + o


if __name__ == "__main__":
    key = jax.random.PRNGKey(0)
    kx, kp = jax.random.split(key)

    # C must be divisible by 32 (GroupNorm in the module uses num_groups=32).
    B, C, H, W = 2, 64, 16, 16
    x = jax.random.normal(kx, (B, C, H, W), jnp.float32)
    params = init_attn_block_params(kp, C)

    y = jax.block_until_ready(attn_block_forward(x, params))
    assert y.shape == (B, C, H, W), y.shape

    ref = _ref_forward(x, params)
    err = float(jnp.max(jnp.abs(y - ref)))
    # MXU operands (q/k/v, weights) are bf16 with f32 accumulation, so compare
    # against the f32 reference with a bf16-level tolerance.
    assert err < 3e-2, f"max abs error {err}"

    print("KERNEL_OK")
</pallas_src>

<mosaic_0001>
module attributes {stable_mosaic.version = 11 : i64} {
  func.func @_stats_kernel(%arg0: i32, %arg1: i32, %arg2: memref<1x256x64xf32, #tpu.memory_space<vmem>>, %arg3: memref<1x1x64xf32, #tpu.memory_space<vmem>>, %arg4: memref<1x1x64xf32, #tpu.memory_space<vmem>>) attributes {dimension_semantics = [#tpu.dimension_semantics<parallel>, #tpu.dimension_semantics<arbitrary>], iteration_bounds = array<i64: 2, 1>, scalar_prefetch = 0 : i64, scratch_operands = 0 : i64, tpu.core_type = #tpu.core_type<tc>, window_params = [{transform_indices = @transform_0, window_bounds = array<i64: 1, 256, 64>}, {transform_indices = @transform_1, window_bounds = array<i64: 1, 1, 64>}, {transform_indices = @transform_2, window_bounds = array<i64: 1, 1, 64>}]} {
    %c0_i32 = arith.constant 0 : i32
    %0 = arith.cmpi eq, %arg1, %c0_i32 : i32
    %1 = arith.extui %0 : i1 to i32
    %c0_i32_0 = arith.constant 0 : i32
    %2 = arith.cmpi ne, %1, %c0_i32_0 : i32
    scf.if %2 {
      %cst_16 = arith.constant 0.000000e+00 : f32
      %22 = vector.broadcast %cst_16 : f32 to vector<1x1x64xf32>
      %c0_17 = arith.constant 0 : index
      %c0_18 = arith.constant 0 : index
      %c0_19 = arith.constant 0 : index
      %23 = vector.load %arg3[%c0_17, %c0_18, %c0_19] : memref<1x1x64xf32, #tpu.memory_space<vmem>>, vector<1x1x64xf32>
      tpu.vector_store %arg3[%c0_17, %c0_18, %c0_19], %22 {strides = array<i32>} : memref<1x1x64xf32, #tpu.memory_space<vmem>>, vector<1x1x64xf32>,
      %cst_20 = arith.constant 0.000000e+00 : f32
      %24 = vector.broadcast %cst_20 : f32 to vector<1x1x64xf32>
      %c0_21 = arith.constant 0 : index
      %c0_22 = arith.constant 0 : index
      %c0_23 = arith.constant 0 : index
      %25 = vector.load %arg4[%c0_21, %c0_22, %c0_23] : memref<1x1x64xf32, #tpu.memory_space<vmem>>, vector<1x1x64xf32>
      tpu.vector_store %arg4[%c0_21, %c0_22, %c0_23], %24 {strides = array<i32>} : memref<1x1x64xf32, #tpu.memory_space<vmem>>, vector<1x1x64xf32>,
    } else {
    }
    %c0 = arith.constant 0 : index
    %c0_1 = arith.constant 0 : index
    %c0_2 = arith.constant 0 : index
    %3 = vector.load %arg2[%c0, %c0_1, %c0_2] : memref<1x256x64xf32, #tpu.memory_space<vmem>>, vector<1x256x64xf32>
    %4 = vector.shape_cast %3 : vector<1x256x64xf32> to vector<256x64xf32>
    %c0_3 = arith.constant 0 : index
    %c0_4 = arith.constant 0 : index
    %c0_5 = arith.constant 0 : index
    %5 = vector.load %arg3[%c0_3, %c0_4, %c0_5] : memref<1x1x64xf32, #tpu.memory_space<vmem>>, vector<1x1x64xf32>
    %6 = vector.shape_cast %5 : vector<1x1x64xf32> to vector<1x64xf32>
    %cst = arith.constant dense<0.000000e+00> : vector<64xf32>
    %7 = vector.multi_reduction <add>, %4, %cst [0] : vector<256x64xf32> to vector<64xf32>
    %8 = vector.shape_cast %7 : vector<64xf32> to vector<1x64xf32>
    %9 = arith.addf %6, %8 : vector<1x64xf32>
    %c0_6 = arith.constant 0 : index
    %c0_7 = arith.constant 0 : index
    %c0_8 = arith.constant 0 : index
    %10 = vector.load %arg3[%c0_6, %c0_7, %c0_8] : memref<1x1x64xf32, #tpu.memory_space<vmem>>, vector<1x1x64xf32>
    %11 = vector.shape_cast %10 : vector<1x1x64xf32> to vector<1x64xf32>
    %12 = vector.shape_cast %9 : vector<1x64xf32> to vector<1x1x64xf32>
    tpu.vector_store %arg3[%c0_6, %c0_7, %c0_8], %12 {strides = array<i32>} : memref<1x1x64xf32, #tpu.memory_space<vmem>>, vector<1x1x64xf32>,
    %c0_9 = arith.constant 0 : index
    %c0_10 = arith.constant 0 : index
    %c0_11 = arith.constant 0 : index
    %13 = vector.load %arg4[%c0_9, %c0_10, %c0_11] : memref<1x1x64xf32, #tpu.memory_space<vmem>>, vector<1x1x64xf32>
    %14 = vector.shape_cast %13 : vector<1x1x64xf32> to vector<1x64xf32>
    %15 = arith.mulf %4, %4 : vector<256x64xf32>
    %cst_12 = arith.constant dense<0.000000e+00> : vector<64xf32>
    %16 = vector.multi_reduction <add>, %15, %cst_12 [0] : vector<256x64xf32> to vector<64xf32>
    %17 = vector.shape_cast %16 : vector<64xf32> to vector<1x64xf32>
    %18 = arith.addf %14, %17 : vector<1x64xf32>
    %c0_13 = arith.constant 0 : index
    %c0_14 = arith.constant 0 : index
    %c0_15 = arith.constant 0 : index
    %19 = vector.load %arg4[%c0_13, %c0_14, %c0_15] : memref<1x1x64xf32, #tpu.memory_space<vmem>>, vector<1x1x64xf32>
    %20 = vector.shape_cast %19 : vector<1x1x64xf32> to vector<1x64xf32>
    %21 = vector.shape_cast %18 : vector<1x64xf32> to vector<1x1x64xf32>
    tpu.vector_store %arg4[%c0_13, %c0_14, %c0_15], %21 {strides = array<i32>} : memref<1x1x64xf32, #tpu.memory_space<vmem>>, vector<1x1x64xf32>,
    return
  }
  func.func @transform_0(%arg0: i32, %arg1: i32) -> (i32, i32, i32) {
    %c0_i32 = arith.constant 0 : i32
    %c0_i32_0 = arith.constant 0 : i32
    return %arg0, %arg1, %c0_i32 : i32, i32, i32
  }
  func.func @transform_1(%arg0: i32, %arg1: i32) -> (i32, i32, i32) {
    %c0_i32 = arith.constant 0 : i32
    %c0_i32_0 = arith.constant 0 : i32
    %c0_i32_1 = arith.constant 0 : i32
    return %arg0, %c0_i32, %c0_i32_0 : i32, i32, i32
  }
  func.func @transform_2(%arg0: i32, %arg1: i32) -> (i32, i32, i32) {
    %c0_i32 = arith.constant 0 : i32
    %c0_i32_0 = arith.constant 0 : i32
    %c0_i32_1 = arith.constant 0 : i32
    return %arg0, %c0_i32, %c0_i32_0 : i32, i32, i32
  }
}

module attributes {stable_mosaic.version = 11 : i64} {
  func.func @_norm_qkv_kernel(%arg0: i32, %arg1: i32, %arg2: memref<1x256x64xf32, #tpu.memory_space<vmem>>, %arg3: memref<1x1x64xf32, #tpu.memory_space<vmem>>, %arg4: memref<1x1x64xf32, #tpu.memory_space<vmem>>, %arg5: memref<64x64xbf16, #tpu.memory_space<vmem>>, %arg6: memref<64x64xbf16, #tpu.memory_space<vmem>>, %arg7: memref<64x64xbf16, #tpu.memory_space<vmem>>, %arg8: memref<1x64xf32, #tpu.memory_space<vmem>>, %arg9: memref<1x64xf32, #tpu.memory_space<vmem>>, %arg10: memref<1x64xf32, #tpu.memory_space<vmem>>, %arg11: memref<1x256x64xbf16, #tpu.memory_space<vmem>>, %arg12: memref<1x256x64xbf16, #tpu.memory_space<vmem>>, %arg13: memref<1x256x64xbf16, #tpu.memory_space<vmem>>) attributes {dimension_semantics = [#tpu.dimension_semantics<parallel>, #tpu.dimension_semantics<parallel>], iteration_bounds = array<i64: 2, 1>, scalar_prefetch = 0 : i64, scratch_operands = 0 : i64, tpu.core_type = #tpu.core_type<tc>, window_params = [{transform_indices = @transform_0, window_bounds = array<i64: 1, 256, 64>}, {transform_indices = @transform_1, window_bounds = array<i64: 1, 1, 64>}, {transform_indices = @transform_2, window_bounds = array<i64: 1, 1, 64>}, {pipeline_mode = #tpu.pipeline_mode<synchronous>, transform_indices = @transform_3, window_bounds = array<i64: 64, 64>}, {pipeline_mode = #tpu.pipeline_mode<synchronous>, transform_indices = @transform_4, window_bounds = array<i64: 64, 64>}, {pipeline_mode = #tpu.pipeline_mode<synchronous>, transform_indices = @transform_5, window_bounds = array<i64: 64, 64>}, {pipeline_mode = #tpu.pipeline_mode<synchronous>, transform_indices = @transform_6, window_bounds = array<i64: 1, 64>}, {pipeline_mode = #tpu.pipeline_mode<synchronous>, transform_indices = @transform_7, window_bounds = array<i64: 1, 64>}, {pipeline_mode = #tpu.pipeline_mode<synchronous>, transform_indices = @transform_8, window_bounds = array<i64: 1, 64>}, {transform_indices = @transform_9, window_bounds = array<i64: 1, 256, 64>}, {transform_indices = @transform_10, window_bounds = array<i64: 1, 256, 64>}, {transform_indices = @transform_11, window_bounds = array<i64: 1, 256, 64>}]} {
    %c0 = arith.constant 0 : index
    %c0_0 = arith.constant 0 : index
    %c0_1 = arith.constant 0 : index
    %0 = vector.load %arg2[%c0, %c0_0, %c0_1] : memref<1x256x64xf32, #tpu.memory_space<vmem>>, vector<1x256x64xf32>
    %1 = vector.shape_cast %0 : vector<1x256x64xf32> to vector<256x64xf32>
    %c0_2 = arith.constant 0 : index
    %c0_3 = arith.constant 0 : index
    %c0_4 = arith.constant 0 : index
    %2 = vector.load %arg3[%c0_2, %c0_3, %c0_4] : memref<1x1x64xf32, #tpu.memory_space<vmem>>, vector<1x1x64xf32>
    %3 = vector.shape_cast %2 : vector<1x1x64xf32> to vector<1x64xf32>
    %4 = vector.broadcast %3 : vector<1x64xf32> to vector<256x64xf32>
    %5 = arith.mulf %1, %4 : vector<256x64xf32>
    %c0_5 = arith.constant 0 : index
    %c0_6 = arith.constant 0 : index
    %c0_7 = arith.constant 0 : index
    %6 = vector.load %arg4[%c0_5, %c0_6, %c0_7] : memref<1x1x64xf32, #tpu.memory_space<vmem>>, vector<1x1x64xf32>
    %7 = vector.shape_cast %6 : vector<1x1x64xf32> to vector<1x64xf32>
    %8 = vector.broadcast %7 : vector<1x64xf32> to vector<256x64xf32>
    %9 = arith.addf %5, %8 : vector<256x64xf32>
    %10 = arith.truncf %9 : vector<256x64xf32> to vector<256x64xbf16>
    %c0_8 = arith.constant 0 : index
    %c0_9 = arith.constant 0 : index
    %11 = vector.load %arg5[%c0_8, %c0_9] : memref<64x64xbf16, #tpu.memory_space<vmem>>, vector<64x64xbf16>
    %cst = arith.constant dense<0.000000e+00> : vector<256x64xf32>
    %12 = tpu.matmul %10, %11, %cst {dimension_numbers = #tpu.dot_dimension_numbers<[1], [0], [0], [1], [0, 0, 1, 1], [], []>} : vector<256x64xbf16>, vector<64x64xbf16>, vector<256x64xf32> -> vector<256x64xf32>
    %c0_10 = arith.constant 0 : index
    %c0_11 = arith.constant 0 : index
    %13 = vector.load %arg8[%c0_10, %c0_11] : memref<1x64xf32, #tpu.memory_space<vmem>>, vector<1x64xf32>
    %14 = vector.broadcast %13 : vector<1x64xf32> to vector<256x64xf32>
    %15 = arith.addf %12, %14 : vector<256x64xf32>
    %16 = arith.truncf %15 : vector<256x64xf32> to vector<256x64xbf16>
    %c0_12 = arith.constant 0 : index
    %c0_13 = arith.constant 0 : index
    %c0_14 = arith.constant 0 : index
    %17 = vector.load %arg11[%c0_12, %c0_13, %c0_14] : memref<1x256x64xbf16, #tpu.memory_space<vmem>>, vector<1x256x64xbf16>
    %18 = vector.shape_cast %17 : vector<1x256x64xbf16> to vector<256x64xbf16>
    %19 = vector.shape_cast %16 : vector<256x64xbf16> to vector<1x256x64xbf16>
    tpu.vector_store %arg11[%c0_12, %c0_13, %c0_14], %19 {strides = array<i32>} : memref<1x256x64xbf16, #tpu.memory_space<vmem>>, vector<1x256x64xbf16>,
    %c0_15 = arith.constant 0 : index
    %c0_16 = arith.constant 0 : index
    %20 = vector.load %arg6[%c0_15, %c0_16] : memref<64x64xbf16, #tpu.memory_space<vmem>>, vector<64x64xbf16>
    %cst_17 = arith.constant dense<0.000000e+00> : vector<256x64xf32>
    %21 = tpu.matmul %10, %20, %cst_17 {dimension_numbers = #tpu.dot_dimension_numbers<[1], [0], [0], [1], [0, 0, 1, 1], [], []>} : vector<256x64xbf16>, vector<64x64xbf16>, vector<256x64xf32> -> vector<256x64xf32>
    %c0_18 = arith.constant 0 : index
    %c0_19 = arith.constant 0 : index
    %22 = vector.load %arg9[%c0_18, %c0_19] : memref<1x64xf32, #tpu.memory_space<vmem>>, vector<1x64xf32>
    %23 = vector.broadcast %22 : vector<1x64xf32> to vector<256x64xf32>
    %24 = arith.addf %21, %23 : vector<256x64xf32>
    %25 = arith.truncf %24 : vector<256x64xf32> to vector<256x64xbf16>
    %c0_20 = arith.constant 0 : index
    %c0_21 = arith.constant 0 : index
    %c0_22 = arith.constant 0 : index
    %26 = vector.load %arg12[%c0_20, %c0_21, %c0_22] : memref<1x256x64xbf16, #tpu.memory_space<vmem>>, vector<1x256x64xbf16>
    %27 = vector.shape_cast %26 : vector<1x256x64xbf16> to vector<256x64xbf16>
    %28 = vector.shape_cast %25 : vector<256x64xbf16> to vector<1x256x64xbf16>
    tpu.vector_store %arg12[%c0_20, %c0_21, %c0_22], %28 {strides = array<i32>} : memref<1x256x64xbf16, #tpu.memory_space<vmem>>, vector<1x256x64xbf16>,
    %c0_23 = arith.constant 0 : index
    %c0_24 = arith.constant 0 : index
    %29 = vector.load %arg7[%c0_23, %c0_24] : memref<64x64xbf16, #tpu.memory_space<vmem>>, vector<64x64xbf16>
    %cst_25 = arith.constant dense<0.000000e+00> : vector<256x64xf32>
    %30 = tpu.matmul %10, %29, %cst_25 {dimension_numbers = #tpu.dot_dimension_numbers<[1], [0], [0], [1], [0, 0, 1, 1], [], []>} : vector<256x64xbf16>, vector<64x64xbf16>, vector<256x64xf32> -> vector<256x64xf32>
    %c0_26 = arith.constant 0 : index
    %c0_27 = arith.constant 0 : index
    %31 = vector.load %arg10[%c0_26, %c0_27] : memref<1x64xf32, #tpu.memory_space<vmem>>, vector<1x64xf32>
    %32 = vector.broadcast %31 : vector<1x64xf32> to vector<256x64xf32>
    %33 = arith.addf %30, %32 : vector<256x64xf32>
    %34 = arith.truncf %33 : vector<256x64xf32> to vector<256x64xbf16>
    %c0_28 = arith.constant 0 : index
    %c0_29 = arith.constant 0 : index
    %c0_30 = arith.constant 0 : index
    %35 = vector.load %arg13[%c0_28, %c0_29, %c0_30] : memref<1x256x64xbf16, #tpu.memory_space<vmem>>, vector<1x256x64xbf16>
    %36 = vector.shape_cast %35 : vector<1x256x64xbf16> to vector<256x64xbf16>
    %37 = vector.shape_cast %34 : vector<256x64xbf16> to vector<1x256x64xbf16>
    tpu.vector_store %arg13[%c0_28, %c0_29, %c0_30], %37 {strides = array<i32>} : memref<1x256x64xbf16, #tpu.memory_space<vmem>>, vector<1x256x64xbf16>,
    return
  }
  func.func @transform_0(%arg0: i32, %arg1: i32) -> (i32, i32, i32) {
    %c0_i32 = arith.constant 0 : i32
    %c0_i32_0 = arith.constant 0 : i32
    return %arg0, %arg1, %c0_i32 : i32, i32, i32
  }
  func.func @transform_1(%arg0: i32, %arg1: i32) -> (i32, i32, i32) {
    %c0_i32 = arith.constant 0 : i32
    %c0_i32_0 = arith.constant 0 : i32
    %c0_i32_1 = arith.constant 0 : i32
    return %arg0, %c0_i32, %c0_i32_0 : i32, i32, i32
  }
  func.func @transform_2(%arg0: i32, %arg1: i32) -> (i32, i32, i32) {
    %c0_i32 = arith.constant 0 : i32
    %c0_i32_0 = arith.constant 0 : i32
    %c0_i32_1 = arith.constant 0 : i32
    return %arg0, %c0_i32, %c0_i32_0 : i32, i32, i32
  }
  func.func @transform_3(%arg0: i32, %arg1: i32) -> (i32, i32) {
    %c0_i32 = arith.constant 0 : i32
    %c0_i32_0 = arith.constant 0 : i32
    %c0_i32_1 = arith.constant 0 : i32
    return %c0_i32, %c0_i32_0 : i32, i32
  }
  func.func @transform_4(%arg0: i32, %arg1: i32) -> (i32, i32) {
    %c0_i32 = arith.constant 0 : i32
    %c0_i32_0 = arith.constant 0 : i32
    %c0_i32_1 = arith.constant 0 : i32
    return %c0_i32, %c0_i32_0 : i32, i32
  }
  func.func @transform_5(%arg0: i32, %arg1: i32) -> (i32, i32) {
    %c0_i32 = arith.constant 0 : i32
    %c0_i32_0 = arith.constant 0 : i32
    %c0_i32_1 = arith.constant 0 : i32
    return %c0_i32, %c0_i32_0 : i32, i32
  }
  func.func @transform_6(%arg0: i32, %arg1: i32) -> (i32, i32) {
    %c0_i32 = arith.constant 0 : i32
    %c0_i32_0 = arith.constant 0 : i32
    %c0_i32_1 = arith.constant 0 : i32
    return %c0_i32, %c0_i32_0 : i32, i32
  }
  func.func @transform_7(%arg0: i32, %arg1: i32) -> (i32, i32) {
    %c0_i32 = arith.constant 0 : i32
    %c0_i32_0 = arith.constant 0 : i32
    %c0_i32_1 = arith.constant 0 : i32
    return %c0_i32, %c0_i32_0 : i32, i32
  }
  func.func @transform_8(%arg0: i32, %arg1: i32) -> (i32, i32) {
    %c0_i32 = arith.constant 0 : i32
    %c0_i32_0 = arith.constant 0 : i32
    %c0_i32_1 = arith.constant 0 : i32
    return %c0_i32, %c0_i32_0 : i32, i32
  }
  func.func @transform_9(%arg0: i32, %arg1: i32) -> (i32, i32, i32) {
    %c0_i32 = arith.constant 0 : i32
    %c0_i32_0 = arith.constant 0 : i32
    return %arg0, %arg1, %c0_i32 : i32, i32, i32
  }
  func.func @transform_10(%arg0: i32, %arg1: i32) -> (i32, i32, i32) {
    %c0_i32 = arith.constant 0 : i32
    %c0_i32_0 = arith.constant 0 : i32
    return %arg0, %arg1, %c0_i32 : i32, i32, i32
  }
  func.func @transform_11(%arg0: i32, %arg1: i32) -> (i32, i32, i32) {
    %c0_i32 = arith.constant 0 : i32
    %c0_i32_0 = arith.constant 0 : i32
    return %arg0, %arg1, %c0_i32 : i32, i32, i32
  }
}

module attributes {stable_mosaic.version = 11 : i64} {
  func.func @_flash_proj_kernel(%arg0: i32, %arg1: i32, %arg2: i32, %arg3: memref<1x256x64xbf16, #tpu.memory_space<vmem>>, %arg4: memref<1x256x64xbf16, #tpu.memory_space<vmem>>, %arg5: memref<1x256x64xbf16, #tpu.memory_space<vmem>>, %arg6: memref<1x256x64xf32, #tpu.memory_space<vmem>>, %arg7: memref<64x64xbf16, #tpu.memory_space<vmem>>, %arg8: memref<1x64xf32, #tpu.memory_space<vmem>>, %arg9: memref<1x256x64xf32, #tpu.memory_space<vmem>>, %arg10: memref<256x128xf32, #tpu.memory_space<vmem>>, %arg11: memref<256x128xf32, #tpu.memory_space<vmem>>, %arg12: memref<256x64xf32, #tpu.memory_space<vmem>>) attributes {dimension_semantics = [#tpu.dimension_semantics<parallel>, #tpu.dimension_semantics<parallel>, #tpu.dimension_semantics<arbitrary>], iteration_bounds = array<i64: 2, 1, 1>, scalar_prefetch = 0 : i64, scratch_operands = 3 : i64, tpu.core_type = #tpu.core_type<tc>, window_params = [{transform_indices = @transform_0, window_bounds = array<i64: 1, 256, 64>}, {transform_indices = @transform_1, window_bounds = array<i64: 1, 256, 64>}, {transform_indices = @transform_2, window_bounds = array<i64: 1, 256, 64>}, {transform_indices = @transform_3, window_bounds = array<i64: 1, 256, 64>}, {pipeline_mode = #tpu.pipeline_mode<synchronous>, transform_indices = @transform_4, window_bounds = array<i64: 64, 64>}, {pipeline_mode = #tpu.pipeline_mode<synchronous>, transform_indices = @transform_5, window_bounds = array<i64: 1, 64>}, {transform_indices = @transform_6, window_bounds = array<i64: 1, 256, 64>}]} {
    %c0_i32 = arith.constant 0 : i32
    %0 = arith.cmpi eq, %arg2, %c0_i32 : i32
    %1 = arith.extui %0 : i1 to i32
    %c0_i32_0 = arith.constant 0 : i32
    %2 = arith.cmpi ne, %1, %c0_i32_0 : i32
    scf.if %2 {
      %cst_26 = arith.constant 0xFF800000 : f32
      %38 = vector.broadcast %cst_26 : f32 to vector<256x128xf32>
      %c0_27 = arith.constant 0 : index
      %c0_28 = arith.constant 0 : index
      %39 = vector.load %arg10[%c0_27, %c0_28] : memref<256x128xf32, #tpu.memory_space<vmem>>, vector<256x128xf32>
      tpu.vector_store %arg10[%c0_27, %c0_28], %38 {strides = array<i32>} : memref<256x128xf32, #tpu.memory_space<vmem>>, vector<256x128xf32>,
      %cst_29 = arith.constant 0.000000e+00 : f32
      %40 = vector.broadcast %cst_29 : f32 to vector<256x128xf32>
      %c0_30 = arith.constant 0 : index
      %c0_31 = arith.constant 0 : index
      %41 = vector.load %arg11[%c0_30, %c0_31] : memref<256x128xf32, #tpu.memory_space<vmem>>, vector<256x128xf32>
      tpu.vector_store %arg11[%c0_30, %c0_31], %40 {strides = array<i32>} : memref<256x128xf32, #tpu.memory_space<vmem>>, vector<256x128xf32>,
      %cst_32 = arith.constant 0.000000e+00 : f32
      %42 = vector.broadcast %cst_32 : f32 to vector<256x64xf32>
      %c0_33 = arith.constant 0 : index
      %c0_34 = arith.constant 0 : index
      %43 = vector.load %arg12[%c0_33, %c0_34] : memref<256x64xf32, #tpu.memory_space<vmem>>, vector<256x64xf32>
      tpu.vector_store %arg12[%c0_33, %c0_34], %42 {strides = array<i32>} : memref<256x64xf32, #tpu.memory_space<vmem>>, vector<256x64xf32>,
    } else {
    }
    %c0 = arith.constant 0 : index
    %c0_1 = arith.constant 0 : index
    %c0_2 = arith.constant 0 : index
    %3 = vector.load %arg3[%c0, %c0_1, %c0_2] : memref<1x256x64xbf16, #tpu.memory_space<vmem>>, vector<1x256x64xbf16>
    %4 = vector.shape_cast %3 : vector<1x256x64xbf16> to vector<256x64xbf16>
    %c0_3 = arith.constant 0 : index
    %c0_4 = arith.constant 0 : index
    %c0_5 = arith.constant 0 : index
    %5 = vector.load %arg4[%c0_3, %c0_4, %c0_5] : memref<1x256x64xbf16, #tpu.memory_space<vmem>>, vector<1x256x64xbf16>
    %6 = vector.shape_cast %5 : vector<1x256x64xbf16> to vector<256x64xbf16>
    %cst = arith.constant dense<0.000000e+00> : vector<256x256xf32>
    %7 = tpu.matmul %4, %6, %cst {dimension_numbers = #tpu.dot_dimension_numbers<[1], [1], [0], [0], [0, 0, 1, 0], [], []>} : vector<256x64xbf16>, vector<256x64xbf16>, vector<256x256xf32> -> vector<256x256xf32>
    %c0_6 = arith.constant 0 : index
    %c0_7 = arith.constant 0 : index
    %8 = vector.load %arg10[%c0_6, %c0_7] : memref<256x128xf32, #tpu.memory_space<vmem>>, vector<256x128xf32>
    %cst_8 = arith.constant dense<0xFF800000> : vector<256xf32>
    %9 = vector.multi_reduction <maximumf>, %7, %cst_8 [1] : vector<256x256xf32> to vector<256xf32>
    %10 = vector.shape_cast %9 : vector<256xf32> to vector<256x1xf32>
    %11 = vector.broadcast %10 : vector<256x1xf32> to vector<256x128xf32>
    %12 = arith.maximumf %8, %11 : vector<256x128xf32>
    %13 = arith.subf %8, %12 : vector<256x128xf32>
    %14 = math.exp %13 : vector<256x128xf32>
    %15 = tpu.concatenate %12, %12 in 1 : vector<256x128xf32>, vector<256x128xf32> -> vector<256x256xf32>
    %16 = arith.subf %7, %15 : vector<256x256xf32>
    %17 = math.exp %16 : vector<256x256xf32>
    %c0_9 = arith.constant 0 : index
    %c0_10 = arith.constant 0 : index
    %18 = vector.load %arg11[%c0_9, %c0_10] : memref<256x128xf32, #tpu.memory_space<vmem>>, vector<256x128xf32>
    %19 = arith.mulf %14, %18 : vector<256x128xf32>
    %cst_11 = arith.constant dense<0.000000e+00> : vector<256xf32>
    %20 = vector.multi_reduction <add>, %17, %cst_11 [1] : vector<256x256xf32> to vector<256xf32>
    %21 = vector.shape_cast %20 : vector<256xf32> to vector<256x1xf32>
    %22 = vector.broadcast %21 : vector<256x1xf32> to vector<256x128xf32>
    %23 = arith.addf %19, %22 : vector<256x128xf32>
    %c0_12 = arith.constant 0 : index
    %c0_13 = arith.constant 0 : index
    %24 = vector.load %arg11[%c0_12, %c0_13] : memref<256x128xf32, #tpu.memory_space<vmem>>, vector<256x128xf32>
    tpu.vector_store %arg11[%c0_12, %c0_13], %23 {strides = array<i32>} : memref<256x128xf32, #tpu.memory_space<vmem>>, vector<256x128xf32>,
    %25 = vector.extract_strided_slice %14 {offsets = [0, 0], sizes = [256, 64], strides = [1, 1]} : vector<256x128xf32> to vector<256x64xf32>
    %c0_14 = arith.constant 0 : index
    %c0_15 = arith.constant 0 : index
    %26 = vector.load %arg12[%c0_14, %c0_15] : memref<256x64xf32, #tpu.memory_space<vmem>>, vector<256x64xf32>
    %27 = arith.mulf %25, %26 : vector<256x64xf32>
    %28 = arith.truncf %17 : vector<256x256xf32> to vector<256x256xbf16>
    %c0_16 = arith.constant 0 : index
    %c0_17 = arith.constant 0 : index
    %c0_18 = arith.constant 0 : index
    %29 = vector.load %arg5[%c0_16, %c0_17, %c0_18] : memref<1x256x64xbf16, #tpu.memory_space<vmem>>, vector<1x256x64xbf16>
    %30 = vector.shape_cast %29 : vector<1x256x64xbf16> to vector<256x64xbf16>
    %cst_19 = arith.constant dense<0.000000e+00> : vector<256x64xf32>
    %31 = tpu.matmul %28, %30, %cst_19 {dimension_numbers = #tpu.dot_dimension_numbers<[1], [0], [0], [1], [0, 0, 1, 1], [], []>} : vector<256x256xbf16>, vector<256x64xbf16>, vector<256x64xf32> -> vector<256x64xf32>
    %32 = arith.addf %27, %31 : vector<256x64xf32>
    %c0_20 = arith.constant 0 : index
    %c0_21 = arith.constant 0 : index
    %33 = vector.load %arg12[%c0_20, %c0_21] : memref<256x64xf32, #tpu.memory_space<vmem>>, vector<256x64xf32>
    tpu.vector_store %arg12[%c0_20, %c0_21], %32 {strides = array<i32>} : memref<256x64xf32, #tpu.memory_space<vmem>>, vector<256x64xf32>,
    %c0_22 = arith.constant 0 : index
    %c0_23 = arith.constant 0 : index
    %34 = vector.load %arg10[%c0_22, %c0_23] : memref<256x128xf32, #tpu.memory_space<vmem>>, vector<256x128xf32>
    tpu.vector_store %arg10[%c0_22, %c0_23], %12 {strides = array<i32>} : memref<256x128xf32, #tpu.memory_space<vmem>>, vector<256x128xf32>,
    %c0_i32_24 = arith.constant 0 : i32
    %35 = arith.cmpi eq, %arg2, %c0_i32_24 : i32
    %36 = arith.extui %35 : i1 to i32
    %c0_i32_25 = arith.constant 0 : i32
    %37 = arith.cmpi ne, %36, %c0_i32_25 : i32
    scf.if %37 {
      %c0_26 = arith.constant 0 : index
      %c0_27 = arith.constant 0 : index
      %38 = vector.load %arg11[%c0_26, %c0_27] : memref<256x128xf32, #tpu.memory_space<vmem>>, vector<256x128xf32>
      %39 = tpu.reciprocal %38 {approx = true} : vector<256x128xf32> -> vector<256x128xf32>
      %c0_28 = arith.constant 0 : index
      %c0_29 = arith.constant 0 : index
      %40 = vector.load %arg12[%c0_28, %c0_29] : memref<256x64xf32, #tpu.memory_space<vmem>>, vector<256x64xf32>
      %41 = vector.extract_strided_slice %39 {offsets = [0, 0], sizes = [256, 64], strides = [1, 1]} : vector<256x128xf32> to vector<256x64xf32>
      %42 = arith.mulf %40, %41 : vector<256x64xf32>
      %43 = arith.truncf %42 : vector<256x64xf32> to vector<256x64xbf16>
      %c0_30 = arith.constant 0 : index
      %c0_31 = arith.constant 0 : index
      %44 = vector.load %arg7[%c0_30, %c0_31] : memref<64x64xbf16, #tpu.memory_space<vmem>>, vector<64x64xbf16>
      %cst_32 = arith.constant dense<0.000000e+00> : vector<256x64xf32>
      %45 = tpu.matmul %43, %44, %cst_32 {dimension_numbers = #tpu.dot_dimension_numbers<[1], [0], [0], [1], [0, 0, 1, 1], [], []>} : vector<256x64xbf16>, vector<64x64xbf16>, vector<256x64xf32> -> vector<256x64xf32>
      %c0_33 = arith.constant 0 : index
      %c0_34 = arith.constant 0 : index
      %46 = vector.load %arg8[%c0_33, %c0_34] : memref<1x64xf32, #tpu.memory_space<vmem>>, vector<1x64xf32>
      %47 = vector.broadcast %46 : vector<1x64xf32> to vector<256x64xf32>
      %48 = arith.addf %45, %47 : vector<256x64xf32>
      %c0_35 = arith.constant 0 : index
      %c0_36 = arith.constant 0 : index
      %c0_37 = arith.constant 0 : index
      %49 = vector.load %arg6[%c0_35, %c0_36, %c0_37] : memref<1x256x64xf32, #tpu.memory_space<vmem>>, vector<1x256x64xf32>
      %50 = vector.shape_cast %49 : vector<1x256x64xf32> to vector<256x64xf32>
      %51 = arith.addf %48, %50 : vector<256x64xf32>
      %c0_38 = arith.constant 0 : index
      %c0_39 = arith.constant 0 : index
      %c0_40 = arith.constant 0 : index
      %52 = vector.load %arg9[%c0_38, %c0_39, %c0_40] : memref<1x256x64xf32, #tpu.memory_space<vmem>>, vector<1x256x64xf32>
      %53 = vector.shape_cast %52 : vector<1x256x64xf32> to vector<256x64xf32>
      %54 = vector.shape_cast %51 : vector<256x64xf32> to vector<1x256x64xf32>
      tpu.vector_store %arg9[%c0_38, %c0_39, %c0_40], %54 {strides = array<i32>} : memref<1x256x64xf32, #tpu.memory_space<vmem>>, vector<1x256x64xf32>,
    } else {
    }
    return
  }
  func.func @transform_0(%arg0: i32, %arg1: i32, %arg2: i32) -> (i32, i32, i32) {
    %c0_i32 = arith.constant 0 : i32
    %c0_i32_0 = arith.constant 0 : i32
    return %arg0, %arg1, %c0_i32 : i32, i32, i32
  }
  func.func @transform_1(%arg0: i32, %arg1: i32, %arg2: i32) -> (i32, i32, i32) {
    %c0_i32 = arith.constant 0 : i32
    %c0_i32_0 = arith.constant 0 : i32
    return %arg0, %arg2, %c0_i32 : i32, i32, i32
  }
  func.func @transform_2(%arg0: i32, %arg1: i32, %arg2: i32) -> (i32, i32, i32) {
    %c0_i32 = arith.constant 0 : i32
    %c0_i32_0 = arith.constant 0 : i32
    return %arg0, %arg2, %c0_i32 : i32, i32, i32
  }
  func.func @transform_3(%arg0: i32, %arg1: i32, %arg2: i32) -> (i32, i32, i32) {
    %c0_i32 = arith.constant 0 : i32
    %c0_i32_0 = arith.constant 0 : i32
    return %arg0, %arg1, %c0_i32 : i32, i32, i32
  }
  func.func @transform_4(%arg0: i32, %arg1: i32, %arg2: i32) -> (i32, i32) {
    %c0_i32 = arith.constant 0 : i32
    %c0_i32_0 = arith.constant 0 : i32
    %c0_i32_1 = arith.constant 0 : i32
    return %c0_i32, %c0_i32_0 : i32, i32
  }
  func.func @transform_5(%arg0: i32, %arg1: i32, %arg2: i32) -> (i32, i32) {
    %c0_i32 = arith.constant 0 : i32
    %c0_i32_0 = arith.constant 0 : i32
    %c0_i32_1 = arith.constant 0 : i32
    return %c0_i32, %c0_i32_0 : i32, i32
  }
  func.func @transform_6(%arg0: i32, %arg1: i32, %arg2: i32) -> (i32, i32, i32) {
    %c0_i32 = arith.constant 0 : i32
    %c0_i32_0 = arith.constant 0 : i32
    return %arg0, %arg1, %c0_i32 : i32, i32, i32
  }
}

</mosaic_0001>

<bundles_post_ra>
// kernel: attn_block_forward.3
= control target key start
LH: loop header
LB: loop body
LE: loop exit
PB: predicated region body
PF: predicated region fallthrough
CT: control target
= control target key end

     0   :  { %8 = vsyncpa [#allocation3], 0  ;;  %s908_s0 = inlined_call_operand.hbm [shape: f32[2,256,64], index: 0, kind: input, shape index: {}]   ;;  %s909_s1 = inlined_call_operand.vmem [shape: f32[2,1,64], index: 1, kind: output, shape index: {0}]   ;;  %s910_s2 = inlined_call_operand.vmem [shape: f32[2,1,64], index: 2, kind: output, shape index: {1}]  }
   0x1   :  { %10 = vsyncpa [#allocation3 + $0x1], 0  ;;  %s669_s9 = smov 0   ;;  %s671_s10 = smov 0  }
   0x2   :  { %s673_s11 = smov 0   ;;  %s675_s12 = smov 0  }
   0x3   :  { %s677_s13 = smov 0   ;;  %s679_s14 = smov 0  }
   0x4 LB: > { %s498_s15 = sadd.s32 4294967295, %s648_s14   ;;  %s28_s16 = sadd.s32 1, %s644_s13  ;;  %s648_s14 = sphi %s679_s14, %s16_s14   ;;  %s644_s13 = sphi %s677_s13, %s918_s13   ;;  %s640_s12 = sphi %s675_s12, %s917_s12   ;;  %s636_s11 = sphi %s673_s11, %s916_s11   ;;  %s632_s10 = sphi %s671_s10, %s915_s10   ;;  %s628_s9 = sphi %s669_s9, %s914_s9  }
   0x5   : > { %p30_p0 = scmp.ge.s32.totalorder %s28_s16, 2  ;;  %s37_s17 = sadd.s32 1, %s636_s11 }
   0x6   : > { %p44_p1 = scmp.ne.s32.totalorder %s636_s11, %s632_s10  ;;  %p45_p2 = scmp.eq.s32.totalorder %s648_s14, 0 }
   0x7   : > { %s920_s16 = smov (%p30_p0, %s28_s16), 0  ;;  %p50_p4 = scmp.ne.s32.totalorder %s632_s10, %s628_s9 }
   0x8   : > { %p705_p3 = por %p45_p2, %p44_p1  ;;  %s32_s19 = ssub.s32 %s644_s13, %s920_s16 }
   0x9   : > { %p51_p5 = scmp.eq.s32.totalorder %s498_s15, 0  ;;  %p35_p6 = scmp.eq.s32.totalorder %s32_s19, 0 }
   0xa   : > { %p516_p8 = scmp.lt.s32.totalorder %s648_s14, 2  ;;  %s126_s22 = sand.u32 1, %s636_s11  }
   0xb   : > { %p712_p7 = por %p51_p5, %p50_p4  ;;  %s509_s23 = sshll.u32 %s644_s13, 12 }
   0xc   : > { %s718_s21 = scalar_select %p35_p6, %s636_s11, %s37_s17  }
   0xd   : > { %s502_s24 = sshll.u32 %s126_s22, 8  ;;  %s725_s27 = scalar_lea.hbm %s908_s0, %s509_s23 }
   0xe   : > { %s130_s28 = scalar_lea.vmem [#allocation2], %s502_s24  ;;  %p729_p9 = pnand %p516_p8, %p705_p3 }
   0xf   : > { %s139_s29 = sshll.u32 %s130_s28, 4  ;;  %s735_s3 = scalar_lea.sflag [#allocation3], %s126_s22  ;;  %s733_s29 = int_to_ptr.vmem [resolvable:$true] %s139_s29 }
  0x10   : > { %s568_s4 = scalar_lea.hbm %s725_s27, 4096  ;;  %p570_p11 = pneg %p729_p9 }
  0x11   : > { %p569_p10 = scmp.ne.s32.totalorder %s725_s27, %s568_s4  ;;  %s573_s7 = scalar_lea.hbm %s908_s0, 8192 }
  0x12   : > { %p574_p0 = scmp.lt.u32.totalorder %s725_s27, %s908_s0  ;;  %p575_p1 = scmp.lt.u32.totalorder %s573_s7, %s568_s4 }
  0x13   : > { %p571_p12 = pnand %p570_p11, %p569_p10  ;;  %p577_p3 = scmp.lt.u32.totalorder %s568_s4, %s725_s27 }
  0x14   : > { %p576_p2 = por %p575_p1, %p574_p0 }
  0x15   : > { %p572_p13 = pneg %p571_p12 }
  0x16   : > { %p578_p4 = por %p577_p3, %p576_p2 }
  0x18   : > { %p579_p5 = pnand %p578_p4, %p572_p13 }
  0x1a   : > { %582 = shalt.err (!%p579_p5)
}
  0x1b   : > { %s583_s15 = scalar_lea.vmem %s733_s29, 4096  ;;  %s650_s17 = smov [#allocation2]  }
  0x1c   : > { %p584_p6 = scmp.ne.s32.totalorder %s733_s29, %s583_s15  ;;  %s588_s18 = sshll.u32 %s650_s17, 4  ;;  %s589_s18 = int_to_ptr.vmem [resolvable:$false] %s588_s18 }
  0x1d   : > { %s590_s19 = scalar_lea.vmem %s589_s18, 8192  ;;  %p591_p12 = scmp.lt.s32.totalorder %s733_s29, %s589_s18 }
  0x1e   : > { %p586_p8 = pnand %p584_p6, %p570_p11  ;;  %p592_p0 = scmp.lt.s32.totalorder %s590_s19, %s583_s15 }
  0x20   : > { %p587_p10 = pneg %p586_p8  ;;  %p593_p1 = por %p592_p0, %p591_p12 }
  0x22   : > { %p594_p2 = pnand %p593_p1, %p587_p10 }
  0x24   : > { %597 = shalt.err (!%p594_p2)
}
  0x25   : > { %s651_s22 = smov 128   ;;  %s652_s23 = smov 8  }
  0x26   : > { %515 = dma.hbm_to_vmem [thread:$0]  (!%p729_p9), %s725_s27, 4096, %s733_s29, %s735_s3, %s651_s22, %s651_s22, %s652_s23  }
  0x27   : > { %p505_p11 = scmp.ge.s32.totalorder %s648_s14, 1  ;;  %p147_p13 = scmp.lt.s32.totalorder %s648_s14, 3 }
  0x29   : > { %p148_p3 = pnand %p505_p11, %p147_p13 }
  0x2a   : > { %s153_s24 = sand.u32 (!%p148_p3), 1, %s632_s10  }
  0x2b   : > { %151 = sbr.rel (%p148_p3) target bundleno = 135 (0x87), region = 24  ;;  %s506_s25 = sshll.u32 (!%p148_p3), %s153_s24, 8 }
  0x2c   : > { %s154_s26 = scalar_lea.sflag (!%p148_p3), [#allocation3], %s153_s24  ;;  %s766_s28 = scalar_lea.vmem (!%p148_p3), [#allocation2], %s506_s25 }
  0x32   : > { %623 = dma.done.wait (%p712_p7), %s154_s26, 4096  }
  0x33   : > { %625 = vsyncadd (%p712_p7), %s154_s26, 4294963200  ;;  %p180_p9 = scmp.lt.s32.totalorder %s640_s12, 1  ;;  %vm190_vm0 = vcmask 516096   ;;  %v653_v0 = vmov 0.0   ;;  %vm226_vm1 = vcmask 523264   ;;  %v193_v1 = vld [vmem:[%s766_s28] sm:$0xff] }
  0x34   : > { %v194_v2 = vld [vmem:[%s766_s28 + $0x8] sm:$0xff]  ;;  %v195_v3 = vld [vmem:[%s766_s28 + $0x10] sm:$0xff]  ;;  %v227_v4 = vsel %vm226_vm1, %v193_v1, 0.0  ;;  %v196_v7 = vld [vmem:[%s766_s28 + $0x18] sm:$0xff]  ;;  %v300_v28 = vmul.f32 %v193_v1, %v193_v1 }
  0x35   : > { %s922_s12 = smov (!%p180_p9, %s640_s12), 1  ;;  %v228_v5 = vsel %vm226_vm1, %v194_v2, 0.0  ;;  %v230_v6 = vsel %vm226_vm1, %v195_v3, 0.0  ;;  %v232_v9 = vsel %vm226_vm1, %v196_v7, 0.0  ;;  %v197_v10 = vld [vmem:[%s766_s28 + $0x20] sm:$0xff]  ;;  %v198_v13 = vld [vmem:[%s766_s28 + $0x28] sm:$0xff]  ;;  %v301_v29 = vmul.f32 %v194_v2, %v194_v2 }
  0x36   : > { %s777_s30 = scalar_lea.vmem %s909_s1, %s922_s12  ;;  %s782_s20 = scalar_lea.vmem %s910_s2, %s922_s12  ;;  %v229_v8 = vadd.f32 %v228_v5, %v227_v4  ;;  %v234_v12 = vsel %vm226_vm1, %v197_v10, 0.0  ;;  %v236_v15 = vsel %vm226_vm1, %v198_v13, 0.0  ;;  %v199_v16 = vld [vmem:[%s766_s28 + $0x30] sm:$0xff]  ;;  %v200_v19 = vld [vmem:[%s766_s28 + $0x38] sm:$0xff]  ;;  %v201_v22 = vld [vmem:[%s766_s28 + $0x40] sm:$0xff]  ;;  %v302_v30 = vmul.f32 %v195_v3, %v195_v3 }
  0x37   : > { %191 = vst.msk [vmem:[%s777_s30] sm:$0x1] %vm190_vm0, %v653_v0  ;;  %192 = vst.msk [vmem:[%s782_s20] sm:$0x1] %vm190_vm0, %v653_v0  ;;  %v238_v18 = vsel %vm226_vm1, %v199_v16, 0.0  ;;  %v240_v21 = vsel %vm226_vm1, %v200_v19, 0.0  ;;  %v303_v35 = vmul.f32 %v196_v7, %v196_v7  ;;  %v304_v38 = vmul.f32 %v197_v10, %v197_v10 }
  0x38   : > { %v231_v11 = vadd.f32 %v230_v6, %v229_v8  ;;  %v242_v24 = vsel %vm226_vm1, %v201_v22, 0.0  ;;  %v202_v25 = vld [vmem:[%s766_s28 + $0x48] sm:$0xff]  ;;  %v203_v31 = vld [vmem:[%s766_s28 + $0x50] sm:$0xff]  ;;  %v204_v33 = vld [vmem:[%s766_s28 + $0x58] sm:$0xff]  ;;  %v332_v39 = vsel %vm226_vm1, %v300_v28, 0.0  ;;  %v333_v40 = vsel %vm226_vm1, %v301_v29, 0.0 }
  0x39   : > { %v244_v27 = vsel %vm226_vm1, %v202_v25, 0.0  ;;  %v246_v34 = vsel %vm226_vm1, %v203_v31, 0.0  ;;  %v248_v37 = vsel %vm226_vm1, %v204_v33, 0.0  ;;  %v335_v41 = vsel %vm226_vm1, %v302_v30, 0.0  ;;  %v205_v42 = vld [vmem:[%s766_s28 + $0x60] sm:$0xff]  ;;  %v206_v48 = vld [vmem:[%s766_s28 + $0x68] sm:$0xff] }
  0x3a   : > { %v233_v14 = vadd.f32 %v232_v9, %v231_v11  ;;  %v334_v44 = vadd.f32 %v333_v40, %v332_v39  ;;  %v250_v45 = vsel %vm226_vm1, %v205_v42, 0.0  ;;  %v305_v46 = vmul.f32 %v198_v13, %v198_v13  ;;  %v207_v54 = vld [vmem:[%s766_s28 + $0x70] sm:$0xff]  ;;  %v208_v60 = vld [vmem:[%s766_s28 + $0x78] sm:$0xff]  ;;  %v209_v2 = vld [vmem:[%s766_s28 + $0x80] sm:$0xff] }
  0x3b   : > { %v337_v47 = vsel %vm226_vm1, %v303_v35, 0.0  ;;  %v252_v51 = vsel %vm226_vm1, %v206_v48, 0.0  ;;  %v306_v52 = vmul.f32 %v199_v16, %v199_v16  ;;  %v339_v53 = vsel %vm226_vm1, %v304_v38, 0.0  ;;  %v210_v8 = vld [vmem:[%s766_s28 + $0x88] sm:$0xff]  ;;  %v215_v38 = vld [vmem:[%s766_s28 + $0xb0] sm:$0xff] }
  0x3c   : > { %v235_v17 = vadd.f32 %v234_v12, %v233_v14  ;;  %v336_v50 = vadd.f32 %v335_v41, %v334_v44  ;;  %v254_v57 = vsel %vm226_vm1, %v207_v54, 0.0  ;;  %v307_v58 = vmul.f32 %v200_v19, %v200_v19  ;;  %v211_v14 = vld [vmem:[%s766_s28 + $0x90] sm:$0xff]  ;;  %v216_v44 = vld [vmem:[%s766_s28 + $0xb8] sm:$0xff] }
  0x3d   : > { %v341_v59 = vsel %vm226_vm1, %v305_v46, 0.0  ;;  %v256_v63 = vsel %vm226_vm1, %v208_v60, 0.0  ;;  %v308_v0 = vmul.f32 %v201_v22, %v201_v22  ;;  %v343_v1 = vsel %vm226_vm1, %v306_v52, 0.0 }
  0x3e   : > { %v237_v20 = vadd.f32 %v236_v15, %v235_v17  ;;  %v338_v56 = vadd.f32 %v337_v47, %v336_v50  ;;  %v258_v5 = vsel %vm226_vm1, %v209_v2, 0.0  ;;  %v309_v6 = vmul.f32 %v202_v25, %v202_v25  ;;  %v217_v50 = vld [vmem:[%s766_s28 + $0xc0] sm:$0xff] }
  0x3f   : > { %v345_v7 = vsel %vm226_vm1, %v307_v58, 0.0  ;;  %v260_v11 = vsel %vm226_vm1, %v210_v8, 0.0  ;;  %v310_v12 = vmul.f32 %v203_v31, %v203_v31  ;;  %v347_v13 = vsel %vm226_vm1, %v308_v0, 0.0 }
  0x40   : > { %v239_v23 = vadd.f32 %v238_v18, %v237_v20  ;;  %v340_v62 = vadd.f32 %v339_v53, %v338_v56  ;;  %v262_v17 = vsel %vm226_vm1, %v211_v14, 0.0  ;;  %v311_v18 = vmul.f32 %v204_v33, %v204_v33  ;;  %v212_v20 = vld [vmem:[%s766_s28 + $0x98] sm:$0xff]  ;;  %v218_v56 = vld [vmem:[%s766_s28 + $0xc8] sm:$0xff] }
  0x41   : > { %v349_v19 = vsel %vm226_vm1, %v309_v6, 0.0  ;;  %v351_v25 = vsel %vm226_vm1, %v310_v12, 0.0  ;;  %v313_v30 = vmul.f32 %v206_v48, %v206_v48  ;;  %v270_v41 = vsel %vm226_vm1, %v215_v38, 0.0 }
  0x42   : > { %v241_v26 = vadd.f32 %v240_v21, %v239_v23  ;;  %v342_v4 = vadd.f32 %v341_v59, %v340_v62  ;;  %v264_v23 = vsel %vm226_vm1, %v212_v20, 0.0  ;;  %v353_v31 = vsel %vm226_vm1, %v311_v18, 0.0  ;;  %v219_v62 = vld [vmem:[%s766_s28 + $0xd0] sm:$0xff] }
  0x43   : > { %v272_v47 = vsel %vm226_vm1, %v216_v44, 0.0  ;;  %v316_v48 = vmul.f32 %v209_v2, %v209_v2  ;;  %v274_v53 = vsel %vm226_vm1, %v217_v50, 0.0  ;;  %v276_v59 = vsel %vm226_vm1, %v218_v56, 0.0 }
  0x44   : > { %v243_v32 = vadd.f32 %v242_v24, %v241_v26  ;;  %v344_v10 = vadd.f32 %v343_v1, %v342_v4  ;;  %v312_v24 = vmul.f32 %v205_v42, %v205_v42  ;;  %v213_v26 = vld [vmem:[%s766_s28 + $0xa0] sm:$0xff]  ;;  %v315_v42 = vmul.f32 %v208_v60, %v208_v60  ;;  %v220_v4 = vld [vmem:[%s766_s28 + $0xd8] sm:$0xff] }
  0x45   : > { %v266_v29 = vsel %vm226_vm1, %v213_v26, 0.0  ;;  %v318_v60 = vmul.f32 %v211_v14, %v211_v14  ;;  %v278_v1 = vsel %vm226_vm1, %v219_v62, 0.0  ;;  %v319_v2 = vmul.f32 %v212_v20, %v212_v20 }
  0x46   : > { %v245_v36 = vadd.f32 %v244_v27, %v243_v32  ;;  %v346_v16 = vadd.f32 %v345_v7, %v344_v10  ;;  %v214_v32 = vld [vmem:[%s766_s28 + $0xa8] sm:$0xff]  ;;  %v280_v7 = vsel %vm226_vm1, %v220_v4, 0.0  ;;  %v221_v10 = vld [vmem:[%s766_s28 + $0xe0] sm:$0xff]  ;;  %v322_v20 = vmul.f32 %v215_v38, %v215_v38 }
  0x47   : > { %v268_v35 = vsel %vm226_vm1, %v214_v32, 0.0  ;;  %v321_v14 = vmul.f32 %v214_v32, %v214_v32  ;;  %v324_v32 = vmul.f32 %v217_v50, %v217_v50 }
  0x48   : > { %v247_v43 = vadd.f32 %v246_v34, %v245_v36  ;;  %v348_v22 = vadd.f32 %v347_v13, %v346_v16  ;;  %v314_v36 = vmul.f32 %v207_v54, %v207_v54  ;;  %v317_v54 = vmul.f32 %v210_v8, %v210_v8  ;;  %v222_v16 = vld [vmem:[%s766_s28 + $0xe8] sm:$0xff] }
  0x49   : > { %v320_v8 = vmul.f32 %v213_v26, %v213_v26  ;;  %v282_v13 = vsel %vm226_vm1, %v221_v10, 0.0  ;;  %v323_v26 = vmul.f32 %v216_v44, %v216_v44  ;;  %v327_v44 = vmul.f32 %v220_v4, %v220_v4 }
  0x4a   : > { %v249_v49 = vadd.f32 %v248_v37, %v247_v43  ;;  %v350_v28 = vadd.f32 %v349_v19, %v348_v22  ;;  %v355_v37 = vsel %vm226_vm1, %v312_v24, 0.0  ;;  %v357_v43 = vsel %vm226_vm1, %v313_v30, 0.0  ;;  %v223_v22 = vld [vmem:[%s766_s28 + $0xf0] sm:$0xff] }
  0x4b   : > { %v284_v19 = vsel %vm226_vm1, %v222_v16, 0.0 }
  0x4c   : > { %v251_v55 = vadd.f32 %v250_v45, %v249_v49  ;;  %v352_v34 = vadd.f32 %v351_v25, %v350_v28  ;;  %v359_v49 = vsel %vm226_vm1, %v314_v36, 0.0  ;;  %v286_v25 = vsel %vm226_vm1, %v223_v22, 0.0  ;;  %v224_v28 = vld [vmem:[%s766_s28 + $0xf8] sm:$0xff] }
  0x4d   : > { %v325_v36 = vmul.f32 %v218_v56, %v218_v56  ;;  %v330_v56 = vmul.f32 %v223_v22, %v223_v22 }
  0x4e   : > { %v253_v61 = vadd.f32 %v252_v51, %v251_v55  ;;  %v354_v40 = vadd.f32 %v353_v31, %v352_v34  ;;  %v361_v55 = vsel %vm226_vm1, %v315_v42, 0.0  ;;  %v288_v31 = vsel %vm226_vm1, %v224_v28, 0.0 }
  0x50   : > { %v255_v3 = vadd.f32 %v254_v57, %v253_v61  ;;  %v356_v46 = vadd.f32 %v355_v37, %v354_v40  ;;  %v363_v61 = vsel %vm226_vm1, %v316_v48, 0.0  ;;  %v377_v37 = vsel %vm226_vm1, %v323_v26, 0.0 }
  0x51   : > { %v326_v40 = vmul.f32 %v219_v62, %v219_v62  ;;  %v328_v48 = vmul.f32 %v221_v10, %v221_v10 }
  0x52   : > { %v257_v9 = vadd.f32 %v256_v63, %v255_v3  ;;  %v358_v52 = vadd.f32 %v357_v43, %v356_v46  ;;  %v365_v3 = vsel %vm226_vm1, %v317_v54, 0.0 }
  0x54   : > { %v259_v15 = vadd.f32 %v258_v5, %v257_v9  ;;  %v360_v58 = vadd.f32 %v359_v49, %v358_v52  ;;  %v367_v9 = vsel %vm226_vm1, %v318_v60, 0.0  ;;  %v383_v49 = vsel %vm226_vm1, %v326_v40, 0.0  ;;  %v225_v60 = vld [vmem:[%s777_s30] sm:$0x1] }
  0x55   : > { %v329_v52 = vmul.f32 %v222_v16, %v222_v16 }
  0x56   : > { %v261_v21 = vadd.f32 %v260_v11, %v259_v15  ;;  %v362_v0 = vadd.f32 %v361_v55, %v360_v58  ;;  %v369_v15 = vsel %vm226_vm1, %v319_v2, 0.0 }
  0x57   : > { %v389_v62 = vsel %vm226_vm1, %v329_v52, 0.0 }
  0x58   : > { %v263_v27 = vadd.f32 %v262_v17, %v261_v21  ;;  %v364_v6 = vadd.f32 %v363_v61, %v362_v0  ;;  %v371_v21 = vsel %vm226_vm1, %v320_v8, 0.0  ;;  %v331_v61 = vmul.f32 %v224_v28, %v224_v28 }
  0x5a   : > { %v265_v33 = vadd.f32 %v264_v23, %v263_v27  ;;  %v366_v12 = vadd.f32 %v365_v3, %v364_v6  ;;  %v373_v27 = vsel %vm226_vm1, %v321_v14, 0.0  ;;  %v393_v4 = vsel %vm226_vm1, %v331_v61, 0.0 }
  0x5c   : > { %v267_v39 = vadd.f32 %v266_v29, %v265_v33  ;;  %v368_v18 = vadd.f32 %v367_v9, %v366_v12  ;;  %v375_v33 = vsel %vm226_vm1, %v322_v20, 0.0  ;;  %v299_v12 = vld [vmem:[%s782_s20] sm:$0x1] }
  0x5e   : > { %v269_v45 = vadd.f32 %v268_v35, %v267_v39  ;;  %v370_v24 = vadd.f32 %v369_v15, %v368_v18 }
  0x60   : > { %v271_v51 = vadd.f32 %v270_v41, %v269_v45  ;;  %v372_v30 = vadd.f32 %v371_v21, %v370_v24  ;;  %v379_v41 = vsel %vm226_vm1, %v324_v32, 0.0  ;;  %v381_v45 = vsel %vm226_vm1, %v325_v36, 0.0 }
  0x62   : > { %v273_v57 = vadd.f32 %v272_v47, %v271_v51  ;;  %v374_v35 = vadd.f32 %v373_v27, %v372_v30 }
  0x64   : > { %v275_v63 = vadd.f32 %v274_v53, %v273_v57  ;;  %v376_v39 = vadd.f32 %v375_v33, %v374_v35  ;;  %v385_v53 = vsel %vm226_vm1, %v327_v44, 0.0  ;;  %v387_v57 = vsel %vm226_vm1, %v328_v48, 0.0 }
  0x66   : > { %v277_v5 = vadd.f32 %v276_v59, %v275_v63  ;;  %v378_v43 = vadd.f32 %v377_v37, %v376_v39 }
  0x68   : > { %v279_v11 = vadd.f32 %v278_v1, %v277_v5  ;;  %v380_v47 = vadd.f32 %v379_v41, %v378_v43  ;;  %v391_v1 = vsel %vm226_vm1, %v330_v56, 0.0 }
  0x6a   : > { %v281_v17 = vadd.f32 %v280_v7, %v279_v11  ;;  %v382_v51 = vadd.f32 %v381_v45, %v380_v47 }
  0x6c   : > { %v283_v23 = vadd.f32 %v282_v13, %v281_v17  ;;  %v384_v55 = vadd.f32 %v383_v49, %v382_v51 }
  0x6e   : > { %v285_v29 = vadd.f32 %v284_v19, %v283_v23  ;;  %v386_v59 = vadd.f32 %v385_v53, %v384_v55 }
  0x70   : > { %v287_v34 = vadd.f32 %v286_v25, %v285_v29  ;;  %v388_v0 = vadd.f32 %v387_v57, %v386_v59 }
  0x72   : > { %v289_v38 = vadd.f32 %v288_v31, %v287_v34  ;;  %v390_v3 = vadd.f32 %v389_v62, %v388_v0 }
  0x74   : > { %v290_v42 = vrot.slane %v289_v38, 4  ;;  %v392_v5 = vadd.f32 %v391_v1, %v390_v3 }
  0x76   : > { %v291_v46 = vadd.f32 %v290_v42, %v289_v38  ;;  %v394_v6 = vadd.f32 %v393_v4, %v392_v5 }
  0x78   : > { %v292_v50 = vrot.slane %v291_v46, 2  ;;  %v395_v7 = vrot.slane %v394_v6, 4 }
  0x7a   : > { %v293_v54 = vadd.f32 %v292_v50, %v291_v46  ;;  %v396_v8 = vadd.f32 %v395_v7, %v394_v6 }
  0x7c   : > { %v294_v58 = vrot.slane %v293_v54, 1  ;;  %v397_v9 = vrot.slane %v396_v8, 2 }
  0x7e   : > { %v295_v63 = vadd.f32 %v294_v58, %v293_v54  ;;  %v398_v10 = vadd.f32 %v397_v9, %v396_v8 }
  0x80   : > { %v296_v2 = vadd.f32 %v295_v63, %v225_v60  ;;  %v399_v11 = vrot.slane %v398_v10, 1 }
  0x82   : > { %298 = vst.msk [vmem:[%s777_s30] sm:$0x1] %vm190_vm0, %v296_v2  ;;  %v400_v13 = vadd.f32 %v399_v11, %v398_v10 }
  0x84   : > { %v401_v14 = vadd.f32 %v400_v13, %v299_v12 }
  0x86   : > { %402 = vst.msk [vmem:[%s782_s20] sm:$0x1] %vm190_vm0, %v401_v14 }
  0x87 PF: > { %s16_s14 = sadd.s32 1, %s648_s14   ;;  %s914_s9 = smov %s632_s10 }
  0x88   : > { %p13_p7 = scmp.ge.s32.totalorder %s16_s14, 4   ;;  %s915_s10 = smov %s636_s11 }
  0x89   : > { %s916_s11 = smov %s718_s21  ;;  %s917_s12 = smov %s644_s13 }
  0x8a   : > { %s918_s13 = smov %s920_s16  ;;  %15 = sbr.rel (!%p13_p7) target bundleno = 4 (0x4), region = 80 }
  0x91   :  { %432 = vsyncpa [#allocation3], 1 }
  0x92   :  { %434 = vsyncpa [#allocation3 + $0x1], 1 }

// kernel: attn_block_forward.4
= control target key start
LH: loop header
LB: loop body
LE: loop exit
PB: predicated region body
PF: predicated region fallthrough
CT: control target
= control target key end

     0   :  { %s2547_s17 = smov 0   ;;  %s2549_s18 = smov 0   ;;  %s3148_s0 = inlined_call_operand.vmem [shape: f32[2,256,64], index: 0, kind: input, shape index: {}]   ;;  %s3149_s1 = inlined_call_operand.vmem [shape: f32[2,1,64], index: 1, kind: input, shape index: {}]   ;;  %s3150_s2 = inlined_call_operand.vmem [shape: f32[2,1,64], index: 2, kind: input, shape index: {}]   ;;  %s3151_s3 = inlined_call_operand.vmem [shape: bf16[64,64], index: 3, kind: input, shape index: {}]   ;;  %s3152_s4 = inlined_call_operand.vmem [shape: bf16[64,64], index: 4, kind: input, shape index: {}]   ;;  %s3153_s5 = inlined_call_operand.vmem [shape: bf16[64,64], index: 5, kind: input, shape index: {}]   ;;  %s3154_s6 = inlined_call_operand.vmem [shape: f32[1,64], index: 6, kind: input, shape index: {}]   ;;  %s3155_s7 = inlined_call_operand.vmem [shape: f32[1,64], index: 7, kind: input, shape index: {}]   ;;  %s3156_s8 = inlined_call_operand.vmem [shape: f32[1,64], index: 8, kind: input, shape index: {}]   ;;  %s3157_s9 = inlined_call_operand.vmem [shape: bf16[2,256,64], index: 9, kind: output, shape index: {0}]   ;;  %s3158_s10 = inlined_call_operand.vmem [shape: bf16[2,256,64], index: 10, kind: output, shape index: {1}]   ;;  %s3159_s11 = inlined_call_operand.vmem [shape: bf16[2,256,64], index: 11, kind: output, shape index: {2}]  }
   0x1   :  { %s2551_s19 = smov 0  }
   0x2 LB: > { %s34_s20 = sadd.s32 1, %s2481_s18  ;;  %p1967_p0 = scmp.ge.s32.totalorder %s2485_s19, 1  ;;  %s2485_s19 = sphi %s2551_s19, %s22_s19   ;;  %s2481_s18 = sphi %s2549_s18, %s3161_s18   ;;  %s2477_s17 = sphi %s2547_s17, %s3160_s17  }
   0x3   : > { %p36_p1 = scmp.ge.s32.totalorder %s34_s20, 2  ;;  %p383_p2 = scmp.lt.s32.totalorder %s2485_s19, 3 }
   0x5   : > { %s3163_s20 = smov (%p36_p1, %s34_s20), 0  ;;  %p384_p3 = pnand %p1967_p0, %p383_p2 }
   0x6   : > { %v2451_v0 = vld [vmem:[%s3151_s3] sm:$0xff] (!%p384_p3)   ;;  %p456_p4 = scmp.lt.s32.totalorder (!%p384_p3), %s2477_s17, 1  ;;  %v2452_v1 = vld [vmem:[%s3151_s3 + $0x8] sm:$0xff] (!%p384_p3)   ;;  %v2453_v2 = vld [vmem:[%s3151_s3 + $0x10] sm:$0xff] (!%p384_p3)   ;;  %vm667_vm0 = vcmask (!%p384_p3), 523264   ;;  %vm1005_vm1 = vcmask (!%p384_p3), 519168  }
   0x7   : > { %387 = sbr.rel (%p384_p3) target bundleno = 335 (0x14f), region = 56  ;;  %2299 = vmatprep.subr.bf16.mxu0 (!%p384_p3), %v2451_v0  ;;  %2419 = vmatprep.subr.bf16.mxu1 (!%p384_p3), %v2451_v0  ;;  %v2454_v4 = vld [vmem:[%s3151_s3 + $0x18] sm:$0xff] (!%p384_p3)   ;;  %v2455_v34 = vld [vmem:[%s3152_s4] sm:$0xff] (!%p384_p3)   ;;  %v2457_v55 = vld [vmem:[%s3152_s4 + $0x8] sm:$0xff] (!%p384_p3)  }
   0x8   : > { %2300 = vmatpush3.bf16.msra.mxu0 (!%p384_p3), %v2451_v0  ;;  %2423 = vmatpush3.bf16.msra.mxu1 (!%p384_p3), %v2451_v0  ;;  %v2456_v39 = vld [vmem:[%s3153_s5] sm:$0xff] (!%p384_p3)   ;;  %v2458_v59 = vld [vmem:[%s3153_s5 + $0x8] sm:$0xff] (!%p384_p3)  }
   0x9   : > { %2301 = vmatprep.subr.bf16.mxu0 (!%p384_p3), %v2452_v1  ;;  %2420 = vmatprep.subr.bf16.mxu1 (!%p384_p3), %v2452_v1 }
   0xc   : > { %2302 = vmatpush3.bf16.msra.mxu0 (!%p384_p3), %v2452_v1  ;;  %2424 = vmatpush3.bf16.msra.mxu1 (!%p384_p3), %v2452_v1 }
   0xd   : > { %2303 = vmatprep.subr.bf16.mxu0 (!%p384_p3), %v2453_v2  ;;  %2421 = vmatprep.subr.bf16.mxu1 (!%p384_p3), %v2453_v2 }
   0xe   : > { %s3165_s17 = smov (!%p456_p4, %s2477_s17), 1 }
   0xf   : > { %s2139_s27 = sshll.u32 %s3165_s17, 8  ;;  %s467_s30 = scalar_lea.vmem %s3149_s1, %s3165_s17 }
  0x10   : > { %s2584_s14 = scalar_lea.vmem %s3148_s0, %s2139_s27  ;;  %s470_s21 = scalar_lea.vmem %s3150_s2, %s3165_s17  ;;  %v2590_v3 = vld [vmem:[%s467_s30] ss:$0 sm:$0xff]  ;;  %2304 = vmatpush3.bf16.msra.mxu0 %v2453_v2  ;;  %2425 = vmatpush3.bf16.msra.mxu1 %v2453_v2 }
  0x11   : > { %v502_v5 = vld [vmem:[%s2584_s14] sm:$0xff]  ;;  %v503_v6 = vld [vmem:[%s2584_s14 + $0x8] sm:$0xff]  ;;  %v504_v12 = vld [vmem:[%s2584_s14 + $0x10] sm:$0xff]  ;;  %2305 = vmatprep.subr.bf16.mxu0 %v2454_v4  ;;  %2422 = vmatprep.subr.bf16.mxu1 %v2454_v4  ;;  %s2821_s27 = sshll.u32 %s3165_s17, 7 }
  0x12   : > { %v2597_v7 = vld [vmem:[%s470_s21] ss:$0 sm:$0xff]  ;;  %v541_v8 = vmul.f32 %v2590_v3, %v502_v5  ;;  %v542_v9 = vmul.f32 %v2590_v3, %v503_v6  ;;  %v519_v11 = vld [vmem:[%s2584_s14 + $0x88] sm:$0xff]  ;;  %v505_v15 = vld [vmem:[%s2584_s14 + $0x18] sm:$0xff]  ;;  %v543_v16 = vmul.f32 %v2590_v3, %v504_v12  ;;  %s2829_s30 = scalar_lea.vmem %s3157_s9, %s2821_s27  ;;  %s2941_s22 = scalar_lea.vmem %s3158_s10, %s2821_s27 }
  0x13   : > { %v518_v10 = vld [vmem:[%s2584_s14 + $0x80] sm:$0xff]  ;;  %v558_v14 = vmul.f32 %v2590_v3, %v519_v11  ;;  %v520_v17 = vld [vmem:[%s2584_s14 + $0x90] sm:$0xff]  ;;  %v521_v18 = vld [vmem:[%s2584_s14 + $0x98] sm:$0xff]  ;;  %v544_v21 = vmul.f32 %v2590_v3, %v505_v15  ;;  %s2947_s25 = scalar_lea.vmem %s3159_s11, %s2821_s27 }
  0x14   : > { %v557_v13 = vmul.f32 %v2590_v3, %v518_v10  ;;  %v580_v19 = vadd.f32 %v2597_v7, %v541_v8  ;;  %v581_v20 = vadd.f32 %v2597_v7, %v542_v9  ;;  %v559_v22 = vmul.f32 %v2590_v3, %v520_v17  ;;  %v506_v23 = vld [vmem:[%s2584_s14 + $0x20] sm:$0xff]  ;;  %v507_v28 = vld [vmem:[%s2584_s14 + $0x28] sm:$0xff]  ;;  %v508_v35 = vld [vmem:[%s2584_s14 + $0x30] sm:$0xff]  ;;  %2306 = vmatpush3.bf16.msra.mxu0 %v2454_v4 }
  0x15   : > { %v597_v25 = vadd.f32 %v2597_v7, %v558_v14  ;;  %v582_v26 = vadd.f32 %v2597_v7, %v543_v16  ;;  %v560_v27 = vmul.f32 %v2590_v3, %v521_v18  ;;  %v522_v29 = vld [vmem:[%s2584_s14 + $0xa0] sm:$0xff]  ;;  %v523_v30 = vld [vmem:[%s2584_s14 + $0xa8] sm:$0xff]  ;;  %v583_v32 = vadd.f32 %v2597_v7, %v544_v21  ;;  %v509_v36 = vld [vmem:[%s2584_s14 + $0x38] sm:$0xff]  ;;  %2426 = vmatpush3.bf16.msra.mxu1 %v2454_v4 }
  0x16   : > { %v596_v24 = vadd.f32 %v2597_v7, %v557_v13  ;;  %v2622_v31 = vpack.c.bf16 %v581_v20, %v580_v19  ;;  %v598_v33 = vadd.f32 %v2597_v7, %v559_v22  ;;  %v545_v40 = vmul.f32 %v2590_v3, %v506_v23  ;;  %v524_v45 = vld [vmem:[%s2584_s14 + $0xb0] sm:$0xff]  ;;  %v525_v50 = vld [vmem:[%s2584_s14 + $0xb8] sm:$0xff]  ;;  %v510_v51 = vld [vmem:[%s2584_s14 + $0x40] sm:$0xff]  ;;  %2339 = vmatprep.subr.bf16.mxu1 %v2455_v34 }
  0x17   : > { %v599_v38 = vadd.f32 %v2597_v7, %v560_v27  ;;  %v2640_v41 = vpack.c.bf16 %v583_v32, %v582_v26  ;;  %v546_v42 = vmul.f32 %v2590_v3, %v507_v28  ;;  %v561_v43 = vmul.f32 %v2590_v3, %v522_v29  ;;  %v511_v56 = vld [vmem:[%s2584_s14 + $0x48] sm:$0xff]  ;;  %2379 = vmatprep.subr.bf16.mxu0 %v2456_v39  ;;  %v526_v60 = vld [vmem:[%s2584_s14 + $0xc0] sm:$0xff]  ;;  %v512_v6 = vld [vmem:[%s2584_s14 + $0x50] sm:$0xff] }
  0x18   : > { %v2631_v37 = vpack.c.bf16 %v597_v25, %v596_v24  ;;  %2307 = vmatprep.mubr.msk.bf16.mxu0 %vm667_vm0, %v2622_v31  ;;  %v562_v44 = vmul.f32 %v2590_v3, %v523_v30  ;;  %v584_v47 = vadd.f32 %v2597_v7, %v545_v40  ;;  %v547_v48 = vmul.f32 %v2590_v3, %v508_v35  ;;  %v527_v1 = vld [vmem:[%s2584_s14 + $0xc8] sm:$0xff]  ;;  %v513_v8 = vld [vmem:[%s2584_s14 + $0x58] sm:$0xff]  ;;  %v528_v12 = vld [vmem:[%s2584_s14 + $0xd0] sm:$0xff] }
  0x19   : > { %v2648_v46 = vpack.c.bf16 %v599_v38, %v598_v33  ;;  %v548_v49 = vmul.f32 %v2590_v3, %v509_v36  ;;  %v585_v52 = vadd.f32 %v2597_v7, %v546_v42  ;;  %v600_v53 = vadd.f32 %v2597_v7, %v561_v43  ;;  %2308 = vmatmul.mubr.msk.bf16.vlgmr.msra.gmra.mrb[0].mxu0 %vm667_vm0, %v2640_v41  ;;  %v529_v13 = vld [vmem:[%s2584_s14 + $0xd8] sm:$0xff]  ;;  %v2459_v16 = vld [vmem:[%s3152_s4 + $0x10] sm:$0xff]   ;;  %v514_v18 = vld [vmem:[%s2584_s14 + $0x60] sm:$0xff] }
  0x1a   : > { %2323 = vmatprep.mubr.msk.bf16.mxu1 %vm667_vm0, %v2631_v37  ;;  %v601_v54 = vadd.f32 %v2597_v7, %v562_v44  ;;  %v586_v57 = vadd.f32 %v2597_v7, %v547_v48  ;;  %v563_v58 = vmul.f32 %v2590_v3, %v524_v45  ;;  %v564_v63 = vmul.f32 %v2590_v3, %v525_v50  ;;  %v2460_v17 = vld [vmem:[%s3153_s5 + $0x10] sm:$0xff]   ;;  %v515_v22 = vld [vmem:[%s2584_s14 + $0x68] sm:$0xff]  ;;  %v530_v27 = vld [vmem:[%s2584_s14 + $0xe0] sm:$0xff] }
  0x1b   : > { %v2668_v61 = vpack.c.bf16 %v585_v52, %v584_v47  ;;  %v549_v0 = vmul.f32 %v2590_v3, %v510_v51  ;;  %2324 = vmatmul.mubr.msk.bf16.vlgmr.msra.gmra.mrb[0].mxu1 %vm667_vm0, %v2648_v46  ;;  %v587_v2 = vadd.f32 %v2597_v7, %v548_v49  ;;  %v550_v5 = vmul.f32 %v2590_v3, %v511_v56  ;;  %v531_v32 = vld [vmem:[%s2584_s14 + $0xe8] sm:$0xff]  ;;  %v2462_v40 = vld [vmem:[%s3153_s5 + $0x18] sm:$0xff]   ;;  %v516_v45 = vld [vmem:[%s2584_s14 + $0x70] sm:$0xff] }
  0x1c   : > { %v2670_v62 = vpack.c.bf16 %v601_v54, %v600_v53  ;;  %v602_v4 = vadd.f32 %v2597_v7, %v563_v58  ;;  %2340 = vmatpush3.bf16.msra.mxu1 %v2455_v34  ;;  %2380 = vmatpush3.bf16.msra.mxu0 %v2456_v39  ;;  %v603_v9 = vadd.f32 %v2597_v7, %v564_v63  ;;  %v2461_v39 = vld [vmem:[%s3152_s4 + $0x18] sm:$0xff]   ;;  %v532_v51 = vld [vmem:[%s2584_s14 + $0xf0] sm:$0xff] }
  0x1d   : > { %v588_v10 = vadd.f32 %v2597_v7, %v549_v0  ;;  %v565_v11 = vmul.f32 %v2590_v3, %v526_v60  ;;  %2311 = vmatprep.mubr.msk.bf16.mxu0 %vm667_vm0, %v2668_v61  ;;  %v589_v14 = vadd.f32 %v2597_v7, %v550_v5  ;;  %v566_v15 = vmul.f32 %v2590_v3, %v527_v1  ;;  %v517_v50 = vld [vmem:[%s2584_s14 + $0x78] sm:$0xff] }
  0x1e   : > { %2327 = vmatprep.mubr.msk.bf16.mxu1 %vm667_vm0, %v2670_v62  ;;  %2341 = vmatprep.subr.bf16.mxu1 %v2457_v55  ;;  %v551_v20 = vmul.f32 %v2590_v3, %v512_v6  ;;  %v552_v21 = vmul.f32 %v2590_v3, %v513_v8  ;;  %v2706_v23 = vpack.c.bf16 %v587_v2, %v586_v57  ;;  %v533_v52 = vld [vmem:[%s2584_s14 + $0xf8] sm:$0xff] }
  0x1f   : > { %2381 = vmatprep.subr.bf16.mxu0 %v2458_v59  ;;  %v604_v19 = vadd.f32 %v2597_v7, %v565_v11  ;;  %v2708_v24 = vpack.c.bf16 %v603_v9, %v602_v4  ;;  %v605_v25 = vadd.f32 %v2597_v7, %v566_v15  ;;  %v567_v26 = vmul.f32 %v2590_v3, %v528_v12 }
  0x20   : > { %2342 = vmatpush3.bf16.msra.mxu1 %v2457_v55  ;;  %2382 = vmatpush3.bf16.msra.mxu0 %v2458_v59  ;;  %v2713_v28 = vpack.c.bf16 %v589_v14, %v588_v10  ;;  %v568_v29 = vmul.f32 %v2590_v3, %v529_v13  ;;  %v553_v30 = vmul.f32 %v2590_v3, %v514_v18 }
  0x21   : > { %v2718_v33 = vpack.c.bf16 %v605_v25, %v604_v19  ;;  %2343 = vmatprep.subr.bf16.mxu1 %v2459_v16  ;;  %2383 = vmatprep.subr.bf16.mxu0 %v2460_v17  ;;  %v554_v34 = vmul.f32 %v2590_v3, %v515_v22  ;;  %v590_v35 = vadd.f32 %v2597_v7, %v551_v20 }
  0x22   : > { %v591_v36 = vadd.f32 %v2597_v7, %v552_v21  ;;  %v569_v38 = vmul.f32 %v2590_v3, %v530_v27  ;;  %2312 = vmatmul.mubr.msk.bf16.gmra.mrb[4].mxu0 %vm667_vm0, %v2706_v23  ;;  %v606_v42 = vadd.f32 %v2597_v7, %v567_v26  ;;  %v607_v43 = vadd.f32 %v2597_v7, %v568_v29 }
  0x23   : > { %2328 = vmatmul.mubr.msk.bf16.gmra.mrb[4].mxu1 %vm667_vm0, %v2708_v24  ;;  %v570_v44 = vmul.f32 %v2590_v3, %v531_v32  ;;  %2315 = vmatprep.mubr.msk.bf16.mxu0 %vm667_vm0, %v2713_v28  ;;  %v592_v47 = vadd.f32 %v2597_v7, %v553_v30  ;;  %v593_v48 = vadd.f32 %v2597_v7, %v554_v34 }
  0x24   : > { %2331 = vmatprep.mubr.msk.bf16.mxu1 %vm667_vm0, %v2718_v33  ;;  %v608_v49 = vadd.f32 %v2597_v7, %v569_v38  ;;  %2344 = vmatpush3.bf16.msra.mxu1 %v2459_v16  ;;  %v617_v54 = vpack.c.bf16 %v591_v36, %v590_v35  ;;  %v555_v55 = vmul.f32 %v2590_v3, %v516_v45 }
  0x25   : > { %2384 = vmatpush3.bf16.msra.mxu0 %v2460_v17  ;;  %v609_v53 = vadd.f32 %v2597_v7, %v570_v44  ;;  %2345 = vmatprep.subr.bf16.mxu1 %v2461_v39  ;;  %v625_v56 = vpack.c.bf16 %v607_v43, %v606_v42  ;;  %v556_v57 = vmul.f32 %v2590_v3, %v517_v50 }
  0x26   : > { %2385 = vmatprep.subr.bf16.mxu0 %v2462_v40  ;;  %v571_v58 = vmul.f32 %v2590_v3, %v532_v51  ;;  %v572_v59 = vmul.f32 %v2590_v3, %v533_v52  ;;  %v618_v60 = vpack.c.bf16 %v593_v48, %v592_v47  ;;  %v594_v0 = vadd.f32 %v2597_v7, %v555_v55 }
  0x27   : > { %v626_v63 = vpack.c.bf16 %v609_v53, %v608_v49  ;;  %v595_v1 = vadd.f32 %v2597_v7, %v556_v57 }
  0x28   : > { %2346 = vmatpush3.bf16.msra.mxu1 %v2461_v39  ;;  %v610_v2 = vadd.f32 %v2597_v7, %v571_v58  ;;  %v611_v4 = vadd.f32 %v2597_v7, %v572_v59  ;;  %v2818_v7 = vld [vmem:[%s3154_s6] ss:$0 sm:$0xff] }
  0x29   : > { %2386 = vmatpush3.bf16.msra.mxu0 %v2462_v40  ;;  %v619_v3 = vpack.c.bf16 %v595_v1, %v594_v0 }
  0x2a   : > { %2316 = vmatmul.mubr.msk.bf16.gmra.mrb[8].mxu0 %vm667_vm0, %v617_v54  ;;  %v627_v5 = vpack.c.bf16 %v611_v4, %v610_v2 }
  0x2b   : > { %2332 = vmatmul.mubr.msk.bf16.gmra.mrb[8].mxu1 %vm667_vm0, %v625_v56  ;;  %2319 = vmatprep.mubr.msk.bf16.mxu0 %vm667_vm0, %v618_v60 }
  0x2c   : > { %2335 = vmatprep.mubr.msk.bf16.mxu1 %vm667_vm0, %v626_v63 }
  0x32   : > { %2320 = vmatmul.mubr.msk.bf16.gmra.mrb[12].mxu0 %vm667_vm0, %v619_v3 }
  0x33   : > { %2336 = vmatmul.mubr.msk.bf16.gmra.mrb[12].mxu1 %vm667_vm0, %v627_v5  ;;  %2387 = vmatprep.mubr.msk.bf16.mxu0 %vm667_vm0, %v2622_v31 }
  0x34   : > { %2347 = vmatprep.mubr.msk.bf16.mxu1 %vm667_vm0, %v2622_v31 }
  0x3a   : > { %2388 = vmatmul.mubr.msk.bf16.vlgmr.msra.gmra.mrb[16].mxu0 %vm667_vm0, %v2640_v41 }
  0x3b   : > { %2348 = vmatmul.mubr.msk.bf16.vlgmr.msra.gmra.mrb[16].mxu1 %vm667_vm0, %v2640_v41  ;;  %2391 = vmatprep.mubr.msk.bf16.mxu0 %vm667_vm0, %v2668_v61 }
  0x3c   : > { %2351 = vmatprep.mubr.msk.bf16.mxu1 %vm667_vm0, %v2668_v61 }
  0x42   : > { %2392 = vmatmul.mubr.msk.bf16.gmra.mrb[20].mxu0 %vm667_vm0, %v2706_v23 }
  0x43   : > { %2352 = vmatmul.mubr.msk.bf16.gmra.mrb[20].mxu1 %vm667_vm0, %v2706_v23  ;;  %2395 = vmatprep.mubr.msk.bf16.mxu0 %vm667_vm0, %v2713_v28 }
  0x44   : > { %2355 = vmatprep.mubr.msk.bf16.mxu1 %vm667_vm0, %v2713_v28 }
  0x4a   : > { %2396 = vmatmul.mubr.msk.bf16.gmra.mrb[24].mxu0 %vm667_vm0, %v617_v54 }
  0x4b   : > { %2356 = vmatmul.mubr.msk.bf16.gmra.mrb[24].mxu1 %vm667_vm0, %v617_v54  ;;  %2399 = vmatprep.mubr.msk.bf16.mxu0 %vm667_vm0, %v618_v60 }
  0x4c   : > { %2359 = vmatprep.mubr.msk.bf16.mxu1 %vm667_vm0, %v618_v60 }
  0x52   : > { %2400 = vmatmul.mubr.msk.bf16.gmra.mrb[28].mxu0 %vm667_vm0, %v619_v3 }
  0x53   : > { %2360 = vmatmul.mubr.msk.bf16.gmra.mrb[28].mxu1 %vm667_vm0, %v619_v3  ;;  %2403 = vmatprep.mubr.msk.bf16.mxu0 %vm667_vm0, %v2631_v37 }
  0x54   : > { %2363 = vmatprep.mubr.msk.bf16.mxu1 %vm667_vm0, %v2631_v37 }
  0x5a   : > { %2404 = vmatmul.mubr.msk.bf16.gmra.mrb[32].mxu0 %vm667_vm0, %v2648_v46 }
  0x5b   : > { %2364 = vmatmul.mubr.msk.bf16.gmra.mrb[32].mxu1 %vm667_vm0, %v2648_v46  ;;  %2407 = vmatprep.mubr.msk.bf16.mxu0 %vm667_vm0, %v2670_v62 }
  0x5c   : > { %2367 = vmatprep.mubr.msk.bf16.mxu1 %vm667_vm0, %v2670_v62 }
  0x62   : > { %2408 = vmatmul.mubr.msk.bf16.gmra.mrb[36].mxu0 %vm667_vm0, %v2708_v24 }
  0x63   : > { %2368 = vmatmul.mubr.msk.bf16.gmra.mrb[36].mxu1 %vm667_vm0, %v2708_v24  ;;  %2411 = vmatprep.mubr.msk.bf16.mxu0 %vm667_vm0, %v2718_v33 }
  0x64   : > { %2371 = vmatprep.mubr.msk.bf16.mxu1 %vm667_vm0, %v2718_v33 }
  0x6a   : > { %2412 = vmatmul.mubr.msk.bf16.gmra.mrb[40].mxu0 %vm667_vm0, %v625_v56 }
  0x6b   : > { %2372 = vmatmul.mubr.msk.bf16.gmra.mrb[40].mxu1 %vm667_vm0, %v625_v56  ;;  %2415 = vmatprep.mubr.msk.bf16.mxu0 %vm667_vm0, %v626_v63 }
  0x6c   : > { %2375 = vmatprep.mubr.msk.bf16.mxu1 %vm667_vm0, %v626_v63 }
  0x72   : > { %2416 = vmatmul.mubr.msk.bf16.gmra.mrb[44].mxu0 %vm667_vm0, %v627_v5 }
  0x73   : > { %2376 = vmatmul.mubr.msk.bf16.gmra.mrb[44].mxu1 %vm667_vm0, %v627_v5 }
  0xec   : > { %v2309_v31 = vpop.f32.mrb[0].mxu0 }
  0xed   : > { %v759_v41 = vadd.f32 %v2309_v31, %v2818_v7  ;;  %v750_v61 = vpop.f32.mrb[1].mxu0 }
  0xee   : > { %v2325_v37 = vpop.f32.mrb[0].mxu1  ;;  %v751_v6 = vadd.f32 %v2818_v7, %v750_v61  ;;  %v2310_v9 = vpop.f32.mrb[2].mxu0 }
  0xef   : > { %v823_v46 = vadd.f32 %v2325_v37, %v2818_v7  ;;  %v814_v62 = vpop.f32.mrb[1].mxu1  ;;  %v2145_v11 = vpack.c.bf16 %v759_v41, %v759_v41  ;;  %v762_v13 = vadd.f32 %v2310_v9, %v2818_v7  ;;  %v753_v15 = vpop.f32.mrb[3].mxu0 }
  0xf0   : > { %v815_v8 = vadd.f32 %v2818_v7, %v814_v62  ;;  %v2326_v10 = vpop.f32.mrb[2].mxu1  ;;  %v2143_v17 = vpack.c.bf16 %v751_v6, %v751_v6  ;;  %v754_v19 = vadd.f32 %v2818_v7, %v753_v15 }
  0xf1   : > { %v2161_v12 = vpack.c.bf16 %v823_v46, %v823_v46  ;;  %v826_v14 = vadd.f32 %v2326_v10, %v2818_v7  ;;  %v817_v16 = vpop.f32.mrb[3].mxu1  ;;  %1008 = vst.msk [vmem:[%s2829_s30 + $0x8] sm:$0xf] %vm1005_vm1, %v2145_v11  ;;  %v2146_v21 = vpack.c.bf16 %v762_v13, %v762_v13 }
  0xf2   : > { %v2159_v18 = vpack.c.bf16 %v815_v8, %v815_v8  ;;  %v818_v20 = vadd.f32 %v2818_v7, %v817_v16  ;;  %1006 = vst.msk [vmem:[%s2829_s30] sm:$0xf] %vm1005_vm1, %v2143_v17  ;;  %v2144_v23 = vpack.c.bf16 %v754_v19, %v754_v19 }
  0xf3   : > { %1024 = vst.msk [vmem:[%s2829_s30 + $0x48] sm:$0xf] %vm1005_vm1, %v2161_v12  ;;  %v2162_v22 = vpack.c.bf16 %v826_v14, %v826_v14  ;;  %1009 = vst.msk [vmem:[%s2829_s30 + $0xc] sm:$0xf] %vm1005_vm1, %v2146_v21 }
  0xf4   : > { %1022 = vst.msk [vmem:[%s2829_s30 + $0x40] sm:$0xf] %vm1005_vm1, %v2159_v18  ;;  %v2160_v24 = vpack.c.bf16 %v818_v20, %v818_v20  ;;  %1007 = vst.msk [vmem:[%s2829_s30 + $0x4] sm:$0xf] %vm1005_vm1, %v2144_v23 }
  0xf5   : > { %1025 = vst.msk [vmem:[%s2829_s30 + $0x4c] sm:$0xf] %vm1005_vm1, %v2162_v22  ;;  %v2313_v25 = vpop.f32.mrb[4].mxu0 }
  0xf6   : > { %1023 = vst.msk [vmem:[%s2829_s30 + $0x44] sm:$0xf] %vm1005_vm1, %v2160_v24  ;;  %v2329_v26 = vpop.f32.mrb[4].mxu1  ;;  %v775_v27 = vadd.f32 %v2313_v25, %v2818_v7  ;;  %v766_v29 = vpop.f32.mrb[5].mxu0 }
  0xf7   : > { %v839_v28 = vadd.f32 %v2329_v26, %v2818_v7  ;;  %v830_v30 = vpop.f32.mrb[5].mxu1  ;;  %v767_v32 = vadd.f32 %v2818_v7, %v766_v29  ;;  %v2314_v34 = vpop.f32.mrb[6].mxu0 }
  0xf8   : > { %v831_v33 = vadd.f32 %v2818_v7, %v830_v30  ;;  %v2330_v35 = vpop.f32.mrb[6].mxu1  ;;  %v2149_v36 = vpack.c.bf16 %v775_v27, %v775_v27  ;;  %v778_v39 = vadd.f32 %v2314_v34, %v2818_v7  ;;  %v769_v42 = vpop.f32.mrb[7].mxu0 }
  0xf9   : > { %v2165_v38 = vpack.c.bf16 %v839_v28, %v839_v28  ;;  %v842_v40 = vadd.f32 %v2330_v35, %v2818_v7  ;;  %v833_v43 = vpop.f32.mrb[7].mxu1  ;;  %v2147_v44 = vpack.c.bf16 %v767_v32, %v767_v32  ;;  %v770_v47 = vadd.f32 %v2818_v7, %v769_v42  ;;  %v2920_v35 = vld [vmem:[%s3155_s7] ss:$0 sm:$0xff] }
  0xfa   : > { %v2163_v45 = vpack.c.bf16 %v831_v33, %v831_v33  ;;  %v834_v48 = vadd.f32 %v2818_v7, %v833_v43  ;;  %1012 = vst.msk [vmem:[%s2829_s30 + $0x18] sm:$0xf] %vm1005_vm1, %v2149_v36  ;;  %v2150_v49 = vpack.c.bf16 %v778_v39, %v778_v39 }
  0xfb   : > { %1028 = vst.msk [vmem:[%s2829_s30 + $0x58] sm:$0xf] %vm1005_vm1, %v2165_v38  ;;  %v2166_v50 = vpack.c.bf16 %v842_v40, %v842_v40  ;;  %1010 = vst.msk [vmem:[%s2829_s30 + $0x10] sm:$0xf] %vm1005_vm1, %v2147_v44  ;;  %v2148_v51 = vpack.c.bf16 %v770_v47, %v770_v47 }
  0xfc   : > { %1026 = vst.msk [vmem:[%s2829_s30 + $0x50] sm:$0xf] %vm1005_vm1, %v2163_v45  ;;  %v2164_v52 = vpack.c.bf16 %v834_v48, %v834_v48  ;;  %1013 = vst.msk [vmem:[%s2829_s30 + $0x1c] sm:$0xf] %vm1005_vm1, %v2150_v49 }
  0xfd   : > { %1029 = vst.msk [vmem:[%s2829_s30 + $0x5c] sm:$0xf] %vm1005_vm1, %v2166_v50  ;;  %1011 = vst.msk [vmem:[%s2829_s30 + $0x14] sm:$0xf] %vm1005_vm1, %v2148_v51  ;;  %v2317_v53 = vpop.f32.mrb[8].mxu0 }
  0xfe   : > { %1027 = vst.msk [vmem:[%s2829_s30 + $0x54] sm:$0xf] %vm1005_vm1, %v2164_v52  ;;  %v2333_v54 = vpop.f32.mrb[8].mxu1  ;;  %v791_v55 = vadd.f32 %v2317_v53, %v2818_v7  ;;  %v782_v57 = vpop.f32.mrb[9].mxu0 }
  0xff   : > { %v855_v56 = vadd.f32 %v2333_v54, %v2818_v7  ;;  %v846_v58 = vpop.f32.mrb[9].mxu1  ;;  %v783_v59 = vadd.f32 %v2818_v7, %v782_v57  ;;  %v2318_v63 = vpop.f32.mrb[10].mxu0 }
 0x100   : > { %v847_v60 = vadd.f32 %v2818_v7, %v846_v58  ;;  %v2334_v0 = vpop.f32.mrb[10].mxu1  ;;  %v2153_v1 = vpack.c.bf16 %v791_v55, %v791_v55  ;;  %v794_v4 = vadd.f32 %v2318_v63, %v2818_v7  ;;  %v785_v5 = vpop.f32.mrb[11].mxu0 }
 0x101   : > { %v2169_v2 = vpack.c.bf16 %v855_v56, %v855_v56  ;;  %v858_v3 = vadd.f32 %v2334_v0, %v2818_v7  ;;  %v849_v31 = vpop.f32.mrb[11].mxu1  ;;  %v2151_v37 = vpack.c.bf16 %v783_v59, %v783_v59  ;;  %v786_v46 = vadd.f32 %v2818_v7, %v785_v5 }
 0x102   : > { %v2167_v41 = vpack.c.bf16 %v847_v60, %v847_v60  ;;  %v850_v61 = vadd.f32 %v2818_v7, %v849_v31  ;;  %1016 = vst.msk [vmem:[%s2829_s30 + $0x28] sm:$0xf] %vm1005_vm1, %v2153_v1  ;;  %v2154_v62 = vpack.c.bf16 %v794_v4, %v794_v4 }
 0x103   : > { %1032 = vst.msk [vmem:[%s2829_s30 + $0x68] sm:$0xf] %vm1005_vm1, %v2169_v2  ;;  %v2170_v6 = vpack.c.bf16 %v858_v3, %v858_v3  ;;  %1014 = vst.msk [vmem:[%s2829_s30 + $0x20] sm:$0xf] %vm1005_vm1, %v2151_v37  ;;  %v2152_v8 = vpack.c.bf16 %v786_v46, %v786_v46 }
 0x104   : > { %1030 = vst.msk [vmem:[%s2829_s30 + $0x60] sm:$0xf] %vm1005_vm1, %v2167_v41  ;;  %v2168_v9 = vpack.c.bf16 %v850_v61, %v850_v61  ;;  %1017 = vst.msk [vmem:[%s2829_s30 + $0x2c] sm:$0xf] %vm1005_vm1, %v2154_v62 }
 0x105   : > { %1033 = vst.msk [vmem:[%s2829_s30 + $0x6c] sm:$0xf] %vm1005_vm1, %v2170_v6  ;;  %1015 = vst.msk [vmem:[%s2829_s30 + $0x24] sm:$0xf] %vm1005_vm1, %v2152_v8  ;;  %v2321_v10 = vpop.f32.mrb[12].mxu0 }
 0x106   : > { %1031 = vst.msk [vmem:[%s2829_s30 + $0x64] sm:$0xf] %vm1005_vm1, %v2168_v9  ;;  %v2337_v11 = vpop.f32.mrb[12].mxu1  ;;  %v807_v12 = vadd.f32 %v2321_v10, %v2818_v7  ;;  %v798_v14 = vpop.f32.mrb[13].mxu0 }
 0x107   : > { %v871_v13 = vadd.f32 %v2337_v11, %v2818_v7  ;;  %v862_v15 = vpop.f32.mrb[13].mxu1  ;;  %v799_v16 = vadd.f32 %v2818_v7, %v798_v14  ;;  %v2322_v18 = vpop.f32.mrb[14].mxu0 }
 0x108   : > { %v863_v17 = vadd.f32 %v2818_v7, %v862_v15  ;;  %v2338_v19 = vpop.f32.mrb[14].mxu1  ;;  %v2157_v20 = vpack.c.bf16 %v807_v12, %v807_v12  ;;  %v810_v22 = vadd.f32 %v2322_v18, %v2818_v7  ;;  %v801_v24 = vpop.f32.mrb[15].mxu0 }
 0x109   : > { %v2173_v21 = vpack.c.bf16 %v871_v13, %v871_v13  ;;  %v874_v23 = vadd.f32 %v2338_v19, %v2818_v7  ;;  %v865_v25 = vpop.f32.mrb[15].mxu1  ;;  %v2155_v26 = vpack.c.bf16 %v799_v16, %v799_v16  ;;  %v802_v28 = vadd.f32 %v2818_v7, %v801_v24 }
 0x10a   : > { %v2171_v27 = vpack.c.bf16 %v863_v17, %v863_v17  ;;  %v866_v29 = vadd.f32 %v2818_v7, %v865_v25  ;;  %1020 = vst.msk [vmem:[%s2829_s30 + $0x38] sm:$0xf] %vm1005_vm1, %v2157_v20  ;;  %v2158_v30 = vpack.c.bf16 %v810_v22, %v810_v22  ;;  %v2925_v7 = vld [vmem:[%s3156_s8] ss:$0 sm:$0xff] }
 0x10b   : > { %1036 = vst.msk [vmem:[%s2829_s30 + $0x78] sm:$0xf] %vm1005_vm1, %v2173_v21  ;;  %v2174_v32 = vpack.c.bf16 %v874_v23, %v874_v23  ;;  %1018 = vst.msk [vmem:[%s2829_s30 + $0x30] sm:$0xf] %vm1005_vm1, %v2155_v26  ;;  %v2156_v33 = vpack.c.bf16 %v802_v28, %v802_v28 }
 0x10c   : > { %1034 = vst.msk [vmem:[%s2829_s30 + $0x70] sm:$0xf] %vm1005_vm1, %v2171_v27  ;;  %v2172_v34 = vpack.c.bf16 %v866_v29, %v866_v29  ;;  %1021 = vst.msk [vmem:[%s2829_s30 + $0x3c] sm:$0xf] %vm1005_vm1, %v2158_v30 }
 0x10d   : > { %1037 = vst.msk [vmem:[%s2829_s30 + $0x7c] sm:$0xf] %vm1005_vm1, %v2174_v32  ;;  %1019 = vst.msk [vmem:[%s2829_s30 + $0x34] sm:$0xf] %vm1005_vm1, %v2156_v33  ;;  %v2389_v38 = vpop.f32.mrb[16].mxu0 }
 0x10e   : > { %1035 = vst.msk [vmem:[%s2829_s30 + $0x74] sm:$0xf] %vm1005_vm1, %v2172_v34  ;;  %v2349_v36 = vpop.f32.mrb[16].mxu1  ;;  %v1480_v40 = vadd.f32 %v2389_v38, %v2925_v7  ;;  %v1471_v43 = vpop.f32.mrb[17].mxu0 }
 0x10f   : > { %v1120_v39 = vadd.f32 %v2349_v36, %v2920_v35  ;;  %v1111_v42 = vpop.f32.mrb[17].mxu1  ;;  %v1472_v45 = vadd.f32 %v2925_v7, %v1471_v43  ;;  %v2390_v48 = vpop.f32.mrb[18].mxu0 }
 0x110   : > { %v1112_v44 = vadd.f32 %v2920_v35, %v1111_v42  ;;  %v2350_v47 = vpop.f32.mrb[18].mxu1  ;;  %v2209_v50 = vpack.c.bf16 %v1480_v40, %v1480_v40  ;;  %v1483_v52 = vadd.f32 %v2390_v48, %v2925_v7  ;;  %v1474_v54 = vpop.f32.mrb[19].mxu0 }
 0x111   : > { %v2177_v49 = vpack.c.bf16 %v1120_v39, %v1120_v39  ;;  %v1123_v51 = vadd.f32 %v2350_v47, %v2920_v35  ;;  %v1114_v53 = vpop.f32.mrb[19].mxu1  ;;  %v2207_v56 = vpack.c.bf16 %v1472_v45, %v1472_v45  ;;  %v1475_v58 = vadd.f32 %v2925_v7, %v1474_v54 }
 0x112   : > { %v2175_v55 = vpack.c.bf16 %v1112_v44, %v1112_v44  ;;  %v1115_v57 = vadd.f32 %v2920_v35, %v1114_v53  ;;  %1728 = vst.msk [vmem:[%s2947_s25 + $0x8] sm:$0xf] %vm1005_vm1, %v2209_v50  ;;  %v2210_v60 = vpack.c.bf16 %v1483_v52, %v1483_v52 }
 0x113   : > { %1368 = vst.msk [vmem:[%s2941_s22 + $0x8] sm:$0xf] %vm1005_vm1, %v2177_v49  ;;  %v2178_v59 = vpack.c.bf16 %v1123_v51, %v1123_v51  ;;  %1726 = vst.msk [vmem:[%s2947_s25] sm:$0xf] %vm1005_vm1, %v2207_v56  ;;  %v2208_v0 = vpack.c.bf16 %v1475_v58, %v1475_v58 }
 0x114   : > { %1366 = vst.msk [vmem:[%s2941_s22] sm:$0xf] %vm1005_vm1, %v2175_v55  ;;  %v2176_v63 = vpack.c.bf16 %v1115_v57, %v1115_v57  ;;  %1729 = vst.msk [vmem:[%s2947_s25 + $0xc] sm:$0xf] %vm1005_vm1, %v2210_v60 }
 0x115   : > { %1369 = vst.msk [vmem:[%s2941_s22 + $0xc] sm:$0xf] %vm1005_vm1, %v2178_v59  ;;  %1727 = vst.msk [vmem:[%s2947_s25 + $0x4] sm:$0xf] %vm1005_vm1, %v2208_v0  ;;  %v2393_v2 = vpop.f32.mrb[20].mxu0 }
 0x116   : > { %1367 = vst.msk [vmem:[%s2941_s22 + $0x4] sm:$0xf] %vm1005_vm1, %v2176_v63  ;;  %v2353_v1 = vpop.f32.mrb[20].mxu1  ;;  %v1496_v3 = vadd.f32 %v2393_v2, %v2925_v7  ;;  %v1487_v31 = vpop.f32.mrb[21].mxu0 }
 0x117   : > { %v1136_v4 = vadd.f32 %v2353_v1, %v2920_v35  ;;  %v1127_v5 = vpop.f32.mrb[21].mxu1  ;;  %v1488_v41 = vadd.f32 %v2925_v7, %v1487_v31  ;;  %v2394_v61 = vpop.f32.mrb[22].mxu0 }
 0x118   : > { %v1128_v37 = vadd.f32 %v2920_v35, %v1127_v5  ;;  %v2354_v46 = vpop.f32.mrb[22].mxu1  ;;  %v2213_v6 = vpack.c.bf16 %v1496_v3, %v1496_v3  ;;  %v1499_v9 = vadd.f32 %v2394_v61, %v2925_v7  ;;  %v1490_v11 = vpop.f32.mrb[23].mxu0 }
 0x119   : > { %v2181_v62 = vpack.c.bf16 %v1136_v4, %v1136_v4  ;;  %v1139_v8 = vadd.f32 %v2354_v46, %v2920_v35  ;;  %v1130_v10 = vpop.f32.mrb[23].mxu1  ;;  %v2211_v13 = vpack.c.bf16 %v1488_v41, %v1488_v41  ;;  %v1491_v15 = vadd.f32 %v2925_v7, %v1490_v11 }
 0x11a   : > { %v2179_v12 = vpack.c.bf16 %v1128_v37, %v1128_v37  ;;  %v1131_v14 = vadd.f32 %v2920_v35, %v1130_v10  ;;  %1732 = vst.msk [vmem:[%s2947_s25 + $0x18] sm:$0xf] %vm1005_vm1, %v2213_v6  ;;  %v2214_v17 = vpack.c.bf16 %v1499_v9, %v1499_v9 }
 0x11b   : > { %1372 = vst.msk [vmem:[%s2941_s22 + $0x18] sm:$0xf] %vm1005_vm1, %v2181_v62  ;;  %v2182_v16 = vpack.c.bf16 %v1139_v8, %v1139_v8  ;;  %1730 = vst.msk [vmem:[%s2947_s25 + $0x10] sm:$0xf] %vm1005_vm1, %v2211_v13  ;;  %v2212_v19 = vpack.c.bf16 %v1491_v15, %v1491_v15 }
 0x11c   : > { %1370 = vst.msk [vmem:[%s2941_s22 + $0x10] sm:$0xf] %vm1005_vm1, %v2179_v12  ;;  %v2180_v18 = vpack.c.bf16 %v1131_v14, %v1131_v14  ;;  %1733 = vst.msk [vmem:[%s2947_s25 + $0x1c] sm:$0xf] %vm1005_vm1, %v2214_v17 }
 0x11d   : > { %1373 = vst.msk [vmem:[%s2941_s22 + $0x1c] sm:$0xf] %vm1005_vm1, %v2182_v16  ;;  %1731 = vst.msk [vmem:[%s2947_s25 + $0x14] sm:$0xf] %vm1005_vm1, %v2212_v19  ;;  %v2397_v21 = vpop.f32.mrb[24].mxu0 }
 0x11e   : > { %1371 = vst.msk [vmem:[%s2941_s22 + $0x14] sm:$0xf] %vm1005_vm1, %v2180_v18  ;;  %v2357_v20 = vpop.f32.mrb[24].mxu1  ;;  %v1512_v23 = vadd.f32 %v2397_v21, %v2925_v7  ;;  %v1503_v25 = vpop.f32.mrb[25].mxu0 }
 0x11f   : > { %v1152_v22 = vadd.f32 %v2357_v20, %v2920_v35  ;;  %v1143_v24 = vpop.f32.mrb[25].mxu1  ;;  %v1504_v27 = vadd.f32 %v2925_v7, %v1503_v25  ;;  %v2398_v29 = vpop.f32.mrb[26].mxu0 }
 0x120   : > { %v1144_v26 = vadd.f32 %v2920_v35, %v1143_v24  ;;  %v2358_v28 = vpop.f32.mrb[26].mxu1  ;;  %v2217_v32 = vpack.c.bf16 %v1512_v23, %v1512_v23  ;;  %v1515_v34 = vadd.f32 %v2398_v29, %v2925_v7  ;;  %v1506_v38 = vpop.f32.mrb[27].mxu0 }
 0x121   : > { %v2185_v30 = vpack.c.bf16 %v1152_v22, %v1152_v22  ;;  %v1155_v33 = vadd.f32 %v2358_v28, %v2920_v35  ;;  %v1146_v36 = vpop.f32.mrb[27].mxu1  ;;  %v2215_v40 = vpack.c.bf16 %v1504_v27, %v1504_v27  ;;  %v1507_v43 = vadd.f32 %v2925_v7, %v1506_v38 }
 0x122   : > { %v2183_v39 = vpack.c.bf16 %v1144_v26, %v1144_v26  ;;  %v1147_v42 = vadd.f32 %v2920_v35, %v1146_v36  ;;  %1736 = vst.msk [vmem:[%s2947_s25 + $0x28] sm:$0xf] %vm1005_vm1, %v2217_v32  ;;  %v2218_v45 = vpack.c.bf16 %v1515_v34, %v1515_v34 }
 0x123   : > { %1376 = vst.msk [vmem:[%s2941_s22 + $0x28] sm:$0xf] %vm1005_vm1, %v2185_v30  ;;  %v2186_v44 = vpack.c.bf16 %v1155_v33, %v1155_v33  ;;  %1734 = vst.msk [vmem:[%s2947_s25 + $0x20] sm:$0xf] %vm1005_vm1, %v2215_v40  ;;  %v2216_v48 = vpack.c.bf16 %v1507_v43, %v1507_v43 }
 0x124   : > { %1374 = vst.msk [vmem:[%s2941_s22 + $0x20] sm:$0xf] %vm1005_vm1, %v2183_v39  ;;  %v2184_v47 = vpack.c.bf16 %v1147_v42, %v1147_v42  ;;  %1737 = vst.msk [vmem:[%s2947_s25 + $0x2c] sm:$0xf] %vm1005_vm1, %v2218_v45 }
 0x125   : > { %1377 = vst.msk [vmem:[%s2941_s22 + $0x2c] sm:$0xf] %vm1005_vm1, %v2186_v44  ;;  %1735 = vst.msk [vmem:[%s2947_s25 + $0x24] sm:$0xf] %vm1005_vm1, %v2216_v48  ;;  %v2401_v50 = vpop.f32.mrb[28].mxu0 }
 0x126   : > { %1375 = vst.msk [vmem:[%s2941_s22 + $0x24] sm:$0xf] %vm1005_vm1, %v2184_v47  ;;  %v2361_v49 = vpop.f32.mrb[28].mxu1  ;;  %v1528_v52 = vadd.f32 %v2401_v50, %v2925_v7  ;;  %v1519_v54 = vpop.f32.mrb[29].mxu0 }
 0x127   : > { %v1168_v51 = vadd.f32 %v2361_v49, %v2920_v35  ;;  %v1159_v53 = vpop.f32.mrb[29].mxu1  ;;  %v1520_v56 = vadd.f32 %v2925_v7, %v1519_v54  ;;  %v2402_v58 = vpop.f32.mrb[30].mxu0 }
 0x128   : > { %v1160_v55 = vadd.f32 %v2920_v35, %v1159_v53  ;;  %v2362_v57 = vpop.f32.mrb[30].mxu1  ;;  %v2221_v60 = vpack.c.bf16 %v1528_v52, %v1528_v52  ;;  %v1531_v0 = vadd.f32 %v2402_v58, %v2925_v7  ;;  %v1522_v2 = vpop.f32.mrb[31].mxu0 }
 0x129   : > { %v2189_v59 = vpack.c.bf16 %v1168_v51, %v1168_v51  ;;  %v1171_v63 = vadd.f32 %v2362_v57, %v2920_v35  ;;  %v1162_v1 = vpop.f32.mrb[31].mxu1  ;;  %v2219_v3 = vpack.c.bf16 %v1520_v56, %v1520_v56  ;;  %v1523_v31 = vadd.f32 %v2925_v7, %v1522_v2 }
 0x12a   : > { %v2187_v4 = vpack.c.bf16 %v1160_v55, %v1160_v55  ;;  %v1163_v5 = vadd.f32 %v2920_v35, %v1162_v1  ;;  %1740 = vst.msk [vmem:[%s2947_s25 + $0x38] sm:$0xf] %vm1005_vm1, %v2221_v60  ;;  %v2222_v41 = vpack.c.bf16 %v1531_v0, %v1531_v0 }
 0x12b   : > { %1380 = vst.msk [vmem:[%s2941_s22 + $0x38] sm:$0xf] %vm1005_vm1, %v2189_v59  ;;  %v2190_v37 = vpack.c.bf16 %v1171_v63, %v1171_v63  ;;  %1738 = vst.msk [vmem:[%s2947_s25 + $0x30] sm:$0xf] %vm1005_vm1, %v2219_v3  ;;  %v2220_v61 = vpack.c.bf16 %v1523_v31, %v1523_v31 }
 0x12c   : > { %1378 = vst.msk [vmem:[%s2941_s22 + $0x30] sm:$0xf] %vm1005_vm1, %v2187_v4  ;;  %v2188_v46 = vpack.c.bf16 %v1163_v5, %v1163_v5  ;;  %1741 = vst.msk [vmem:[%s2947_s25 + $0x3c] sm:$0xf] %vm1005_vm1, %v2222_v41 }
 0x12d   : > { %1381 = vst.msk [vmem:[%s2941_s22 + $0x3c] sm:$0xf] %vm1005_vm1, %v2190_v37  ;;  %1739 = vst.msk [vmem:[%s2947_s25 + $0x34] sm:$0xf] %vm1005_vm1, %v2220_v61  ;;  %v2405_v6 = vpop.f32.mrb[32].mxu0 }
 0x12e   : > { %1379 = vst.msk [vmem:[%s2941_s22 + $0x34] sm:$0xf] %vm1005_vm1, %v2188_v46  ;;  %v2365_v62 = vpop.f32.mrb[32].mxu1  ;;  %v1544_v9 = vadd.f32 %v2405_v6, %v2925_v7  ;;  %v1535_v11 = vpop.f32.mrb[33].mxu0 }
 0x12f   : > { %v1184_v8 = vadd.f32 %v2365_v62, %v2920_v35  ;;  %v1175_v10 = vpop.f32.mrb[33].mxu1  ;;  %v1536_v13 = vadd.f32 %v2925_v7, %v1535_v11  ;;  %v2406_v15 = vpop.f32.mrb[34].mxu0 }
 0x130   : > { %v1176_v12 = vadd.f32 %v2920_v35, %v1175_v10  ;;  %v2366_v14 = vpop.f32.mrb[34].mxu1  ;;  %v2225_v17 = vpack.c.bf16 %v1544_v9, %v1544_v9  ;;  %v1547_v19 = vadd.f32 %v2406_v15, %v2925_v7  ;;  %v1538_v21 = vpop.f32.mrb[35].mxu0 }
 0x131   : > { %v2193_v16 = vpack.c.bf16 %v1184_v8, %v1184_v8  ;;  %v1187_v18 = vadd.f32 %v2366_v14, %v2920_v35  ;;  %v1178_v20 = vpop.f32.mrb[35].mxu1  ;;  %v2223_v23 = vpack.c.bf16 %v1536_v13, %v1536_v13  ;;  %v1539_v25 = vadd.f32 %v2925_v7, %v1538_v21 }
 0x132   : > { %v2191_v22 = vpack.c.bf16 %v1176_v12, %v1176_v12  ;;  %v1179_v24 = vadd.f32 %v2920_v35, %v1178_v20  ;;  %1744 = vst.msk [vmem:[%s2947_s25 + $0x48] sm:$0xf] %vm1005_vm1, %v2225_v17  ;;  %v2226_v27 = vpack.c.bf16 %v1547_v19, %v1547_v19 }
 0x133   : > { %1384 = vst.msk [vmem:[%s2941_s22 + $0x48] sm:$0xf] %vm1005_vm1, %v2193_v16  ;;  %v2194_v26 = vpack.c.bf16 %v1187_v18, %v1187_v18  ;;  %1742 = vst.msk [vmem:[%s2947_s25 + $0x40] sm:$0xf] %vm1005_vm1, %v2223_v23  ;;  %v2224_v29 = vpack.c.bf16 %v1539_v25, %v1539_v25 }
 0x134   : > { %1382 = vst.msk [vmem:[%s2941_s22 + $0x40] sm:$0xf] %vm1005_vm1, %v2191_v22  ;;  %v2192_v28 = vpack.c.bf16 %v1179_v24, %v1179_v24  ;;  %1745 = vst.msk [vmem:[%s2947_s25 + $0x4c] sm:$0xf] %vm1005_vm1, %v2226_v27 }
 0x135   : > { %1385 = vst.msk [vmem:[%s2941_s22 + $0x4c] sm:$0xf] %vm1005_vm1, %v2194_v26  ;;  %1743 = vst.msk [vmem:[%s2947_s25 + $0x44] sm:$0xf] %vm1005_vm1, %v2224_v29  ;;  %v2409_v32 = vpop.f32.mrb[36].mxu0 }
 0x136   : > { %1383 = vst.msk [vmem:[%s2941_s22 + $0x44] sm:$0xf] %vm1005_vm1, %v2192_v28  ;;  %v2369_v30 = vpop.f32.mrb[36].mxu1  ;;  %v1560_v34 = vadd.f32 %v2409_v32, %v2925_v7  ;;  %v1551_v38 = vpop.f32.mrb[37].mxu0 }
 0x137   : > { %v1200_v33 = vadd.f32 %v2369_v30, %v2920_v35  ;;  %v1191_v36 = vpop.f32.mrb[37].mxu1  ;;  %v1552_v40 = vadd.f32 %v2925_v7, %v1551_v38  ;;  %v2410_v43 = vpop.f32.mrb[38].mxu0 }
 0x138   : > { %v1192_v39 = vadd.f32 %v2920_v35, %v1191_v36  ;;  %v2370_v42 = vpop.f32.mrb[38].mxu1  ;;  %v2229_v45 = vpack.c.bf16 %v1560_v34, %v1560_v34  ;;  %v1563_v48 = vadd.f32 %v2410_v43, %v2925_v7  ;;  %v1554_v50 = vpop.f32.mrb[39].mxu0 }
 0x139   : > { %v2197_v44 = vpack.c.bf16 %v1200_v33, %v1200_v33  ;;  %v1203_v47 = vadd.f32 %v2370_v42, %v2920_v35  ;;  %v1194_v49 = vpop.f32.mrb[39].mxu1  ;;  %v2227_v52 = vpack.c.bf16 %v1552_v40, %v1552_v40  ;;  %v1555_v54 = vadd.f32 %v2925_v7, %v1554_v50 }
 0x13a   : > { %v2195_v51 = vpack.c.bf16 %v1192_v39, %v1192_v39  ;;  %v1195_v53 = vadd.f32 %v2920_v35, %v1194_v49  ;;  %1748 = vst.msk [vmem:[%s2947_s25 + $0x58] sm:$0xf] %vm1005_vm1, %v2229_v45  ;;  %v2230_v56 = vpack.c.bf16 %v1563_v48, %v1563_v48 }
 0x13b   : > { %1388 = vst.msk [vmem:[%s2941_s22 + $0x58] sm:$0xf] %vm1005_vm1, %v2197_v44  ;;  %v2198_v55 = vpack.c.bf16 %v1203_v47, %v1203_v47  ;;  %1746 = vst.msk [vmem:[%s2947_s25 + $0x50] sm:$0xf] %vm1005_vm1, %v2227_v52  ;;  %v2228_v58 = vpack.c.bf16 %v1555_v54, %v1555_v54 }
 0x13c   : > { %1386 = vst.msk [vmem:[%s2941_s22 + $0x50] sm:$0xf] %vm1005_vm1, %v2195_v51  ;;  %v2196_v57 = vpack.c.bf16 %v1195_v53, %v1195_v53  ;;  %1749 = vst.msk [vmem:[%s2947_s25 + $0x5c] sm:$0xf] %vm1005_vm1, %v2230_v56 }
 0x13d   : > { %1389 = vst.msk [vmem:[%s2941_s22 + $0x5c] sm:$0xf] %vm1005_vm1, %v2198_v55  ;;  %1747 = vst.msk [vmem:[%s2947_s25 + $0x54] sm:$0xf] %vm1005_vm1, %v2228_v58  ;;  %v2413_v60 = vpop.f32.mrb[40].mxu0 }
 0x13e   : > { %1387 = vst.msk [vmem:[%s2941_s22 + $0x54] sm:$0xf] %vm1005_vm1, %v2196_v57  ;;  %v2373_v59 = vpop.f32.mrb[40].mxu1  ;;  %v1576_v0 = vadd.f32 %v2413_v60, %v2925_v7  ;;  %v1567_v2 = vpop.f32.mrb[41].mxu0 }
 0x13f   : > { %v1216_v63 = vadd.f32 %v2373_v59, %v2920_v35  ;;  %v1207_v1 = vpop.f32.mrb[41].mxu1  ;;  %v1568_v3 = vadd.f32 %v2925_v7, %v1567_v2  ;;  %v2414_v31 = vpop.f32.mrb[42].mxu0 }
 0x140   : > { %v1208_v4 = vadd.f32 %v2920_v35, %v1207_v1  ;;  %v2374_v5 = vpop.f32.mrb[42].mxu1  ;;  %v2233_v41 = vpack.c.bf16 %v1576_v0, %v1576_v0  ;;  %v1579_v61 = vadd.f32 %v2414_v31, %v2925_v7  ;;  %v1570_v6 = vpop.f32.mrb[43].mxu0 }
 0x141   : > { %v2201_v37 = vpack.c.bf16 %v1216_v63, %v1216_v63  ;;  %v1219_v46 = vadd.f32 %v2374_v5, %v2920_v35  ;;  %v1210_v62 = vpop.f32.mrb[43].mxu1  ;;  %v2231_v9 = vpack.c.bf16 %v1568_v3, %v1568_v3  ;;  %v1571_v11 = vadd.f32 %v2925_v7, %v1570_v6 }
 0x142   : > { %v2199_v8 = vpack.c.bf16 %v1208_v4, %v1208_v4  ;;  %v1211_v10 = vadd.f32 %v2920_v35, %v1210_v62  ;;  %1752 = vst.msk [vmem:[%s2947_s25 + $0x68] sm:$0xf] %vm1005_vm1, %v2233_v41  ;;  %v2234_v13 = vpack.c.bf16 %v1579_v61, %v1579_v61 }
 0x143   : > { %1392 = vst.msk [vmem:[%s2941_s22 + $0x68] sm:$0xf] %vm1005_vm1, %v2201_v37  ;;  %v2202_v12 = vpack.c.bf16 %v1219_v46, %v1219_v46  ;;  %1750 = vst.msk [vmem:[%s2947_s25 + $0x60] sm:$0xf] %vm1005_vm1, %v2231_v9  ;;  %v2232_v15 = vpack.c.bf16 %v1571_v11, %v1571_v11 }
 0x144   : > { %1390 = vst.msk [vmem:[%s2941_s22 + $0x60] sm:$0xf] %vm1005_vm1, %v2199_v8  ;;  %v2200_v14 = vpack.c.bf16 %v1211_v10, %v1211_v10  ;;  %1753 = vst.msk [vmem:[%s2947_s25 + $0x6c] sm:$0xf] %vm1005_vm1, %v2234_v13 }
 0x145   : > { %1393 = vst.msk [vmem:[%s2941_s22 + $0x6c] sm:$0xf] %vm1005_vm1, %v2202_v12  ;;  %1751 = vst.msk [vmem:[%s2947_s25 + $0x64] sm:$0xf] %vm1005_vm1, %v2232_v15  ;;  %v2417_v17 = vpop.f32.mrb[44].mxu0 }
 0x146   : > { %1391 = vst.msk [vmem:[%s2941_s22 + $0x64] sm:$0xf] %vm1005_vm1, %v2200_v14  ;;  %v2377_v16 = vpop.f32.mrb[44].mxu1  ;;  %v1592_v19 = vadd.f32 %v2417_v17, %v2925_v7  ;;  %v1583_v21 = vpop.f32.mrb[45].mxu0 }
 0x147   : > { %v1232_v18 = vadd.f32 %v2377_v16, %v2920_v35  ;;  %v1223_v20 = vpop.f32.mrb[45].mxu1  ;;  %v1584_v23 = vadd.f32 %v2925_v7, %v1583_v21  ;;  %v2418_v25 = vpop.f32.mrb[46].mxu0 }
 0x148   : > { %v1224_v22 = vadd.f32 %v2920_v35, %v1223_v20  ;;  %v2378_v24 = vpop.f32.mrb[46].mxu1  ;;  %v2237_v27 = vpack.c.bf16 %v1592_v19, %v1592_v19  ;;  %v1595_v29 = vadd.f32 %v2418_v25, %v2925_v7  ;;  %v1586_v32 = vpop.f32.mrb[47].mxu0 }
 0x149   : > { %v2205_v26 = vpack.c.bf16 %v1232_v18, %v1232_v18  ;;  %v1235_v28 = vadd.f32 %v2378_v24, %v2920_v35  ;;  %v1226_v30 = vpop.f32.mrb[47].mxu1  ;;  %v2235_v34 = vpack.c.bf16 %v1584_v23, %v1584_v23  ;;  %v1587_v38 = vadd.f32 %v2925_v7, %v1586_v32 }
 0x14a   : > { %v2203_v33 = vpack.c.bf16 %v1224_v22, %v1224_v22  ;;  %v1227_v36 = vadd.f32 %v2920_v35, %v1226_v30  ;;  %1756 = vst.msk [vmem:[%s2947_s25 + $0x78] sm:$0xf] %vm1005_vm1, %v2237_v27  ;;  %v2238_v40 = vpack.c.bf16 %v1595_v29, %v1595_v29 }
 0x14b   : > { %1396 = vst.msk [vmem:[%s2941_s22 + $0x78] sm:$0xf] %vm1005_vm1, %v2205_v26  ;;  %v2206_v39 = vpack.c.bf16 %v1235_v28, %v1235_v28  ;;  %1754 = vst.msk [vmem:[%s2947_s25 + $0x70] sm:$0xf] %vm1005_vm1, %v2235_v34  ;;  %v2236_v43 = vpack.c.bf16 %v1587_v38, %v1587_v38 }
 0x14c   : > { %1394 = vst.msk [vmem:[%s2941_s22 + $0x70] sm:$0xf] %vm1005_vm1, %v2203_v33  ;;  %v2204_v42 = vpack.c.bf16 %v1227_v36, %v1227_v36  ;;  %1757 = vst.msk [vmem:[%s2947_s25 + $0x7c] sm:$0xf] %vm1005_vm1, %v2238_v40 }
 0x14d   : > { %1397 = vst.msk [vmem:[%s2941_s22 + $0x7c] sm:$0xf] %vm1005_vm1, %v2206_v39  ;;  %1755 = vst.msk [vmem:[%s2947_s25 + $0x74] sm:$0xf] %vm1005_vm1, %v2236_v43 }
 0x14e   : > { %1395 = vst.msk [vmem:[%s2941_s22 + $0x74] sm:$0xf] %vm1005_vm1, %v2204_v42 }
 0x14f PF: > { %s22_s19 = sadd.s32 1, %s2485_s19   ;;  %s3160_s17 = smov %s2481_s18 }
 0x150   : > { %p19_p5 = scmp.ge.s32.totalorder %s22_s19, 4   ;;  %s3161_s18 = smov %s3163_s20 }
 0x152   :  { %21 = sbr.rel (!%p19_p5) target bundleno = 2 (0x2), region = 116 }

// kernel: attn_block_forward.5
= control target key start
LH: loop header
LB: loop body
LE: loop exit
PB: predicated region body
PF: predicated region fallthrough
CT: control target
= control target key end

     0   :  { %11 = vsyncpa [#allocation6], 0  ;;  %s4710_s0 = inlined_call_operand.vmem [shape: bf16[2,256,64], index: 0, kind: input, shape index: {}]   ;;  %s4711_s1 = inlined_call_operand.vmem [shape: bf16[2,256,64], index: 1, kind: input, shape index: {}]   ;;  %s4712_s2 = inlined_call_operand.vmem [shape: bf16[2,256,64], index: 2, kind: input, shape index: {}]   ;;  %s4713_s3 = inlined_call_operand.vmem [shape: f32[2,256,64], index: 3, kind: input, shape index: {}]   ;;  %s4714_s4 = inlined_call_operand.vmem [shape: bf16[64,64], index: 4, kind: input, shape index: {}]   ;;  %s4715_s5 = inlined_call_operand.vmem [shape: f32[1,64], index: 5, kind: input, shape index: {}]   ;;  %s4716_s6 = inlined_call_operand.hbm [shape: f32[2,256,64], index: 6, kind: output, shape index: {}]  }
   0x1   :  { %13 = vsyncpa [#allocation6 + $0x1], 0  ;;  %s3646_s21 = smov 0   ;;  %s3648_s22 = smov 0  }
   0x2   :  { %s3650_s23 = smov 0   ;;  %s3652_s24 = smov 0  }
   0x3   :  { %s3654_s25 = smov 0   ;;  %s3656_s26 = smov 0  }
   0x4 LB: > { %s2808_s27 = sadd.s32 4294967295, %s3605_s26   ;;  %s2809_s28 = sadd.s32 4294967294, %s3605_s26   ;;  %s3605_s26 = sphi %s3656_s26, %s19_s26   ;;  %s3601_s25 = sphi %s3654_s25, %s4777_s25   ;;  %s3597_s24 = sphi %s3652_s24, %s4776_s24   ;;  %s3593_s23 = sphi %s3650_s23, %s4775_s23   ;;  %s3589_s22 = sphi %s3648_s22, %s4774_s22   ;;  %s3585_s21 = sphi %s3646_s21, %s4773_s21  }
   0x5   : > { %s38_s29 = sadd.s32 1, %s3601_s25  ;;  %s201_s30 = sadd.s32 1, %s3593_s23 }
   0x6   : > { %p40_p0 = scmp.ge.s32.totalorder %s38_s29, 2  ;;  %p211_p1 = scmp.ne.s32.totalorder %s3593_s23, %s3589_s22 }
   0x7   : > { %p212_p2 = scmp.eq.s32.totalorder %s2808_s27, 1  ;;  %p217_p3 = scmp.ne.s32.totalorder %s3589_s22, %s3585_s21 }
   0x8   : > { %s4779_s29 = smov (%p40_p0, %s38_s29), 0  ;;  %p218_p5 = scmp.eq.s32.totalorder %s2809_s28, 1 }
   0x9   : > { %p3686_p4 = por %p212_p2, %p211_p1  ;;  %s196_s8 = ssub.s32 %s3601_s25, %s4779_s29 }
   0xa   : > { %p2812_p6 = scmp.ge.s32.totalorder %s3605_s26, 1  ;;  %p199_p7 = scmp.eq.s32.totalorder %s196_s8, 0 }
   0xb   : > { %p3693_p8 = por %p218_p5, %p217_p3  ;;  %p294_p9 = scmp.lt.s32.totalorder %s3605_s26, 3 }
   0xc   : > { %s3699_s10 = scalar_select %p199_p7, %s3593_s23, %s201_s30  }
   0xd   : > { %p295_p10 = pnand %p2812_p6, %p294_p9 }
   0xf   : > { %298 = sbr.rel (%p295_p10) target bundleno = 1063 (0x427), region = 44 }
  0x16   : > { %p356_p11 = scmp.lt.s32.totalorder %s3597_s24, 1  ;;  %vm465_vm0 = vcmask 523264   ;;  %s3608_s19 = smov [#allocation5]  }
  0x17   : > { %s3531_s20 = sshll.u32 %s3608_s19, 4  ;;  %s3532_s20 = int_to_ptr.vmem [resolvable:$false] %s3531_s20 }
  0x18   : > { %s3703_s11 = scalar_select %p356_p11, %s3597_s24, 1 }
  0x1a   : > { %s3706_s12 = sshll.u32 %s3703_s11, 7  ;;  %s2915_s17 = sshll.u32 %s3703_s11, 8 }
  0x1b   : > { %s3712_s15 = scalar_lea.vmem %s4711_s1, %s3706_s12  ;;  %s3729_s18 = scalar_lea.vmem %s4710_s0, %s3706_s12 }
  0x1c   : > { %v3219_v0 = vld [vmem:[%s3712_s15 + $0x40] sm:$0xff]   ;;  %v3221_v2 = vld [vmem:[%s3712_s15 + $0x48] sm:$0xff]   ;;  %v3223_v6 = vld [vmem:[%s3712_s15 + $0x50] sm:$0xff]   ;;  %s3804_s27 = scalar_lea.vmem %s4712_s2, %s3706_s12  ;;  %s2916_s12 = sshll.u32 %s3597_s24, 12 }
  0x1d   : > { %v3220_v1 = vld [vmem:[%s3712_s15] sm:$0xff]   ;;  %3153 = vmatprep.subr.msk.bf16.mxu0 %vm465_vm0, %v3219_v0  ;;  %v3222_v4 = vld [vmem:[%s3712_s15 + $0x8] sm:$0xff]   ;;  %v3224_v7 = vld [vmem:[%s3712_s15 + $0x10] sm:$0xff]   ;;  %s4652_s16 = scalar_lea.hbm %s4716_s6, %s2916_s12 }
  0x1e   : > { %v772_v3 = vsel %vm465_vm0, %v3220_v1, 0  ;;  %v775_v5 = vsel %vm465_vm0, %v3222_v4, 0  ;;  %v3235_v8 = vld [vmem:[%s3729_s18] sm:$0xff]   ;;  %v778_v9 = vsel %vm465_vm0, %v3224_v7, 0  ;;  %v3225_v10 = vld [vmem:[%s3712_s15 + $0x58] sm:$0xff]   ;;  %v3229_v16 = vld [vmem:[%s3712_s15 + $0x68] sm:$0xff]  }
  0x1f   : > { %2918 = vmatpush3.bf16.xpose.msra.mxu0 %v772_v3  ;;  %2933 = vmatprep.mubr.msk.bf16.mxu0 %vm465_vm0, %v3235_v8  ;;  %v3226_v11 = vld [vmem:[%s3712_s15 + $0x18] sm:$0xff]   ;;  %v3227_v13 = vld [vmem:[%s3712_s15 + $0x60] sm:$0xff]   ;;  %v3230_v17 = vld [vmem:[%s3712_s15 + $0x28] sm:$0xff]  }
  0x20   : > { %3154 = vmatprep.subr.msk.bf16.mxu0 %vm465_vm0, %v3221_v2  ;;  %v781_v12 = vsel %vm465_vm0, %v3226_v11, 0  ;;  %v3228_v14 = vld [vmem:[%s3712_s15 + $0x20] sm:$0xff]   ;;  %v787_v18 = vsel %vm465_vm0, %v3230_v17, 0  ;;  %v3231_v19 = vld [vmem:[%s3712_s15 + $0x70] sm:$0xff]   ;;  %v3233_v22 = vld [vmem:[%s3712_s15 + $0x78] sm:$0xff]  }
  0x21   : > { %v784_v15 = vsel %vm465_vm0, %v3228_v14, 0  ;;  %v3232_v20 = vld [vmem:[%s3712_s15 + $0x30] sm:$0xff]   ;;  %v3234_v23 = vld [vmem:[%s3712_s15 + $0x38] sm:$0xff]   ;;  %v3236_v25 = vld [vmem:[%s3729_s18 + $0x8] sm:$0xff]  }
  0x22   : > { %v790_v21 = vsel %vm465_vm0, %v3232_v20, 0  ;;  %v793_v24 = vsel %vm465_vm0, %v3234_v23, 0  ;;  %v3237_v26 = vld [vmem:[%s3729_s18 + $0x10] sm:$0xff]   ;;  %v3238_v27 = vld [vmem:[%s3729_s18 + $0x18] sm:$0xff]   ;;  %v3239_v28 = vld [vmem:[%s3729_s18 + $0x20] sm:$0xff]  }
  0x23   : > { %v3240_v29 = vld [vmem:[%s3729_s18 + $0x28] sm:$0xff]   ;;  %v3241_v30 = vld [vmem:[%s3729_s18 + $0x30] sm:$0xff]   ;;  %v3242_v31 = vld [vmem:[%s3729_s18 + $0x38] sm:$0xff]  }
  0x24   : > { %v3243_v32 = vld [vmem:[%s3729_s18 + $0x40] sm:$0xff]   ;;  %v3244_v33 = vld [vmem:[%s3729_s18 + $0x48] sm:$0xff]   ;;  %v3245_v34 = vld [vmem:[%s3729_s18 + $0x50] sm:$0xff]  }
  0x25   : > { %v3246_v35 = vld [vmem:[%s3729_s18 + $0x58] sm:$0xff]   ;;  %v3247_v36 = vld [vmem:[%s3729_s18 + $0x60] sm:$0xff]   ;;  %v3248_v37 = vld [vmem:[%s3729_s18 + $0x68] sm:$0xff]  }
  0x26   : > { %v3249_v38 = vld [vmem:[%s3729_s18 + $0x70] sm:$0xff]   ;;  %v3250_v39 = vld [vmem:[%s3729_s18 + $0x78] sm:$0xff]   ;;  %v3251_v40 = vld [vmem:[%s3804_s27 + $0x40] sm:$0xff]   ;;  %s352_s18 = sand.u32 1, %s3589_s22  }
  0x27   : > { %2920 = vmatpush3.bf16.xpose.msra.mxu0 %v775_v5  ;;  %v3252_v41 = vld [vmem:[%s3804_s27] sm:$0xff]   ;;  %3137 = vmatprep.subr.bf16.mxu1 %v3251_v40  ;;  %v3253_v42 = vld [vmem:[%s3804_s27 + $0x48] sm:$0xff]   ;;  %v3255_v44 = vld [vmem:[%s3804_s27 + $0x50] sm:$0xff]   ;;  %s2813_s8 = sshll.u32 %s352_s18, 8  ;;  %s4664_s24 = scalar_lea.sflag [#allocation6], %s352_s18 }
  0x28   : > { %3155 = vmatprep.subr.msk.bf16.mxu0 %vm465_vm0, %v3223_v6  ;;  %3145 = vmatpush3.bf16.msra.mxu1 %v3252_v41  ;;  %v3254_v43 = vld [vmem:[%s3804_s27 + $0x8] sm:$0xff]   ;;  %v3256_v45 = vld [vmem:[%s3804_s27 + $0x10] sm:$0xff]   ;;  %v3257_v46 = vld [vmem:[%s3804_s27 + $0x58] sm:$0xff]   ;;  %s4531_s11 = scalar_lea.vmem [#allocation5], %s2813_s8 }
  0x29   : > { %3138 = vmatprep.subr.bf16.mxu1 %v3253_v42  ;;  %v3258_v49 = vld [vmem:[%s3804_s27 + $0x18] sm:$0xff]   ;;  %v3259_v52 = vld [vmem:[%s3804_s27 + $0x60] sm:$0xff]   ;;  %v3262_v23 = vld [vmem:[%s3804_s27 + $0x28] sm:$0xff]   ;;  %s2672_s13 = sshll.u32 %s4531_s11, 4  ;;  %s4654_s13 = int_to_ptr.vmem [resolvable:$true] %s2672_s13 }
  0x2a   : > { %v3260_v55 = vld [vmem:[%s3804_s27 + $0x20] sm:$0xff]   ;;  %p3534_p1 = scmp.lt.s32.totalorder %s4654_s13, %s3532_s20 }
  0x2c   : > { %3146 = vmatpush3.bf16.msra.mxu1 %v3254_v43 }
  0x2d   : > { %3139 = vmatprep.subr.bf16.mxu1 %v3255_v44 }
  0x2f   : > { %2922 = vmatpush3.bf16.xpose.msra.mxu0 %v778_v9 }
  0x30   : > { %3156 = vmatprep.subr.msk.bf16.mxu0 %vm465_vm0, %v3225_v10  ;;  %3147 = vmatpush3.bf16.msra.mxu1 %v3256_v45 }
  0x31   : > { %3140 = vmatprep.subr.bf16.mxu1 %v3257_v46 }
  0x34   : > { %3148 = vmatpush3.bf16.msra.mxu1 %v3258_v49 }
  0x35   : > { %3141 = vmatprep.subr.bf16.mxu1 %v3259_v52 }
  0x37   : > { %2924 = vmatpush3.bf16.xpose.msra.mxu0 %v781_v12 }
  0x38   : > { %3157 = vmatprep.subr.msk.bf16.mxu0 %vm465_vm0, %v3227_v13  ;;  %3149 = vmatpush3.bf16.msra.mxu1 %v3260_v55 }
  0x3f   : > { %2926 = vmatpush3.bf16.xpose.msra.mxu0 %v784_v15 }
  0x40   : > { %3158 = vmatprep.subr.msk.bf16.mxu0 %vm465_vm0, %v3229_v16 }
  0x47   : > { %2928 = vmatpush3.bf16.xpose.msra.mxu0 %v787_v18 }
  0x48   : > { %3159 = vmatprep.subr.msk.bf16.mxu0 %vm465_vm0, %v3231_v19 }
  0x4f   : > { %2930 = vmatpush3.bf16.xpose.msra.mxu0 %v790_v21 }
  0x50   : > { %3160 = vmatprep.subr.msk.bf16.mxu0 %vm465_vm0, %v3233_v22  ;;  %v3261_v22 = vld [vmem:[%s3804_s27 + $0x68] sm:$0xff]  }
  0x51   : > { %3142 = vmatprep.subr.bf16.mxu1 %v3261_v22 }
  0x52   : > { %3150 = vmatpush3.bf16.msra.mxu1 %v3262_v23 }
  0x57   : > { %2932 = vmatpush3.bf16.xpose.msra.mxu0 %v793_v24 }
  0x58   : > { %2965 = vmatprep.subr.bf16.mxu0 %v3251_v40  ;;  %v3607_v40 = vmov 0.0  }
  0x59   : > { %470 = vst.msk [vmem:[#allocation4 + $0x20] sm:$0xff] %vm465_vm0, %v3607_v40  ;;  %466 = vst.msk [vmem:[#allocation4] sm:$0xff] %vm465_vm0, %v3607_v40 }
  0x5a   : > { %467 = vst.msk [vmem:[#allocation4 + $0x8] sm:$0xff] %vm465_vm0, %v3607_v40  ;;  %468 = vst.msk [vmem:[#allocation4 + $0x10] sm:$0xff] %vm465_vm0, %v3607_v40 }
  0x5b   : > { %469 = vst.msk [vmem:[#allocation4 + $0x18] sm:$0xff] %vm465_vm0, %v3607_v40  ;;  %471 = vst.msk [vmem:[#allocation4 + $0x28] sm:$0xff] %vm465_vm0, %v3607_v40 }
  0x5c   : > { %472 = vst.msk [vmem:[#allocation4 + $0x30] sm:$0xff] %vm465_vm0, %v3607_v40  ;;  %473 = vst.msk [vmem:[#allocation4 + $0x38] sm:$0xff] %vm465_vm0, %v3607_v40 }
  0x5d   : > { %474 = vst.msk [vmem:[#allocation4 + $0x40] sm:$0xff] %vm465_vm0, %v3607_v40  ;;  %475 = vst.msk [vmem:[#allocation4 + $0x48] sm:$0xff] %vm465_vm0, %v3607_v40 }
  0x5e   : > { %2934 = vmatmul.mubr.msk.bf16.vlgmr.msra.gmra.mrb[0].mxu0 %vm465_vm0, %v3235_v8  ;;  %476 = vst.msk [vmem:[#allocation4 + $0x50] sm:$0xff] %vm465_vm0, %v3607_v40  ;;  %477 = vst.msk [vmem:[#allocation4 + $0x58] sm:$0xff] %vm465_vm0, %v3607_v40 }
  0x5f   : > { %2935 = vmatprep.mubr.msk.bf16.mxu0 %vm465_vm0, %v3236_v25  ;;  %2966 = vmatpush3.bf16.msra.mxu0 %v3252_v41  ;;  %478 = vst.msk [vmem:[#allocation4 + $0x60] sm:$0xff] %vm465_vm0, %v3607_v40  ;;  %479 = vst.msk [vmem:[#allocation4 + $0x68] sm:$0xff] %vm465_vm0, %v3607_v40 }
  0x60   : > { %2967 = vmatprep.subr.bf16.mxu0 %v3253_v42  ;;  %480 = vst.msk [vmem:[#allocation4 + $0x70] sm:$0xff] %vm465_vm0, %v3607_v40  ;;  %481 = vst.msk [vmem:[#allocation4 + $0x78] sm:$0xff] %vm465_vm0, %v3607_v40 }
  0x61   : > { %482 = vst.msk [vmem:[#allocation4 + $0x80] sm:$0xff] %vm465_vm0, %v3607_v40  ;;  %483 = vst.msk [vmem:[#allocation4 + $0x88] sm:$0xff] %vm465_vm0, %v3607_v40 }
  0x62   : > { %484 = vst.msk [vmem:[#allocation4 + $0x90] sm:$0xff] %vm465_vm0, %v3607_v40  ;;  %485 = vst.msk [vmem:[#allocation4 + $0x98] sm:$0xff] %vm465_vm0, %v3607_v40 }
  0x63   : > { %2968 = vmatpush3.bf16.msra.mxu0 %v3254_v43  ;;  %486 = vst.msk [vmem:[#allocation4 + $0xa0] sm:$0xff] %vm465_vm0, %v3607_v40  ;;  %487 = vst.msk [vmem:[#allocation4 + $0xa8] sm:$0xff] %vm465_vm0, %v3607_v40 }
  0x64   : > { %2969 = vmatprep.subr.bf16.mxu0 %v3255_v44  ;;  %488 = vst.msk [vmem:[#allocation4 + $0xb0] sm:$0xff] %vm465_vm0, %v3607_v40  ;;  %489 = vst.msk [vmem:[#allocation4 + $0xb8] sm:$0xff] %vm465_vm0, %v3607_v40 }
  0x65   : > { %490 = vst.msk [vmem:[#allocation4 + $0xc0] sm:$0xff] %vm465_vm0, %v3607_v40  ;;  %491 = vst.msk [vmem:[#allocation4 + $0xc8] sm:$0xff] %vm465_vm0, %v3607_v40 }
  0x66   : > { %2936 = vmatmul.mubr.msk.bf16.gmra.mrb[4].mxu0 %vm465_vm0, %v3236_v25  ;;  %v3263_v25 = vld [vmem:[%s3804_s27 + $0x70] sm:$0xff]   ;;  %492 = vst.msk [vmem:[#allocation4 + $0xd0] sm:$0xff] %vm465_vm0, %v3607_v40  ;;  %493 = vst.msk [vmem:[#allocation4 + $0xd8] sm:$0xff] %vm465_vm0, %v3607_v40 }
  0x67   : > { %2937 = vmatprep.mubr.msk.bf16.mxu0 %vm465_vm0, %v3237_v26  ;;  %2970 = vmatpush3.bf16.msra.mxu0 %v3256_v45  ;;  %494 = vst.msk [vmem:[#allocation4 + $0xe0] sm:$0xff] %vm465_vm0, %v3607_v40  ;;  %495 = vst.msk [vmem:[#allocation4 + $0xe8] sm:$0xff] %vm465_vm0, %v3607_v40 }
  0x68   : > { %2971 = vmatprep.subr.bf16.mxu0 %v3257_v46  ;;  %3143 = vmatprep.subr.bf16.mxu1 %v3263_v25  ;;  %496 = vst.msk [vmem:[#allocation4 + $0xf0] sm:$0xff] %vm465_vm0, %v3607_v40  ;;  %497 = vst.msk [vmem:[#allocation4 + $0xf8] sm:$0xff] %vm465_vm0, %v3607_v40 }
  0x6b   : > { %2972 = vmatpush3.bf16.msra.mxu0 %v3258_v49 }
  0x6c   : > { %2973 = vmatprep.subr.bf16.mxu0 %v3259_v52 }
  0x6e   : > { %2938 = vmatmul.mubr.msk.bf16.gmra.mrb[8].mxu0 %vm465_vm0, %v3237_v26 }
  0x6f   : > { %2939 = vmatprep.mubr.msk.bf16.mxu0 %vm465_vm0, %v3238_v27  ;;  %2974 = vmatpush3.bf16.msra.mxu0 %v3260_v55 }
  0x70   : > { %2975 = vmatprep.subr.bf16.mxu0 %v3261_v22 }
  0x73   : > { %2976 = vmatpush3.bf16.msra.mxu0 %v3262_v23 }
  0x74   : > { %2977 = vmatprep.subr.bf16.mxu0 %v3263_v25 }
  0x76   : > { %2940 = vmatmul.mubr.msk.bf16.gmra.mrb[12].mxu0 %vm465_vm0, %v3238_v27  ;;  %v3264_v27 = vld [vmem:[%s3804_s27 + $0x30] sm:$0xff]  }
  0x77   : > { %2941 = vmatprep.mubr.msk.bf16.mxu0 %vm465_vm0, %v3239_v28  ;;  %3151 = vmatpush3.bf16.msra.mxu1 %v3264_v27 }
  0x78   : > { %2978 = vmatpush3.bf16.msra.mxu0 %v3264_v27 }
  0x7e   : > { %2942 = vmatmul.mubr.msk.bf16.gmra.mrb[16].mxu0 %vm465_vm0, %v3239_v28 }
  0x7f   : > { %2943 = vmatprep.mubr.msk.bf16.mxu0 %vm465_vm0, %v3240_v29 }
  0x86   : > { %2944 = vmatmul.mubr.msk.bf16.gmra.mrb[20].mxu0 %vm465_vm0, %v3240_v29 }
  0x87   : > { %2945 = vmatprep.mubr.msk.bf16.mxu0 %vm465_vm0, %v3241_v30 }
  0x8e   : > { %2946 = vmatmul.mubr.msk.bf16.gmra.mrb[24].mxu0 %vm465_vm0, %v3241_v30 }
  0x8f   : > { %2947 = vmatprep.mubr.msk.bf16.mxu0 %vm465_vm0, %v3242_v31 }
  0x96   : > { %2948 = vmatmul.mubr.msk.bf16.gmra.mrb[28].mxu0 %vm465_vm0, %v3242_v31 }
  0x97   : > { %2949 = vmatprep.mubr.msk.bf16.mxu0 %vm465_vm0, %v3243_v32 }
  0x9e   : > { %2950 = vmatmul.mubr.msk.bf16.gmra.mrb[32].mxu0 %vm465_vm0, %v3243_v32  ;;  %v3265_v32 = vld [vmem:[%s3804_s27 + $0x78] sm:$0xff]  }
  0x9f   : > { %2951 = vmatprep.mubr.msk.bf16.mxu0 %vm465_vm0, %v3244_v33  ;;  %3144 = vmatprep.subr.bf16.mxu1 %v3265_v32 }
  0xa0   : > { %2979 = vmatprep.subr.bf16.mxu0 %v3265_v32 }
  0xa6   : > { %2952 = vmatmul.mubr.msk.bf16.gmra.mrb[36].mxu0 %vm465_vm0, %v3244_v33  ;;  %v3266_v33 = vld [vmem:[%s3804_s27 + $0x38] sm:$0xff]   ;;  %s4514_s27 = scalar_lea.vmem %s4713_s3, %s2915_s17  ;;  %s3527_s17 = scalar_lea.vmem %s4654_s13, 4096 }
  0xa7   : > { %2953 = vmatprep.mubr.msk.bf16.mxu0 %vm465_vm0, %v3245_v34  ;;  %3152 = vmatpush3.bf16.msra.mxu1 %v3266_v33  ;;  %p3528_p12 = scmp.ne.s32.totalorder %s4654_s13, %s3527_s17 }
  0xa8   : > { %2980 = vmatpush3.bf16.msra.mxu0 %v3266_v33 }
  0xa9   : > { %p3529_p13 = pnand %p3528_p12, %p3686_p4 }
  0xab   : > { %p3530_p0 = pneg %p3529_p13 }
  0xae   : > { %2954 = vmatmul.mubr.msk.bf16.gmra.mrb[40].mxu0 %vm465_vm0, %v3245_v34 }
  0xaf   : > { %2955 = vmatprep.mubr.msk.bf16.mxu0 %vm465_vm0, %v3246_v35 }
  0xb6   : > { %2956 = vmatmul.mubr.msk.bf16.gmra.mrb[44].mxu0 %vm465_vm0, %v3246_v35 }
  0xb7   : > { %2957 = vmatprep.mubr.msk.bf16.mxu0 %vm465_vm0, %v3247_v36 }
  0xbe   : > { %2958 = vmatmul.mubr.msk.bf16.gmra.mrb[48].mxu0 %vm465_vm0, %v3247_v36 }
  0xbf   : > { %2959 = vmatprep.mubr.msk.bf16.mxu0 %vm465_vm0, %v3248_v37 }
  0xc6   : > { %2960 = vmatmul.mubr.msk.bf16.gmra.mrb[52].mxu0 %vm465_vm0, %v3248_v37 }
  0xc7   : > { %2961 = vmatprep.mubr.msk.bf16.mxu0 %vm465_vm0, %v3249_v38 }
  0xce   : > { %2962 = vmatmul.mubr.msk.bf16.gmra.mrb[56].mxu0 %vm465_vm0, %v3249_v38 }
  0xcf   : > { %2963 = vmatprep.mubr.msk.bf16.mxu0 %vm465_vm0, %v3250_v39 }
  0xd6   : > { %2964 = vmatmul.mubr.msk.bf16.gmra.mrb[60].mxu0 %vm465_vm0, %v3250_v39 }
 0x131   : > { %v3813_v47 = vpop.f32.mrb[0].mxu0 }
 0x132   : > { %v3815_v48 = vpop.f32.mrb[1].mxu0 }
 0x133   : > { %v3818_v50 = vpop.f32.mrb[2].mxu0  ;;  %v1044_v51 = vmax.f32 %v3813_v47, %v3815_v48 }
 0x134   : > { %v3823_v53 = vpop.f32.mrb[3].mxu0 }
 0x135   : > { %v1047_v54 = vmax.f32 %v3818_v50, %v3823_v53 }
 0x139   : > { %v3828_v56 = vpop.f32.mrb[4].mxu0 }
 0x13a   : > { %v3830_v57 = vpop.f32.mrb[5].mxu0 }
 0x13b   : > { %v3832_v58 = vpop.f32.mrb[6].mxu0  ;;  %v1050_v59 = vmax.f32 %v3828_v56, %v3830_v57 }
 0x13c   : > { %v3836_v60 = vpop.f32.mrb[7].mxu0 }
 0x13d   : > { %v1053_v61 = vmax.f32 %v3832_v58, %v3836_v60 }
 0x141   : > { %v3840_v62 = vpop.f32.mrb[8].mxu0 }
 0x142   : > { %v3842_v63 = vpop.f32.mrb[9].mxu0 }
 0x143   : > { %v3844_v0 = vpop.f32.mrb[10].mxu0  ;;  %v1056_v1 = vmax.f32 %v3840_v62, %v3842_v63 }
 0x144   : > { %v3848_v2 = vpop.f32.mrb[11].mxu0 }
 0x145   : > { %1057 = vmax.xlane.f32.xlu0 %v1056_v1  ;;  %v1059_v3 = vmax.f32 %v3844_v0, %v3848_v2 }
 0x149   : > { %1060 = vmax.xlane.f32.xlu0 %v1059_v3  ;;  %v3852_v4 = vpop.f32.mrb[12].mxu0 }
 0x14a   : > { %v3854_v5 = vpop.f32.mrb[13].mxu0 }
 0x14b   : > { %v3856_v6 = vpop.f32.mrb[14].mxu0  ;;  %v1062_v7 = vmax.f32 %v3852_v4, %v3854_v5 }
 0x14c   : > { %v3860_v8 = vpop.f32.mrb[15].mxu0 }
 0x14d   : > { %1063 = vmax.xlane.f32.xlu1 %v1062_v7  ;;  %v1065_v9 = vmax.f32 %v3856_v6, %v3860_v8 }
 0x151   : > { %1066 = vmax.xlane.f32.xlu1 %v1065_v9  ;;  %v3864_v10 = vpop.f32.mrb[16].mxu0 }
 0x152   : > { %v3866_v11 = vpop.f32.mrb[17].mxu0 }
 0x153   : > { %v3868_v12 = vpop.f32.mrb[18].mxu0  ;;  %v1068_v13 = vmax.f32 %v3864_v10, %v3866_v11 }
 0x154   : > { %v3872_v14 = vpop.f32.mrb[19].mxu0 }
 0x155   : > { %1069 = vmax.xlane.f32.xlu0 %v1068_v13  ;;  %v1071_v15 = vmax.f32 %v3868_v12, %v3872_v14 }
 0x157   : > { %1072 = vmax.xlane.f32.xlu1 %v1071_v15 }
 0x159   : > { %v3876_v16 = vpop.f32.mrb[20].mxu0 }
 0x15a   : > { %v3878_v17 = vpop.f32.mrb[21].mxu0 }
 0x15b   : > { %v3880_v18 = vpop.f32.mrb[22].mxu0  ;;  %v1074_v19 = vmax.f32 %v3876_v16, %v3878_v17 }
 0x15c   : > { %v3884_v20 = vpop.f32.mrb[23].mxu0 }
 0x15d   : > { %1075 = vmax.xlane.f32.xlu0 %v1074_v19  ;;  %v1077_v21 = vmax.f32 %v3880_v18, %v3884_v20 }
 0x15f   : > { %1078 = vmax.xlane.f32.xlu1 %v1077_v21 }
 0x161   : > { %v3890_v24 = vpop.f32.mrb[24].mxu0 }
 0x162   : > { %v3893_v26 = vpop.f32.mrb[25].mxu0 }
 0x163   : > { %v3896_v28 = vpop.f32.mrb[26].mxu0  ;;  %v1080_v29 = vmax.f32 %v3890_v24, %v3893_v26 }
 0x164   : > { %v3900_v30 = vpop.f32.mrb[27].mxu0 }
 0x165   : > { %1081 = vmax.xlane.f32.xlu0 %v1080_v29  ;;  %v1083_v31 = vmax.f32 %v3896_v28, %v3900_v30 }
 0x167   : > { %1084 = vmax.xlane.f32.xlu1 %v1083_v31 }
 0x169   : > { %1045 = vmax.xlane.f32.xlu0 %v1044_v51  ;;  %v3909_v34 = vpop.f32.mrb[28].mxu0 }
 0x16a   : > { %v3911_v35 = vpop.f32.mrb[29].mxu0 }
 0x16b   : > { %1048 = vmax.xlane.f32.xlu1 %v1047_v54  ;;  %v3916_v36 = vpop.f32.mrb[30].mxu0  ;;  %v1086_v37 = vmax.f32 %v3909_v34, %v3911_v35 }
 0x16c   : > { %v3920_v38 = vpop.f32.mrb[31].mxu0 }
 0x16d   : > { %1087 = vmax.xlane.f32.xlu0 %v1086_v37  ;;  %v1089_v39 = vmax.f32 %v3916_v36, %v3920_v38 }
 0x16f   : > { %1090 = vmax.xlane.f32.xlu1 %v1089_v39 }
 0x171   : > { %1051 = vmax.xlane.f32.xlu0 %v1050_v59  ;;  %v3959_v41 = vpop.f32.mrb[32].mxu0 }
 0x172   : > { %v3961_v42 = vpop.f32.mrb[33].mxu0 }
 0x173   : > { %1054 = vmax.xlane.f32.xlu1 %v1053_v61  ;;  %v3966_v43 = vpop.f32.mrb[34].mxu0  ;;  %v1092_v44 = vmax.f32 %v3959_v41, %v3961_v42 }
 0x174   : > { %v3970_v45 = vpop.f32.mrb[35].mxu0 }
 0x175   : > { %1093 = vmax.xlane.f32.xlu0 %v1092_v44  ;;  %v1095_v46 = vmax.f32 %v3966_v43, %v3970_v45 }
 0x177   : > { %1096 = vmax.xlane.f32.xlu1 %v1095_v46 }
 0x179   : > { %v3974_v49 = vpop.f32.mrb[36].mxu0 }
 0x17a   : > { %v3976_v51 = vpop.f32.mrb[37].mxu0 }
 0x17b   : > { %v3978_v52 = vpop.f32.mrb[38].mxu0  ;;  %v1098_v54 = vmax.f32 %v3974_v49, %v3976_v51 }
 0x17c   : > { %v3982_v55 = vpop.f32.mrb[39].mxu0 }
 0x17d   : > { %1099 = vmax.xlane.f32.xlu0 %v1098_v54  ;;  %v1101_v59 = vmax.f32 %v3978_v52, %v3982_v55 }
 0x17f   : > { %1102 = vmax.xlane.f32.xlu1 %v1101_v59 }
 0x181   : > { %v3986_v61 = vpop.f32.mrb[40].mxu0 }
 0x182   : > { %v3988_v1 = vpop.f32.mrb[41].mxu0 }
 0x183   : > { %v3990_v3 = vpop.f32.mrb[42].mxu0  ;;  %v1104_v7 = vmax.f32 %v3986_v61, %v3988_v1 }
 0x184   : > { %v3994_v9 = vpop.f32.mrb[43].mxu0 }
 0x185   : > { %1105 = vmax.xlane.f32.xlu0 %v1104_v7  ;;  %v1107_v13 = vmax.f32 %v3990_v3, %v3994_v9 }
 0x187   : > { %1108 = vmax.xlane.f32.xlu1 %v1107_v13 }
 0x189   : > { %v3998_v15 = vpop.f32.mrb[44].mxu0 }
 0x18a   : > { %v4000_v19 = vpop.f32.mrb[45].mxu0 }
 0x18b   : > { %v4002_v21 = vpop.f32.mrb[46].mxu0  ;;  %v1110_v22 = vmax.f32 %v3998_v15, %v4000_v19 }
 0x18c   : > { %v4006_v23 = vpop.f32.mrb[47].mxu0 }
 0x18d   : > { %1111 = vmax.xlane.f32.xlu0 %v1110_v22  ;;  %v1113_v25 = vmax.f32 %v4002_v21, %v4006_v23 }
 0x18f   : > { %1114 = vmax.xlane.f32.xlu1 %v1113_v25 }
 0x191   : > { %v4010_v27 = vpop.f32.mrb[48].mxu0 }
 0x192   : > { %v4012_v29 = vpop.f32.mrb[49].mxu0 }
 0x193   : > { %v4014_v31 = vpop.f32.mrb[50].mxu0  ;;  %v1116_v32 = vmax.f32 %v4010_v27, %v4012_v29 }
 0x194   : > { %v4018_v33 = vpop.f32.mrb[51].mxu0 }
 0x195   : > { %1117 = vmax.xlane.f32.xlu0 %v1116_v32  ;;  %v1119_v37 = vmax.f32 %v4014_v31, %v4018_v33 }
 0x197   : > { %1120 = vmax.xlane.f32.xlu1 %v1119_v37 }
 0x199   : > { %v4022_v39 = vpop.f32.mrb[52].mxu0 }
 0x19a   : > { %4737 = vst [vmem:[#allocation8_spill] sm:$0xff] %v4022_v39  ;;  %v4024_v40 = vpop.f32.mrb[53].mxu0 }
 0x19b   : > { %4738 = vst [vmem:[#allocation9_spill] sm:$0xff] %v4024_v40  ;;  %v4026_v44 = vpop.f32.mrb[54].mxu0  ;;  %v1122_v46 = vmax.f32 %v4022_v39, %v4024_v40 }
 0x19c   : > { %4739 = vst [vmem:[#allocation10_spill] sm:$0xff] %v4026_v44  ;;  %v4030_v54 = vpop.f32.mrb[55].mxu0 }
 0x19d   : > { %4740 = vst [vmem:[#allocation11_spill] sm:$0xff] %v4030_v54  ;;  %1123 = vmax.xlane.f32.xlu0 %v1122_v46  ;;  %v1125_v59 = vmax.f32 %v4026_v44, %v4030_v54 }
 0x19f   : > { %1126 = vmax.xlane.f32.xlu1 %v1125_v59 }
 0x1a1   : > { %v4034_v7 = vpop.f32.mrb[56].mxu0 }
 0x1a2   : > { %4741 = vst [vmem:[#allocation12_spill] sm:$0xff] %v4034_v7  ;;  %v4036_v13 = vpop.f32.mrb[57].mxu0 }
 0x1a3   : > { %4742 = vst [vmem:[#allocation13_spill] sm:$0xff] %v4036_v13  ;;  %v4038_v22 = vpop.f32.mrb[58].mxu0  ;;  %v1128_v25 = vmax.f32 %v4034_v7, %v4036_v13 }
 0x1a4   : > { %4743 = vst [vmem:[#allocation14_spill] sm:$0xff] %v4038_v22  ;;  %v4042_v32 = vpop.f32.mrb[59].mxu0 }
 0x1a5   : > { %4744 = vst [vmem:[#allocation15_spill] sm:$0xff] %v4042_v32  ;;  %1129 = vmax.xlane.f32.xlu0 %v1128_v25  ;;  %v1131_v37 = vmax.f32 %v4038_v22, %v4042_v32 }
 0x1a7   : > { %1132 = vmax.xlane.f32.xlu1 %v1131_v37 }
 0x1a9   : > { %v4046_v46 = vpop.f32.mrb[60].mxu0 }
 0x1aa   : > { %v4048_v54 = vpop.f32.mrb[61].mxu0 }
 0x1ab   : > { %4745 = vst [vmem:[#allocation16_spill] sm:$0xff] %v4048_v54  ;;  %v4050_v59 = vpop.f32.mrb[62].mxu0  ;;  %v1134_v44 = vmax.f32 %v4046_v46, %v4048_v54 }
 0x1ac   : > { %4746 = vst [vmem:[#allocation17_spill] sm:$0xff] %v4050_v59  ;;  %v4054_v40 = vpop.f32.mrb[63].mxu0 }
 0x1ad   : > { %4747 = vst [vmem:[#allocation18_spill] sm:$0xff] %v4054_v40  ;;  %1135 = vmax.xlane.f32.xlu0 %v1134_v44  ;;  %v1137_v13 = vmax.f32 %v4050_v59, %v4054_v40 }
 0x1af   : > { %1138 = vmax.xlane.f32.xlu1 %v1137_v13 }
 0x1d2   : > { %v4058_v25 = vpop.xlane.xlu0 %1057 }
 0x1d3   : > { %v1276_v37 = vsub.f32 %v3840_v62, %v4058_v25  ;;  %v1277_v32 = vsub.f32 %v3842_v63, %v4058_v25  ;;  %v3267_v62 = vld [vmem:[%s4714_s4] sm:$0xff]  }
 0x1d4   : > { %3097 = vmatprep.subr.bf16.mxu1 %v3267_v62 }
 0x1d5   : > { %v1348_v22 = vmul.f32 1.442695, %v1276_v37  ;;  %v1350_v7 = vmul.f32 1.442695, %v1277_v32 }
 0x1d6   : > { %v4064_v39 = vpop.xlane.xlu0 %1060 }
 0x1d7   : > { %4748 = vst [vmem:[#allocation19_spill] sm:$0xff] %v4064_v39  ;;  %v1278_v54 = vsub.f32 %v3844_v0, %v4064_v39  ;;  %v1279_v44 = vsub.f32 %v3848_v2, %v4064_v39  ;;  %3271 = vpow2.f32 %v1348_v22 }
 0x1d8   : > { %3273 = vpow2.f32 %v1350_v7 }
 0x1d9   : > { %v1352_v13 = vmul.f32 1.442695, %v1278_v54  ;;  %v1354_v40 = vmul.f32 1.442695, %v1279_v44 }
 0x1da   : > { %v4070_v59 = vpop.xlane.xlu1 %1063 }
 0x1db   : > { %4749 = vst [vmem:[#allocation20_spill] sm:$0xff] %v4070_v59  ;;  %v1280_v63 = vsub.f32 %v3852_v4, %v4070_v59  ;;  %v1281_v32 = vsub.f32 %v3854_v5, %v4070_v59  ;;  %3275 = vpow2.f32 %v1352_v13 }
 0x1dc   : > { %3277 = vpow2.f32 %v1354_v40 }
 0x1dd   : > { %v1356_v0 = vmul.f32 1.442695, %v1280_v63  ;;  %v1358_v2 = vmul.f32 1.442695, %v1281_v32 }
 0x1de   : > { %v4079_v7 = vpop.xlane.xlu1 %1066 }
 0x1df   : > { %4750 = vst [vmem:[#allocation21_spill] sm:$0xff] %v4079_v7  ;;  %v1282_v54 = vsub.f32 %v3856_v6, %v4079_v7  ;;  %v1283_v22 = vsub.f32 %v3860_v8, %v4079_v7  ;;  %3279 = vpow2.f32 %v1356_v0 }
 0x1e0   : > { %3281 = vpow2.f32 %v1358_v2 }
 0x1e1   : > { %v1360_v37 = vmul.f32 1.442695, %v1282_v54  ;;  %v1362_v4 = vmul.f32 1.442695, %v1283_v22  ;;  %v3272_v44 = vpop.eup %3271 }
 0x1e2   : > { %v4085_v39 = vpop.xlane.xlu0 %1069  ;;  %v3274_v5 = vpop.eup %3273 }
 0x1e3   : > { %4751 = vst [vmem:[#allocation22_spill] sm:$0xff] %v4085_v39  ;;  %v1284_v40 = vsub.f32 %v3864_v10, %v4085_v39  ;;  %v1285_v13 = vsub.f32 %v3866_v11, %v4085_v39  ;;  %3283 = vpow2.f32 %v1360_v37  ;;  %v4093_v6 = vadd.f32 %v3274_v5, %v3272_v44 }
 0x1e4   : > { %v4091_v63 = vpop.xlane.xlu1 %1072  ;;  %3285 = vpow2.f32 %v1362_v4 }
 0x1e5   : > { %v1364_v8 = vmul.f32 1.442695, %v1284_v40  ;;  %v1366_v32 = vmul.f32 1.442695, %v1285_v13  ;;  %v3276_v0 = vpop.eup %3275  ;;  %v1286_v2 = vsub.f32 %v3868_v12, %v4091_v63  ;;  %v1287_v54 = vsub.f32 %v3872_v14, %v4091_v63 }
 0x1e6   : > { %v3278_v22 = vpop.eup %3277  ;;  %v1752_v10 = vpack.c.bf16 %v3276_v0, %v3272_v44 }
 0x1e7   : > { %3287 = vpow2.f32 %v1364_v8  ;;  %v1368_v7 = vmul.f32 1.442695, %v1286_v2  ;;  %v1370_v11 = vmul.f32 1.442695, %v1287_v54  ;;  %v1753_v37 = vpack.c.bf16 %v3278_v22, %v3274_v5 }
 0x1e8   : > { %3289 = vpow2.f32 %v1366_v32  ;;  %v4099_v39 = vadd.f32 %v3278_v22, %v3276_v0 }
 0x1e9   : > { %v3280_v59 = vpop.eup %3279  ;;  %3291 = vpow2.f32 %v1368_v7  ;;  %1956 = vmatprep.mubr.bf16.mxu1 %v1753_v37 }
 0x1ea   : > { %v4101_v4 = vpop.xlane.xlu0 %1075  ;;  %v3282_v40 = vpop.eup %3281  ;;  %3293 = vpow2.f32 %v1370_v11  ;;  %1957 = vmatmul.mubr.bf16.vlgmr.msra.gmra.mrb[0].mxu1 %v1752_v10 }
 0x1eb   : > { %v1289_v12 = vsub.f32 %v3878_v17, %v4101_v4  ;;  %v4107_v44 = vadd.f32 %v3282_v40, %v3280_v59  ;;  %3098 = vmatpush3.bf16.msra.mxu1 %v3267_v62  ;;  %v1288_v17 = vsub.f32 %v3876_v16, %v4101_v4 }
 0x1ec   : > { %v4105_v14 = vpop.xlane.xlu1 %1078 }
 0x1ed   : > { %v3284_v13 = vpop.eup %3283  ;;  %v1291_v5 = vsub.f32 %v3884_v20, %v4105_v14  ;;  %v1374_v32 = vmul.f32 1.442695, %v1289_v12  ;;  %v1290_v7 = vsub.f32 %v3880_v18, %v4105_v14  ;;  %v1372_v16 = vmul.f32 1.442695, %v1288_v17 }
 0x1ee   : > { %v3286_v8 = vpop.eup %3285  ;;  %v1754_v0 = vpack.c.bf16 %v3284_v13, %v3280_v59 }
 0x1ef   : > { %v1378_v2 = vmul.f32 1.442695, %v1291_v5  ;;  %v1755_v54 = vpack.c.bf16 %v3286_v8, %v3282_v40  ;;  %v4115_v22 = vadd.f32 %v3286_v8, %v3284_v13  ;;  %3295 = vpow2.f32 %v1374_v32 }
 0x1f0   : > { %v1376_v20 = vmul.f32 1.442695, %v1290_v7 }
 0x1f1   : > { %v3288_v10 = vpop.eup %3287  ;;  %1964 = vmatprep.mubr.bf16.mxu1 %v1755_v54  ;;  %3297 = vpow2.f32 %v1378_v2 }
 0x1f2   : > { %v4117_v62 = vpop.xlane.xlu0 %1081  ;;  %v3290_v11 = vpop.eup %3289  ;;  %1965 = vmatmul.mubr.bf16.gmra.mrb[4].mxu1 %v1754_v0  ;;  %3299 = vpow2.f32 %v1376_v20 }
 0x1f3   : > { %v1292_v37 = vsub.f32 %v3890_v24, %v4117_v62  ;;  %v4123_v59 = vadd.f32 %v3290_v11, %v3288_v10  ;;  %v4125_v40 = vpop.eup %3291  ;;  %v1293_v12 = vsub.f32 %v3893_v26, %v4117_v62  ;;  %3301 = vpow2.f32 %v1372_v16 }
 0x1f4   : > { %v4121_v18 = vpop.xlane.xlu1 %1084  ;;  %v4131_v5 = vpop.eup %3293  ;;  %v1756_v7 = vpack.c.bf16 %v4125_v40, %v3288_v10 }
 0x1f5   : > { %v1294_v13 = vsub.f32 %v3896_v28, %v4121_v18  ;;  %v1380_v8 = vmul.f32 1.442695, %v1292_v37  ;;  %v1295_v24 = vsub.f32 %v3900_v30, %v4121_v18  ;;  %v1757_v2 = vpack.c.bf16 %v4131_v5, %v3290_v11 }
 0x1f6   : > { %v4135_v32 = vpop.xlane.xlu0 %1045  ;;  %v1382_v28 = vmul.f32 1.442695, %v1293_v12 }
 0x1f7   : > { %v1384_v0 = vmul.f32 1.442695, %v1294_v13  ;;  %v1386_v54 = vmul.f32 1.442695, %v1295_v24  ;;  %v1268_v26 = vsub.f32 %v3813_v47, %v4135_v32  ;;  %1972 = vmatprep.mubr.bf16.mxu1 %v1757_v2  ;;  %v1269_v30 = vsub.f32 %v3815_v48, %v4135_v32 }
 0x1f8   : > { %v4141_v17 = vpop.xlane.xlu1 %1048  ;;  %3303 = vpow2.f32 %v1380_v8 }
 0x1f9   : > { %v1332_v37 = vmul.f32 1.442695, %v1268_v26  ;;  %v1270_v10 = vsub.f32 %v3818_v50, %v4141_v17  ;;  %v1271_v11 = vsub.f32 %v3823_v53, %v4141_v17  ;;  %3305 = vpow2.f32 %v1384_v0  ;;  %v3296_v48 = vpop.eup %3295 }
 0x1fa   : > { %v4149_v20 = vpop.xlane.xlu0 %1087  ;;  %v1334_v47 = vmul.f32 1.442695, %v1269_v30  ;;  %3307 = vpow2.f32 %v1386_v54  ;;  %1973 = vmatmul.mubr.bf16.gmra.mrb[8].mxu1 %v1756_v7 }
 0x1fb   : > { %v1296_v16 = vsub.f32 %v3909_v34, %v4149_v20  ;;  %3309 = vpow2.f32 %v1382_v28  ;;  %v1336_v13 = vmul.f32 1.442695, %v1270_v10  ;;  %v1297_v50 = vsub.f32 %v3911_v35, %v4149_v20  ;;  %v3298_v8 = vpop.eup %3297 }
 0x1fc   : > { %v4153_v12 = vpop.xlane.xlu1 %1090  ;;  %3311 = vpow2.f32 %v1332_v37  ;;  %v1338_v53 = vmul.f32 1.442695, %v1271_v11  ;;  %v1759_v0 = vpack.c.bf16 %v3298_v8, %v3296_v48  ;;  %v3300_v54 = vpop.eup %3299 }
 0x1fd   : > { %4752 = vst [vmem:[#allocation23_spill] sm:$0xff] %v4153_v12  ;;  %3313 = vpow2.f32 %v1334_v47  ;;  %v1298_v24 = vsub.f32 %v3916_v36, %v4153_v12  ;;  %v1299_v7 = vsub.f32 %v3920_v38, %v4153_v12  ;;  %v1388_v2 = vmul.f32 1.442695, %v1296_v16  ;;  %v3302_v30 = vpop.eup %3301 }
 0x1fe   : > { %v4161_v34 = vpop.xlane.xlu0 %1051  ;;  %3315 = vpow2.f32 %v1336_v13  ;;  %v1390_v26 = vmul.f32 1.442695, %v1297_v50  ;;  %1980 = vmatprep.mubr.bf16.mxu1 %v1759_v0  ;;  %v1758_v16 = vpack.c.bf16 %v3300_v54, %v3302_v30 }
 0x1ff   : > { %4753 = vst [vmem:[#allocation24_spill] sm:$0xff] %v4161_v34  ;;  %3317 = vpow2.f32 %v1338_v53  ;;  %v1272_v35 = vsub.f32 %v3828_v56, %v4161_v34  ;;  %v1392_v37 = vmul.f32 1.442695, %v1298_v24  ;;  %v1394_v36 = vmul.f32 1.442695, %v1299_v7 }
 0x200   : > { %v4163_v28 = vpop.xlane.xlu1 %1054  ;;  %v1273_v38 = vsub.f32 %v3830_v57, %v4161_v34  ;;  %3319 = vpow2.f32 %v1388_v2 }
 0x201   : > { %4754 = vst [vmem:[#allocation25_spill] sm:$0xff] %v4163_v28  ;;  %v1274_v11 = vsub.f32 %v3832_v58, %v4163_v28  ;;  %v1275_v47 = vsub.f32 %v3836_v60, %v4163_v28  ;;  %3321 = vpow2.f32 %v1390_v26  ;;  %v1340_v53 = vmul.f32 1.442695, %v1272_v35 }
 0x202   : > { %v3304_v10 = vpop.eup %3303  ;;  %v4173_v50 = vpop.xlane.xlu0 %1093  ;;  %1981 = vmatmul.mubr.bf16.gmra.mrb[12].mxu1 %v1758_v16  ;;  %3323 = vpow2.f32 %v1392_v37  ;;  %v1342_v7 = vmul.f32 1.442695, %v1273_v38  ;;  %v4183_v35 = vadd.f32 %v4131_v5, %v4125_v40  ;;  %v4187_v38 = vadd.f32 %v3300_v54, %v3298_v8 }
 0x203   : > { %v3306_v13 = vpop.eup %3305  ;;  %3325 = vpow2.f32 %v1394_v36  ;;  %v1344_v0 = vmul.f32 1.442695, %v1274_v11  ;;  %v1346_v2 = vmul.f32 1.442695, %v1275_v47  ;;  %v1300_v58 = vsub.f32 %v3959_v41, %v4173_v50 }
 0x204   : > { %v3308_v56 = vpop.eup %3307  ;;  %v4177_v34 = vpop.xlane.xlu1 %1096  ;;  %v1301_v26 = vsub.f32 %v3961_v42, %v4173_v50  ;;  %v1760_v12 = vpack.c.bf16 %v3306_v13, %v3304_v10  ;;  %3327 = vpow2.f32 %v1340_v53  ;;  %v4185_v36 = vadd.f32 %v3302_v30, %v3296_v48 }
 0x205   : > { %v3310_v24 = vpop.eup %3309  ;;  %3329 = vpow2.f32 %v1342_v7  ;;  %v1302_v41 = vsub.f32 %v3966_v43, %v4177_v34  ;;  %v1303_v42 = vsub.f32 %v3970_v45, %v4177_v34  ;;  %v1396_v40 = vmul.f32 1.442695, %v1300_v58 }
 0x206   : > { %v3312_v57 = vpop.eup %3311  ;;  %v1761_v28 = vpack.c.bf16 %v3308_v56, %v3310_v24  ;;  %v4195_v53 = vadd.f32 %v3310_v24, %v3304_v10  ;;  %v4197_v48 = vadd.f32 %v3308_v56, %v3306_v13  ;;  %3331 = vpow2.f32 %v1344_v0 }
 0x207   : > { %v3314_v60 = vpop.eup %3313  ;;  %v1398_v8 = vmul.f32 1.442695, %v1301_v26  ;;  %3333 = vpow2.f32 %v1346_v2  ;;  %v1400_v58 = vmul.f32 1.442695, %v1302_v41  ;;  %v1402_v13 = vmul.f32 1.442695, %v1303_v42 }
 0x208   : > { %v1524_v37 = vadd.f32 %v3314_v60, %v3312_v57  ;;  %v3316_v11 = vpop.eup %3315  ;;  %1988 = vmatprep.mubr.bf16.mxu1 %v1761_v28  ;;  %3335 = vpow2.f32 %v1396_v40 }
 0x209   : > { %v3318_v16 = vpop.eup %3317  ;;  %v1748_v5 = vpack.c.bf16 %v3316_v11, %v3312_v57  ;;  %3337 = vpow2.f32 %v1398_v8 }
 0x20a   : > { %v4193_v47 = vpop.xlane.xlu0 %1099  ;;  %1525 = vadd.xlane.f32.xlu0 %v1524_v37  ;;  %v1749_v54 = vpack.c.bf16 %v3318_v16, %v3314_v60  ;;  %v3320_v30 = vpop.eup %3319  ;;  %1989 = vmatmul.mubr.bf16.gmra.mrb[16].mxu1 %v1760_v12  ;;  %v1527_v45 = vadd.f32 %v3318_v16, %v3316_v11  ;;  %3339 = vpow2.f32 %v1400_v58 }
 0x20b   : > { %v1304_v43 = vsub.f32 %v3974_v49, %v4193_v47  ;;  %v3322_v7 = vpop.eup %3321  ;;  %v1305_v10 = vsub.f32 %v3976_v51, %v4193_v47  ;;  %3341 = vpow2.f32 %v1402_v13 }
 0x20c   : > { %v4201_v28 = vpop.xlane.xlu1 %1102  ;;  %1940 = vmatprep.mubr.bf16.mxu0 %v1749_v54  ;;  %1528 = vadd.xlane.f32.xlu1 %v1527_v45  ;;  %v4205_v56 = vadd.f32 %v3322_v7, %v3320_v30  ;;  %v3324_v24 = vpop.eup %3323 }
 0x20d   : > { %1941 = vmatmul.mubr.bf16.vlgmr.msra.gmra.mrb[64].mxu0 %v1748_v5  ;;  %v1306_v49 = vsub.f32 %v3978_v52, %v4201_v28  ;;  %v3326_v12 = vpop.eup %3325  ;;  %v1404_v57 = vmul.f32 1.442695, %v1304_v43  ;;  %v1307_v0 = vsub.f32 %v3982_v55, %v4201_v28  ;;  %v1762_v2 = vpack.c.bf16 %v3324_v24, %v3320_v30 }
 0x20e   : > { %v1406_v51 = vmul.f32 1.442695, %v1305_v10  ;;  %v1763_v26 = vpack.c.bf16 %v3326_v12, %v3322_v7  ;;  %v3328_v37 = vpop.eup %3327  ;;  %v4217_v42 = vadd.f32 %v3326_v12, %v3324_v24 }
 0x20f   : > { %v3330_v52 = vpop.eup %3329  ;;  %v1408_v16 = vmul.f32 1.442695, %v1306_v49  ;;  %3343 = vpow2.f32 %v1404_v57  ;;  %v1410_v40 = vmul.f32 1.442695, %v1307_v0 }
 0x210   : > { %1996 = vmatprep.mubr.bf16.mxu1 %v1763_v26  ;;  %v1530_v5 = vadd.f32 %v3330_v52, %v3328_v37  ;;  %v3332_v8 = vpop.eup %3331  ;;  %3345 = vpow2.f32 %v1406_v51 }
 0x211   : > { %v1750_v43 = vpack.c.bf16 %v3332_v8, %v3328_v37  ;;  %3347 = vpow2.f32 %v1408_v16 }
 0x212   : > { %v4211_v60 = vpop.xlane.xlu0 %1105  ;;  %1997 = vmatmul.mubr.bf16.gmra.mrb[20].mxu1 %v1762_v2  ;;  %1531 = vadd.xlane.f32.xlu0 %v1530_v5  ;;  %3349 = vpow2.f32 %v1410_v40 }
 0x213   : > { %v1308_v11 = vsub.f32 %v3986_v61, %v4211_v60  ;;  %v1309_v55 = vsub.f32 %v3988_v1, %v4211_v60  ;;  %v3334_v61 = vpop.eup %3333 }
 0x214   : > { %v4215_v41 = vpop.xlane.xlu1 %1108  ;;  %v1751_v7 = vpack.c.bf16 %v3334_v61, %v3330_v52  ;;  %v1533_v1 = vadd.f32 %v3334_v61, %v3332_v8  ;;  %v3336_v10 = vpop.eup %3335 }
 0x215   : > { %v1310_v54 = vsub.f32 %v3990_v3, %v4215_v41  ;;  %v1412_v30 = vmul.f32 1.442695, %v1308_v11  ;;  %v1311_v45 = vsub.f32 %v3994_v9, %v4215_v41  ;;  %v1414_v58 = vmul.f32 1.442695, %v1309_v55  ;;  %v3338_v24 = vpop.eup %3337 }
 0x216   : > { %1948 = vmatprep.mubr.bf16.mxu0 %v1751_v7  ;;  %1534 = vadd.xlane.f32.xlu1 %v1533_v1  ;;  %v4234_v0 = vadd.f32 %v3338_v24, %v3336_v10  ;;  %v3340_v2 = vpop.eup %3339 }
 0x217   : > { %v1416_v49 = vmul.f32 1.442695, %v1310_v54  ;;  %3351 = vpow2.f32 %v1412_v30  ;;  %1949 = vmatmul.mubr.bf16.gmra.mrb[68].mxu0 %v1750_v43  ;;  %v1418_v9 = vmul.f32 1.442695, %v1311_v45  ;;  %1537 = vadd.xlane.f32.xlu0 %v4093_v6  ;;  %v3342_v51 = vpop.eup %3341  ;;  %v1764_v26 = vpack.c.bf16 %v3340_v2, %v3336_v10 }
 0x218   : > { %3353 = vpow2.f32 %v1414_v58  ;;  %v4241_v52 = vadd.f32 %v3342_v51, %v3340_v2  ;;  %v4756_v2 = vld [vmem:[#allocation9_spill] sm:$0xff] }
 0x219   : > { %3355 = vpow2.f32 %v1416_v49  ;;  %v3344_v16 = vpop.eup %3343 }
 0x21a   : > { %v4225_v13 = vpop.xlane.xlu0 %1111  ;;  %1540 = vadd.xlane.f32.xlu1 %v4099_v39  ;;  %3357 = vpow2.f32 %v1418_v9  ;;  %v3346_v55 = vpop.eup %3345 }
 0x21b   : > { %v1312_v3 = vsub.f32 %v3998_v15, %v4225_v13  ;;  %v1313_v12 = vsub.f32 %v4000_v19, %v4225_v13  ;;  %v1765_v19 = vpack.c.bf16 %v3342_v51, %v3338_v24  ;;  %1543 = vadd.xlane.f32.xlu0 %v4107_v44  ;;  %v4246_v8 = vadd.f32 %v3346_v55, %v3344_v16  ;;  %v3348_v39 = vpop.eup %3347 }
 0x21c   : > { %v4232_v57 = vpop.xlane.xlu1 %1114  ;;  %v3350_v54 = vpop.eup %3349  ;;  %v1766_v61 = vpack.c.bf16 %v3348_v39, %v3344_v16  ;;  %v4758_v16 = vld [vmem:[#allocation11_spill] sm:$0xff] }
 0x21d   : > { %v1420_v37 = vmul.f32 1.442695, %v1312_v3  ;;  %v1422_v11 = vmul.f32 1.442695, %v1313_v12  ;;  %v1314_v15 = vsub.f32 %v4002_v21, %v4232_v57  ;;  %v1315_v6 = vsub.f32 %v4006_v23, %v4232_v57  ;;  %2004 = vmatprep.mubr.bf16.mxu1 %v1765_v19 }
 0x21e   : > { %2005 = vmatmul.mubr.bf16.gmra.mrb[24].mxu1 %v1764_v26  ;;  %1546 = vadd.xlane.f32.xlu1 %v4115_v22  ;;  %v1767_v43 = vpack.c.bf16 %v3350_v54, %v3346_v55 }
 0x21f   : > { %v1424_v40 = vmul.f32 1.442695, %v1314_v15  ;;  %3359 = vpow2.f32 %v1420_v37  ;;  %v1426_v5 = vmul.f32 1.442695, %v1315_v6  ;;  %1549 = vadd.xlane.f32.xlu0 %v4123_v59 }
 0x220   : > { %3361 = vpow2.f32 %v1422_v11  ;;  %2012 = vmatprep.mubr.bf16.mxu1 %v1767_v43 }
 0x221   : > { %3363 = vpow2.f32 %v1424_v40  ;;  %v3352_v7 = vpop.eup %3351 }
 0x222   : > { %v4244_v21 = vpop.xlane.xlu0 %1117  ;;  %3365 = vpow2.f32 %v1426_v5  ;;  %v3354_v1 = vpop.eup %3353  ;;  %1552 = vadd.xlane.f32.xlu1 %v4183_v35  ;;  %v4755_v35 = vld [vmem:[#allocation8_spill] sm:$0xff] }
 0x223   : > { %v1316_v23 = vsub.f32 %v4010_v27, %v4244_v21  ;;  %v1317_v44 = vsub.f32 %v4012_v29, %v4244_v21  ;;  %v4261_v29 = vadd.f32 %v3350_v54, %v3348_v39  ;;  %1555 = vadd.xlane.f32.xlu0 %v4185_v36  ;;  %v4264_v10 = vadd.f32 %v3354_v1, %v3352_v7  ;;  %v3356_v24 = vpop.eup %3355 }
 0x224   : > { %v4254_v30 = vpop.xlane.xlu1 %1120  ;;  %v3358_v3 = vpop.eup %3357 }
 0x225   : > { %v1428_v45 = vmul.f32 1.442695, %v1316_v23  ;;  %v1430_v58 = vmul.f32 1.442695, %v1317_v44  ;;  %v1318_v22 = vsub.f32 %v4014_v31, %v4254_v30  ;;  %v1319_v27 = vsub.f32 %v4018_v33, %v4254_v30 }
 0x226   : > { %2013 = vmatmul.mubr.bf16.gmra.mrb[28].mxu1 %v1766_v61  ;;  %v1768_v31 = vpack.c.bf16 %v3356_v24, %v3352_v7  ;;  %1558 = vadd.xlane.f32.xlu1 %v4187_v38  ;;  %v1769_v33 = vpack.c.bf16 %v3358_v3, %v3354_v1  ;;  %v4276_v37 = vadd.f32 %v3358_v3, %v3356_v24  ;;  %v4757_v38 = vld [vmem:[#allocation10_spill] sm:$0xff] }
 0x227   : > { %3367 = vpow2.f32 %v1428_v45  ;;  %v1432_v59 = vmul.f32 1.442695, %v1318_v22  ;;  %v1434_v49 = vmul.f32 1.442695, %v1319_v27  ;;  %1561 = vadd.xlane.f32.xlu0 %v4195_v53  ;;  %v4761_v3 = vld [vmem:[#allocation14_spill] sm:$0xff] }
 0x228   : > { %3369 = vpow2.f32 %v1430_v58  ;;  %2020 = vmatprep.mubr.bf16.mxu1 %v1769_v33 }
 0x229   : > { %3371 = vpow2.f32 %v1432_v59  ;;  %v3360_v36 = vpop.eup %3359  ;;  %v3268_v59 = vld [vmem:[%s4714_s4 + $0x8] sm:$0xff]  }
 0x22a   : > { %v4266_v12 = vpop.xlane.xlu0 %1123  ;;  %3373 = vpow2.f32 %v1434_v49  ;;  %v3362_v11 = vpop.eup %3361  ;;  %1564 = vadd.xlane.f32.xlu1 %v4197_v48  ;;  %v4759_v48 = vld [vmem:[#allocation12_spill] sm:$0xff]  ;;  %3099 = vmatprep.subr.bf16.mxu1 %v3268_v59 }
 0x22b   : > { %v1320_v9 = vsub.f32 %v4755_v35, %v4266_v12  ;;  %v1321_v51 = vsub.f32 %v4756_v2, %v4266_v12  ;;  %v4282_v40 = vadd.f32 %v3362_v11, %v3360_v36  ;;  %v3364_v53 = vpop.eup %3363  ;;  %1567 = vadd.xlane.f32.xlu0 %v4205_v56  ;;  %v4760_v56 = vld [vmem:[#allocation13_spill] sm:$0xff]  ;;  %v4762_v35 = vld [vmem:[#allocation15_spill] sm:$0xff]  ;;  %3100 = vmatpush3.bf16.msra.mxu1 %v3268_v59 }
 0x22c   : > { %v4274_v26 = vpop.xlane.xlu1 %1126  ;;  %v3366_v39 = vpop.eup %3365  ;;  %v1770_v44 = vpack.c.bf16 %v3364_v53, %v3360_v36 }
 0x22d   : > { %v1436_v15 = vmul.f32 1.442695, %v1320_v9  ;;  %v1322_v19 = vsub.f32 %v4757_v38, %v4274_v26  ;;  %v1438_v6 = vmul.f32 1.442695, %v1321_v51  ;;  %v1323_v55 = vsub.f32 %v4758_v16, %v4274_v26 }
 0x22e   : > { %v1771_v54 = vpack.c.bf16 %v3366_v39, %v3362_v11  ;;  %v1593_v61 = vadd.f32 %v3366_v39, %v3364_v53  ;;  %2021 = vmatmul.mubr.bf16.gmra.mrb[32].mxu1 %v1768_v31  ;;  %1570 = vadd.xlane.f32.xlu1 %v4217_v42 }
 0x22f   : > { %v1440_v5 = vmul.f32 1.442695, %v1322_v19  ;;  %3375 = vpow2.f32 %v1436_v15  ;;  %v1442_v23 = vmul.f32 1.442695, %v1323_v55  ;;  %1573 = vadd.xlane.f32.xlu0 %v4234_v0 }
 0x230   : > { %3377 = vpow2.f32 %v1438_v6  ;;  %2028 = vmatprep.mubr.bf16.mxu1 %v1771_v54  ;;  %v4763_v6 = vld [vmem:[#allocation16_spill] sm:$0xff]  ;;  %v4765_v54 = vld [vmem:[#allocation18_spill] sm:$0xff] }
 0x231   : > { %v3368_v43 = vpop.eup %3367  ;;  %3379 = vpow2.f32 %v1440_v5 }
 0x232   : > { %v4286_v45 = vpop.xlane.xlu0 %1129  ;;  %v3370_v7 = vpop.eup %3369  ;;  %3381 = vpow2.f32 %v1442_v23  ;;  %1576 = vadd.xlane.f32.xlu1 %v4241_v52  ;;  %v4764_v23 = vld [vmem:[#allocation17_spill] sm:$0xff] }
 0x233   : > { %v1324_v58 = vsub.f32 %v4759_v48, %v4286_v45  ;;  %v1325_v22 = vsub.f32 %v4760_v56, %v4286_v45  ;;  %v1596_v27 = vadd.f32 %v3370_v7, %v3368_v43  ;;  %v3372_v24 = vpop.eup %3371  ;;  %1579 = vadd.xlane.f32.xlu0 %v4246_v8 }
 0x234   : > { %v4294_v1 = vpop.xlane.xlu1 %1132  ;;  %v3374_v33 = vpop.eup %3373  ;;  %v1772_v36 = vpack.c.bf16 %v3372_v24, %v3368_v43 }
 0x235   : > { %v1444_v42 = vmul.f32 1.442695, %v1324_v58  ;;  %v1446_v49 = vmul.f32 1.442695, %v1325_v22  ;;  %v1326_v31 = vsub.f32 %v4761_v3, %v4294_v1  ;;  %v1327_v9 = vsub.f32 %v4762_v35, %v4294_v1 }
 0x236   : > { %v1773_v2 = vpack.c.bf16 %v3374_v33, %v3370_v7  ;;  %v1599_v51 = vadd.f32 %v3374_v33, %v3372_v24  ;;  %2029 = vmatmul.mubr.bf16.gmra.mrb[36].mxu1 %v1770_v44  ;;  %1582 = vadd.xlane.f32.xlu1 %v4261_v29 }
 0x237   : > { %v1448_v0 = vmul.f32 1.442695, %v1326_v31  ;;  %3383 = vpow2.f32 %v1444_v42  ;;  %v1450_v11 = vmul.f32 1.442695, %v1327_v9  ;;  %1585 = vadd.xlane.f32.xlu0 %v4264_v10 }
 0x238   : > { %3385 = vpow2.f32 %v1446_v49  ;;  %2036 = vmatprep.mubr.bf16.mxu1 %v1773_v2  ;;  %v3270_v2 = vld [vmem:[%s4714_s4 + $0x18] sm:$0xff]  }
 0x239   : > { %v3376_v15 = vpop.eup %3375  ;;  %3387 = vpow2.f32 %v1448_v0  ;;  %v3269_v0 = vld [vmem:[%s4714_s4 + $0x10] sm:$0xff]  }
 0x23a   : > { %v4305_v38 = vpop.xlane.xlu0 %1135  ;;  %v3378_v19 = vpop.eup %3377  ;;  %3389 = vpow2.f32 %v1450_v11  ;;  %1588 = vadd.xlane.f32.xlu1 %v4276_v37  ;;  %3101 = vmatprep.subr.bf16.mxu1 %v3269_v0  ;;  %v4766_v11 = vld [vmem:[#allocation19_spill] sm:$0xff] }
 0x23b   : > { %v1328_v52 = vsub.f32 %v4046_v46, %v4305_v38  ;;  %v1329_v16 = vsub.f32 %v4763_v6, %v4305_v38  ;;  %v1602_v55 = vadd.f32 %v3378_v19, %v3376_v15  ;;  %v3380_v53 = vpop.eup %3379  ;;  %1591 = vadd.xlane.f32.xlu0 %v4282_v40  ;;  %3102 = vmatpush3.bf16.msra.mxu1 %v3269_v0  ;;  %v4767_v6 = vld [vmem:[#allocation20_spill] sm:$0xff] }
 0x23c   : > { %v4313_v8 = vpop.xlane.xlu1 %1138  ;;  %v3382_v44 = vpop.eup %3381  ;;  %v1774_v46 = vpack.c.bf16 %v3380_v53, %v3376_v15  ;;  %3103 = vmatprep.subr.bf16.mxu1 %v3270_v2  ;;  %v1177_v15 = vsub.f32 -inf, %v4766_v11 }
 0x23d   : > { %v1452_v5 = vmul.f32 1.442695, %v1328_v52  ;;  %v1454_v39 = vmul.f32 1.442695, %v1329_v16  ;;  %v1330_v29 = vsub.f32 %v4764_v23, %v4313_v8  ;;  %v1331_v43 = vsub.f32 %v4765_v54, %v4313_v8 }
 0x23e   : > { %v1775_v48 = vpack.c.bf16 %v3382_v44, %v3378_v19  ;;  %v1605_v58 = vadd.f32 %v3382_v44, %v3380_v53  ;;  %2037 = vmatmul.mubr.bf16.gmra.mrb[40].mxu1 %v1772_v36  ;;  %1594 = vadd.xlane.f32.xlu1 %v1593_v61  ;;  %v1214_v52 = vmul.f32 1.442695, %v1177_v15  ;;  %v1178_v16 = vsub.f32 -inf, %v4767_v6 }
 0x23f   : > { %v1456_v7 = vmul.f32 1.442695, %v1330_v29  ;;  %3391 = vpow2.f32 %v1452_v5  ;;  %v1458_v10 = vmul.f32 1.442695, %v1331_v43  ;;  %1597 = vadd.xlane.f32.xlu0 %v1596_v27  ;;  %3104 = vmatpush3.bf16.msra.mxu1 %v3270_v2 }
 0x240   : > { %3393 = vpow2.f32 %v1454_v39  ;;  %2044 = vmatprep.mubr.bf16.mxu1 %v1775_v48  ;;  %v1216_v23 = vmul.f32 1.442695, %v1178_v16 }
 0x241   : > { %v3384_v56 = vpop.eup %3383  ;;  %3395 = vpow2.f32 %v1456_v7 }
 0x242   : > { %v3386_v22 = vpop.eup %3385  ;;  %3397 = vpow2.f32 %v1458_v10  ;;  %1600 = vadd.xlane.f32.xlu1 %v1599_v51  ;;  %v1176_v51 = vsub.f32 -inf, %v4058_v25  ;;  %v4769_v25 = vld [vmem:[#allocation22_spill] sm:$0xff] }
 0x243   : > { %v1608_v59 = vadd.f32 %v3386_v22, %v3384_v56  ;;  %v3388_v24 = vpop.eup %3387  ;;  %1603 = vadd.xlane.f32.xlu0 %v1602_v55  ;;  %v4768_v55 = vld [vmem:[#allocation21_spill] sm:$0xff]  ;;  %v1180_v43 = vsub.f32 -inf, %v4769_v25  ;;  %v1691_v25 = vld [vmem:[#allocation4 + $0x38] sm:$0xff] }
 0x244   : > { %v3390_v42 = vpop.eup %3389  ;;  %v1776_v37 = vpack.c.bf16 %v3388_v24, %v3384_v56  ;;  %v1212_v19 = vmul.f32 1.442695, %v1176_v51  ;;  %v1179_v53 = vsub.f32 -inf, %v4768_v55 }
 0x245   : > { %v1777_v49 = vpack.c.bf16 %v3390_v42, %v3386_v22  ;;  %v1611_v3 = vadd.f32 %v3390_v42, %v3388_v24  ;;  %v1688_v42 = vld [vmem:[#allocation4 + $0x20] sm:$0xff] }
 0x246   : > { %2045 = vmatmul.mubr.bf16.gmra.mrb[44].mxu1 %v1774_v46  ;;  %1606 = vadd.xlane.f32.xlu1 %v1605_v58  ;;  %3399 = vpow2.f32 %v1212_v19  ;;  %v1218_v29 = vmul.f32 1.442695, %v1179_v53  ;;  %v1181_v46 = vsub.f32 -inf, %v4091_v63  ;;  %v1220_v58 = vmul.f32 1.442695, %v1180_v43  ;;  %v1690_v53 = vld [vmem:[#allocation4 + $0x30] sm:$0xff] }
 0x247   : > { %2052 = vmatprep.mubr.bf16.mxu1 %v1777_v49  ;;  %1609 = vadd.xlane.f32.xlu0 %v1608_v59  ;;  %3401 = vpow2.f32 %v1214_v52  ;;  %v1185_v43 = vsub.f32 -inf, %v4121_v18 }
 0x248   : > { %3403 = vpow2.f32 %v1216_v23  ;;  %v1222_v56 = vmul.f32 1.442695, %v1181_v46  ;;  %v1184_v23 = vsub.f32 -inf, %v4117_v62 }
 0x249   : > { %v3392_v40 = vpop.eup %3391  ;;  %3405 = vpow2.f32 %v1218_v29 }
 0x24a   : > { %v3394_v31 = vpop.eup %3393  ;;  %1612 = vadd.xlane.f32.xlu1 %v1611_v3  ;;  %3407 = vpow2.f32 %v1220_v58 }
 0x24b   : > { %v1614_v33 = vadd.f32 %v3394_v31, %v3392_v40  ;;  %v3396_v61 = vpop.eup %3395  ;;  %3409 = vpow2.f32 %v1222_v56 }
 0x24c   : > { %v3398_v35 = vpop.eup %3397  ;;  %v1778_v9 = vpack.c.bf16 %v3396_v61, %v3392_v40 }
 0x24d   : > { %v1779_v27 = vpack.c.bf16 %v3398_v35, %v3394_v31  ;;  %v1617_v36 = vadd.f32 %v3398_v35, %v3396_v61  ;;  %1615 = vadd.xlane.f32.xlu0 %v1614_v33  ;;  %v1689_v31 = vld [vmem:[#allocation4 + $0x28] sm:$0xff]  ;;  %v1182_v33 = vsub.f32 -inf, %v4101_v4 }
 0x24e   : > { %2053 = vmatmul.mubr.bf16.gmra.mrb[48].mxu1 %v1776_v37 }
 0x24f   : > { %2060 = vmatprep.mubr.bf16.mxu1 %v1779_v27  ;;  %1618 = vadd.xlane.f32.xlu1 %v1617_v36  ;;  %v1183_v27 = vsub.f32 -inf, %v4105_v14  ;;  %v1224_v19 = vmul.f32 1.442695, %v1182_v33  ;;  %v1173_v33 = vsub.f32 -inf, %v4141_v17 }
 0x250   : > { %v3400_v7 = vpop.eup %3399 }
 0x251   : > { %v3402_v48 = vpop.eup %3401  ;;  %v1496_v22 = vmul.f32 0.0, %v3400_v7  ;;  %v1720_v61 = vmul.f32 %v3400_v7, %v1688_v42  ;;  %v1226_v16 = vmul.f32 1.442695, %v1183_v27  ;;  %v1228_v42 = vmul.f32 1.442695, %v1184_v23 }
 0x252   : > { %v1497_v24 = vmul.f32 0.0, %v3402_v48  ;;  %v1721_v51 = vmul.f32 %v3402_v48, %v1689_v31 }
 0x256   : > { %2061 = vmatmul.mubr.bf16.gmra.mrb[52].mxu1 %v1778_v9  ;;  %v3404_v9 = vpop.eup %3403 }
 0x257   : > { %v3406_v0 = vpop.eup %3405  ;;  %v1498_v52 = vmul.f32 0.0, %v3404_v9  ;;  %v1722_v48 = vmul.f32 %v3404_v9, %v1690_v53 }
 0x258   : > { %v1499_v55 = vmul.f32 0.0, %v3406_v0  ;;  %v3408_v56 = vpop.eup %3407 }
 0x259   : > { %v3410_v62 = vpop.eup %3409 }
 0x297   : > { %v4331_v5 = vpop.xlane.xlu0 %1525 }
 0x299   : > { %v4333_v39 = vpop.xlane.xlu1 %1528 }
 0x29f   : > { %v4335_v44 = vpop.xlane.xlu0 %1531 }
 0x2a3   : > { %v4337_v54 = vpop.xlane.xlu1 %1534 }
 0x2a4   : > { %v1538_v10 = vpop.xlane.xlu0 %1537 }
 0x2a5   : > { %v1624_v37 = vadd.f32 %v1538_v10, %v1496_v22  ;;  %v1172_v22 = vsub.f32 -inf, %v4135_v32  ;;  %v1692_v32 = vld [vmem:[#allocation4 + $0x40] sm:$0xff] }
 0x2a7   : > { %v1541_v59 = vpop.xlane.xlu1 %1540  ;;  %3411 = vrcp.f32 %v1624_v37  ;;  %v1204_v27 = vmul.f32 1.442695, %v1172_v22 }
 0x2a8   : > { %v1625_v3 = vadd.f32 %v1541_v59, %v1497_v24  ;;  %v1544_v15 = vpop.xlane.xlu0 %1543  ;;  %v1723_v59 = vmul.f32 %v3406_v0, %v1691_v25 }
 0x2a9   : > { %v1626_v14 = vadd.f32 %v1544_v15, %v1498_v52 }
 0x2aa   : > { %3413 = vrcp.f32 %v1625_v3  ;;  %v1230_v3 = vmul.f32 1.442695, %v1185_v43 }
 0x2ab   : > { %v1547_v6 = vpop.xlane.xlu1 %1546  ;;  %3415 = vpow2.f32 %v1224_v19  ;;  %v1724_v19 = vmul.f32 %v3408_v56, %v1692_v32  ;;  %v1694_v32 = vld [vmem:[#allocation4 + $0x50] sm:$0xff] }
 0x2ac   : > { %v1627_v46 = vadd.f32 %v1547_v6, %v1499_v55  ;;  %3417 = vpow2.f32 %v1226_v16  ;;  %v1550_v18 = vpop.xlane.xlu0 %1549  ;;  %v1693_v6 = vld [vmem:[#allocation4 + $0x48] sm:$0xff]  ;;  %v1186_v16 = vsub.f32 -inf, %v4149_v20 }
 0x2ad   : > { %3419 = vrcp.f32 %v1626_v14  ;;  %v4770_v14 = vld [vmem:[#allocation23_spill] sm:$0xff] }
 0x2ae   : > { %3421 = vrcp.f32 %v1627_v46 }
 0x2af   : > { %3423 = vpow2.f32 %v1228_v42 }
 0x2b0   : > { %3425 = vpow2.f32 %v1230_v3 }
 0x2b1   : > { %v3412_v31 = vpop.eup %3411  ;;  %3427 = vpow2.f32 %v1204_v27 }
 0x2b4   : > { %v3414_v9 = vpop.eup %3413 }
 0x2b5   : > { %v3416_v43 = vpop.eup %3415 }
 0x2bd   : > { %v2993_v49 = vpop.f32.mrb[0].mxu1 }
 0x2be   : > { %v2994_v40 = vpop.f32.mrb[1].mxu1 }
 0x2bf   : > { %v2995_v63 = vadd.f32 %v2994_v40, %v2993_v49  ;;  %v2996_v35 = vpop.f32.mrb[2].mxu1 }
 0x2c0   : > { %v2997_v36 = vpop.f32.mrb[3].mxu1 }
 0x2c1   : > { %v2073_v2 = vadd.f32 %v2995_v63, %v1720_v61  ;;  %v2998_v11 = vadd.f32 %v2997_v36, %v2996_v35  ;;  %v1500_v61 = vmul.f32 0.0, %v3408_v56  ;;  %v1553_v63 = vpop.xlane.xlu1 %1552  ;;  %v1501_v36 = vmul.f32 0.0, %v3410_v62 }
 0x2c3   : > { %2105 = vst.msk [vmem:[#allocation4 + $0x20] sm:$0xff] %vm465_vm0, %v2073_v2  ;;  %v2074_v4 = vadd.f32 %v2998_v11, %v1721_v51  ;;  %v1628_v2 = vadd.f32 %v1550_v18, %v1500_v61  ;;  %v1629_v17 = vadd.f32 %v1553_v63, %v1501_v36  ;;  %v1502_v18 = vmul.f32 0.0, %v3416_v43  ;;  %v4772_v61 = vld [vmem:[#allocation25_spill] sm:$0xff] }
 0x2c4   : > { %v1175_v63 = vsub.f32 -inf, %v4772_v61  ;;  %v1684_v61 = vld [vmem:[#allocation4] sm:$0xff] }
 0x2c5   : > { %2106 = vst.msk [vmem:[#allocation4 + $0x28] sm:$0xff] %vm465_vm0, %v2074_v4  ;;  %v2999_v29 = vpop.f32.mrb[4].mxu1  ;;  %v1206_v4 = vmul.f32 1.442695, %v1173_v33  ;;  %3429 = vrcp.f32 %v1628_v2 }
 0x2c6   : > { %v3000_v7 = vpop.f32.mrb[5].mxu1  ;;  %3431 = vrcp.f32 %v1629_v17 }
 0x2c7   : > { %v3001_v58 = vadd.f32 %v3000_v7, %v2999_v29  ;;  %v3002_v10 = vpop.f32.mrb[6].mxu1  ;;  %v1187_v29 = vsub.f32 -inf, %v4770_v14  ;;  %v1725_v7 = vmul.f32 %v3410_v62, %v1693_v6  ;;  %3433 = vpow2.f32 %v1206_v4 }
 0x2c8   : > { %v3003_v24 = vpop.f32.mrb[7].mxu1  ;;  %v1726_v6 = vmul.f32 %v3416_v43, %v1694_v32  ;;  %v1189_v14 = vsub.f32 -inf, %v4177_v34  ;;  %v1190_v32 = vsub.f32 -inf, %v4193_v47 }
 0x2c9   : > { %v2075_v37 = vadd.f32 %v3001_v58, %v1722_v48  ;;  %v3004_v49 = vadd.f32 %v3003_v24, %v3002_v10  ;;  %v3418_v58 = vpop.eup %3417  ;;  %v4771_v10 = vld [vmem:[#allocation24_spill] sm:$0xff]  ;;  %v1234_v3 = vmul.f32 1.442695, %v1187_v29 }
 0x2ca   : > { %v2236_v40 = vld [vmem:[#allocation4 + $0x20] sm:$0xff]  ;;  %v1174_v56 = vsub.f32 -inf, %v4771_v10  ;;  %v3420_v20 = vpop.eup %3419 }
 0x2cb   : > { %2107 = vst.msk [vmem:[#allocation4 + $0x30] sm:$0xff] %vm465_vm0, %v2075_v37  ;;  %v2076_v35 = vadd.f32 %v3004_v49, %v1723_v59  ;;  %v4351_v11 = vmul.f32 %v3412_v31, %v2236_v40  ;;  %v1232_v59 = vmul.f32 1.442695, %v1186_v16  ;;  %v3422_v42 = vpop.eup %3421  ;;  %v1556_v37 = vpop.xlane.xlu0 %1555 }
 0x2cc   : > { %v2237_v0 = vld [vmem:[#allocation4 + $0x28] sm:$0xff]  ;;  %v1559_v40 = vpop.xlane.xlu1 %1558  ;;  %v1208_v33 = vmul.f32 1.442695, %v1174_v56  ;;  %v1630_v27 = vadd.f32 %v1556_v37, %v1502_v18  ;;  %v1696_v18 = vld [vmem:[#allocation4 + $0x60] sm:$0xff] }
 0x2cd   : > { %2108 = vst.msk [vmem:[#allocation4 + $0x38] sm:$0xff] %vm465_vm0, %v2076_v35  ;;  %v3005_v51 = vpop.f32.mrb[8].mxu1  ;;  %v4353_v15 = vmul.f32 %v3414_v9, %v2237_v0  ;;  %v1503_v35 = vmul.f32 0.0, %v3418_v58  ;;  %v3424_v9 = vpop.eup %3423  ;;  %3435 = vpow2.f32 %v1232_v59 }
 0x2ce   : > { %v3006_v52 = vpop.f32.mrb[9].mxu1  ;;  %v3426_v2 = vpop.eup %3425  ;;  %3437 = vpow2.f32 %v1234_v3  ;;  %v1504_v59 = vmul.f32 0.0, %v3424_v9 }
 0x2cf   : > { %v3007_v55 = vadd.f32 %v3006_v52, %v3005_v51  ;;  %v3008_v53 = vpop.f32.mrb[10].mxu1  ;;  %v2298_v23 = vpack.c.bf16 %v4353_v15, %v4351_v11  ;;  %v1188_v51 = vsub.f32 -inf, %v4173_v50  ;;  %v1631_v17 = vadd.f32 %v1559_v40, %v1503_v35  ;;  %v1695_v52 = vld [vmem:[#allocation4 + $0x58] sm:$0xff] }
 0x2d0   : > { %v3009_v25 = vpop.f32.mrb[11].mxu1  ;;  %3439 = vpow2.f32 %v1208_v33  ;;  %v1505_v3 = vmul.f32 0.0, %v3426_v2 }
 0x2d1   : > { %v2077_v46 = vadd.f32 %v3007_v55, %v1724_v19  ;;  %v3010_v48 = vadd.f32 %v3009_v25, %v3008_v53  ;;  %v3428_v55 = vpop.eup %3427  ;;  %v1210_v53 = vmul.f32 1.442695, %v1175_v63  ;;  %3441 = vrcp.f32 %v1630_v27  ;;  %v1697_v63 = vld [vmem:[#allocation4 + $0x68] sm:$0xff] }
 0x2d2   : > { %v2238_v22 = vld [vmem:[#allocation4 + $0x30] sm:$0xff]  ;;  %v1236_v56 = vmul.f32 1.442695, %v1188_v51  ;;  %3443 = vrcp.f32 %v1631_v17 }
 0x2d3   : > { %2109 = vst.msk [vmem:[#allocation4 + $0x40] sm:$0xff] %vm465_vm0, %v2077_v46  ;;  %v2078_v24 = vadd.f32 %v3010_v48, %v1725_v7  ;;  %v4362_v62 = vmul.f32 %v3420_v20, %v2238_v22  ;;  %v3430_v46 = vpop.eup %3429  ;;  %v1727_v48 = vmul.f32 %v3418_v58, %v1695_v52  ;;  %v1562_v22 = vpop.xlane.xlu0 %1561  ;;  %3445 = vpow2.f32 %v1210_v53  ;;  %v1685_v53 = vld [vmem:[#allocation4 + $0x8] sm:$0xff] }
 0x2d4   : > { %v2239_v49 = vld [vmem:[#allocation4 + $0x38] sm:$0xff]  ;;  %v3432_v50 = vpop.eup %3431  ;;  %v1492_v58 = vmul.f32 0.0, %v3428_v55  ;;  %v1632_v40 = vadd.f32 %v1562_v22, %v1504_v59  ;;  %3447 = vpow2.f32 %v1236_v56  ;;  %v1728_v52 = vmul.f32 %v3424_v9, %v1696_v18 }
 0x2d5   : > { %2110 = vst.msk [vmem:[#allocation4 + $0x48] sm:$0xff] %vm465_vm0, %v2078_v24  ;;  %v4364_v31 = vmul.f32 %v3422_v42, %v2239_v49  ;;  %v3011_v36 = vpop.f32.mrb[12].mxu1  ;;  %v3434_v43 = vpop.eup %3433  ;;  %v1238_v49 = vmul.f32 1.442695, %v1189_v14 }
 0x2d6   : > { %v3012_v19 = vpop.f32.mrb[13].mxu1  ;;  %v1565_v24 = vpop.xlane.xlu1 %1564  ;;  %v1493_v27 = vmul.f32 0.0, %v3434_v43  ;;  %v1717_v59 = vmul.f32 %v3434_v43, %v1685_v53 }
 0x2d7   : > { %v2299_v0 = vpack.c.bf16 %v4364_v31, %v4362_v62  ;;  %v3013_v4 = vadd.f32 %v3012_v19, %v3011_v36  ;;  %v3014_v16 = vpop.f32.mrb[14].mxu1  ;;  %v1633_v36 = vadd.f32 %v1565_v24, %v1505_v3  ;;  %v3436_v17 = vpop.eup %3435  ;;  %v1620_v19 = vadd.f32 %v4331_v5, %v1492_v58 }
 0x2d8   : > { %v3015_v29 = vpop.f32.mrb[15].mxu1  ;;  %3449 = vpow2.f32 %v1238_v49  ;;  %v1621_v14 = vadd.f32 %v4333_v39, %v1493_v27  ;;  %v3438_v47 = vpop.eup %3437  ;;  %v1191_v5 = vsub.f32 -inf, %v4201_v28  ;;  %v1506_v9 = vmul.f32 0.0, %v3436_v17 }
 0x2d9   : > { %v2079_v7 = vadd.f32 %v3013_v4, %v1726_v6  ;;  %v3016_v10 = vadd.f32 %v3015_v29, %v3014_v16  ;;  %v1716_v29 = vmul.f32 %v3428_v55, %v1684_v61  ;;  %3451 = vrcp.f32 %v1632_v40 }
 0x2da   : > { %v2240_v25 = vld [vmem:[#allocation4 + $0x40] sm:$0xff]  ;;  %v4382_v22 = vpop.eup %3439  ;;  %3453 = vrcp.f32 %v1633_v36  ;;  %v1240_v58 = vmul.f32 1.442695, %v1190_v32  ;;  %v1507_v40 = vmul.f32 0.0, %v3438_v47  ;;  %v1200_v62 = vsub.f32 -inf, %v4286_v45 }
 0x2db   : > { %2111 = vst.msk [vmem:[#allocation4 + $0x50] sm:$0xff] %vm465_vm0, %v2079_v7  ;;  %v2080_v42 = vadd.f32 %v3016_v10, %v1727_v48  ;;  %v4372_v37 = vmul.f32 %v3430_v46, %v2240_v25  ;;  %v1729_v46 = vmul.f32 %v3426_v2, %v1697_v63  ;;  %v3442_v55 = vpop.eup %3441  ;;  %3455 = vrcp.f32 %v1620_v19  ;;  %v1571_v2 = vpop.xlane.xlu1 %1570 }
 0x2dc   : > { %v2241_v20 = vld [vmem:[#allocation4 + $0x48] sm:$0xff]  ;;  %v3444_v18 = vpop.eup %3443  ;;  %3457 = vrcp.f32 %v1621_v14  ;;  %v1635_v19 = vadd.f32 %v1571_v2, %v1507_v40 }
 0x2dd   : > { %v4374_v34 = vmul.f32 %v3432_v50, %v2241_v20  ;;  %2112 = vst.msk [vmem:[#allocation4 + $0x58] sm:$0xff] %vm465_vm0, %v2080_v42  ;;  %v3017_v33 = vpop.f32.mrb[16].mxu1  ;;  %v1568_v20 = vpop.xlane.xlu0 %1567  ;;  %3459 = vpow2.f32 %v1240_v58 }
 0x2de   : > { %v3018_v51 = vpop.f32.mrb[17].mxu1  ;;  %v1634_v61 = vadd.f32 %v1568_v20, %v1506_v9  ;;  %v3446_v32 = vpop.eup %3445  ;;  %v1686_v9 = vld [vmem:[#allocation4 + $0x10] sm:$0xff] }
 0x2df   : > { %v2300_v35 = vpack.c.bf16 %v4374_v34, %v4372_v37  ;;  %v3019_v6 = vadd.f32 %v3018_v51, %v3017_v33  ;;  %v3020_v16 = vpop.f32.mrb[18].mxu1  ;;  %v1698_v33 = vld [vmem:[#allocation4 + $0x70] sm:$0xff]  ;;  %v1242_v51 = vmul.f32 1.442695, %v1191_v5  ;;  %v1495_v5 = vmul.f32 0.0, %v3446_v32 }
 0x2e0   : > { %v2981_v4 = vpop.f32.mrb[64].mxu0  ;;  %v3021_v7 = vpop.f32.mrb[19].mxu1  ;;  %3461 = vrcp.f32 %v1634_v61  ;;  %v1718_v40 = vmul.f32 %v4382_v22, %v1686_v9  ;;  %v1195_v9 = vsub.f32 -inf, %v4232_v57  ;;  %v1201_v37 = vsub.f32 -inf, %v4294_v1 }
 0x2e1   : > { %v2982_v25 = vpop.f32.mrb[65].mxu0  ;;  %v2081_v48 = vadd.f32 %v3019_v6, %v1728_v52  ;;  %v3022_v50 = vadd.f32 %v3021_v7, %v3020_v16  ;;  %v1699_v6 = vld [vmem:[#allocation4 + $0x78] sm:$0xff]  ;;  %v1730_v16 = vmul.f32 %v3436_v17, %v1698_v33  ;;  %3463 = vrcp.f32 %v1635_v19  ;;  %v1574_v58 = vpop.xlane.xlu0 %1573 }
 0x2e2   : > { %v2983_v10 = vadd.f32 %v2982_v25, %v2981_v4  ;;  %v2984_v56 = vpop.f32.mrb[66].mxu0  ;;  %v2242_v39 = vld [vmem:[#allocation4 + $0x50] sm:$0xff]  ;;  %v1192_v4 = vsub.f32 -inf, %v4211_v60  ;;  %v1193_v25 = vsub.f32 -inf, %v4215_v41  ;;  %3465 = vpow2.f32 %v1242_v51 }
 0x2e3   : > { %v2985_v24 = vpop.f32.mrb[67].mxu0  ;;  %2113 = vst.msk [vmem:[#allocation4 + $0x60] sm:$0xff] %vm465_vm0, %v2081_v48  ;;  %v2082_v49 = vadd.f32 %v3022_v50, %v1729_v46  ;;  %v4388_v27 = vmul.f32 %v3442_v55, %v2242_v39  ;;  %v1494_v46 = vmul.f32 0.0, %v4382_v22  ;;  %v4398_v48 = vpop.eup %3447  ;;  %v1731_v50 = vmul.f32 %v3438_v47, %v1699_v6  ;;  %v1687_v55 = vld [vmem:[#allocation4 + $0x18] sm:$0xff] }
 0x2e4   : > { %v2069_v42 = vadd.f32 %v2983_v10, %v1716_v29  ;;  %v2986_v3 = vadd.f32 %v2985_v24, %v2984_v56  ;;  %v2243_v28 = vld [vmem:[#allocation4 + $0x58] sm:$0xff]  ;;  %v4400_v56 = vpop.eup %3449  ;;  %v1244_v41 = vmul.f32 1.442695, %v1192_v4  ;;  %v1623_v47 = vadd.f32 %v4337_v54, %v1495_v5  ;;  %v1577_v4 = vpop.xlane.xlu1 %1576 }
 0x2e5   : > { %2114 = vst.msk [vmem:[#allocation4 + $0x68] sm:$0xff] %vm465_vm0, %v2082_v49  ;;  %v3023_v63 = vpop.f32.mrb[20].mxu1  ;;  %v4390_v36 = vmul.f32 %v3444_v18, %v2243_v28  ;;  %v1622_v17 = vadd.f32 %v4335_v44, %v1494_v46  ;;  %v1508_v51 = vmul.f32 0.0, %v4398_v48  ;;  %v1719_v54 = vmul.f32 %v3446_v32, %v1687_v55 }
 0x2e6   : > { %2101 = vst.msk [vmem:[#allocation4] sm:$0xff] %vm465_vm0, %v2069_v42  ;;  %v2070_v43 = vadd.f32 %v2986_v3, %v1717_v59  ;;  %v3024_v52 = vpop.f32.mrb[21].mxu1  ;;  %v3452_v59 = vpop.eup %3451  ;;  %v1246_v42 = vmul.f32 1.442695, %v1193_v25  ;;  %v1194_v25 = vsub.f32 -inf, %v4225_v13 }
 0x2e7   : > { %v3025_v53 = vadd.f32 %v3024_v52, %v3023_v63  ;;  %v3026_v14 = vpop.f32.mrb[22].mxu1  ;;  %v2301_v29 = vpack.c.bf16 %v4390_v36, %v4388_v27  ;;  %v3454_v2 = vpop.eup %3453  ;;  %3467 = vrcp.f32 %v1622_v17  ;;  %v1636_v46 = vadd.f32 %v1574_v58, %v1508_v51 }
 0x2e8   : > { %2102 = vst.msk [vmem:[#allocation4 + $0x8] sm:$0xff] %vm465_vm0, %v2070_v43  ;;  %v3027_v7 = vpop.f32.mrb[23].mxu1  ;;  %v3456_v44 = vpop.eup %3455  ;;  %3469 = vrcp.f32 %v1623_v47  ;;  %v1202_v27 = vsub.f32 -inf, %v4305_v38 }
 0x2e9   : > { %v2083_v10 = vadd.f32 %v3025_v53, %v1730_v16  ;;  %v3028_v60 = vadd.f32 %v3027_v7, %v3026_v14  ;;  %v3458_v63 = vpop.eup %3457  ;;  %v1509_v7 = vmul.f32 0.0, %v4400_v56  ;;  %3471 = vpow2.f32 %v1244_v41 }
 0x2ea   : > { %v2244_v20 = vld [vmem:[#allocation4 + $0x60] sm:$0xff]  ;;  %v2987_v24 = vpop.f32.mrb[68].mxu0  ;;  %v3460_v5 = vpop.eup %3459  ;;  %3473 = vpow2.f32 %v1246_v42  ;;  %v1264_v38 = vmul.f32 1.442695, %v1202_v27 }
 0x2eb   : > { %2115 = vst.msk [vmem:[#allocation4 + $0x70] sm:$0xff] %vm465_vm0, %v2083_v10  ;;  %v2084_v39 = vadd.f32 %v3028_v60, %v1731_v50  ;;  %v2988_v49 = vpop.f32.mrb[69].mxu0  ;;  %v4407_v61 = vmul.f32 %v3452_v59, %v2244_v20  ;;  %v1700_v10 = vld [vmem:[#allocation4 + $0x80] sm:$0xff]  ;;  %v1701_v60 = vld [vmem:[#allocation4 + $0x88] sm:$0xff]  ;;  %v1637_v20 = vadd.f32 %v1577_v4, %v1509_v7  ;;  %3475 = vrcp.f32 %v1636_v46 }
 0x2ec   : > { %v2245_v18 = vld [vmem:[#allocation4 + $0x68] sm:$0xff]  ;;  %v2989_v33 = vadd.f32 %v2988_v49, %v2987_v24  ;;  %v2990_v28 = vpop.f32.mrb[70].mxu0  ;;  %v1732_v13 = vmul.f32 %v4398_v48, %v1700_v10  ;;  %v1248_v49 = vmul.f32 1.442695, %v1194_v25  ;;  %v1733_v41 = vmul.f32 %v4400_v56, %v1701_v60  ;;  %v1580_v48 = vpop.xlane.xlu0 %1579 }
 0x2ed   : > { %v2232_v3 = vld [vmem:[#allocation4] sm:$0xff]  ;;  %2116 = vst.msk [vmem:[#allocation4 + $0x78] sm:$0xff] %vm465_vm0, %v2084_v39  ;;  %v4409_v43 = vmul.f32 %v3454_v2, %v2245_v18  ;;  %v2991_v19 = vpop.f32.mrb[71].mxu0  ;;  %v3462_v39 = vpop.eup %3461  ;;  %3477 = vrcp.f32 %v1637_v20  ;;  %v1196_v25 = vsub.f32 -inf, %v4244_v21  ;;  %v1197_v46 = vsub.f32 -inf, %v4254_v30 }
 0x2ee   : > { %v2264_v6 = vmul.f32 %v3456_v44, %v2232_v3  ;;  %v2071_v16 = vadd.f32 %v2989_v33, %v1718_v40  ;;  %v2992_v53 = vadd.f32 %v2991_v19, %v2990_v28  ;;  %v3464_v47 = vpop.eup %3463  ;;  %v1250_v33 = vmul.f32 1.442695, %v1195_v9 }
 0x2ef   : > { %v2233_v52 = vld [vmem:[#allocation4 + $0x8] sm:$0xff]  ;;  %v2302_v14 = vpack.c.bf16 %v4409_v43, %v4407_v61  ;;  %v3466_v18 = vpop.eup %3465  ;;  %v1510_v28 = vmul.f32 0.0, %v3460_v5  ;;  %3479 = vpow2.f32 %v1248_v49  ;;  %v1252_v21 = vmul.f32 1.442695, %v1196_v25 }
 0x2f0   : > { %v2265_v22 = vmul.f32 %v3458_v63, %v2233_v52  ;;  %2103 = vst.msk [vmem:[#allocation4 + $0x10] sm:$0xff] %vm465_vm0, %v2071_v16  ;;  %v2072_v32 = vadd.f32 %v2992_v53, %v1719_v54  ;;  %v1583_v63 = vpop.xlane.xlu1 %1582  ;;  %v1511_v19 = vmul.f32 0.0, %v3466_v18  ;;  %v1702_v52 = vld [vmem:[#allocation4 + $0x90] sm:$0xff]  ;;  %v1703_v53 = vld [vmem:[#allocation4 + $0x98] sm:$0xff]  ;;  %3481 = vpow2.f32 %v1250_v33  ;;  %v1586_v30 = vpop.xlane.xlu0 %1585 }
 0x2f1   : > { %v3029_v50 = vpop.f32.mrb[24].mxu1  ;;  %v3468_v54 = vpop.eup %3467  ;;  %v1638_v4 = vadd.f32 %v1580_v48, %v1510_v28  ;;  %v1704_v48 = vld [vmem:[#allocation4 + $0xa0] sm:$0xff]  ;;  %v1203_v61 = vsub.f32 -inf, %v4313_v8 }
 0x2f2   : > { %v2296_v17 = vpack.c.bf16 %v2265_v22, %v2264_v6  ;;  %v3030_v59 = vpop.f32.mrb[25].mxu1  ;;  %v2246_v24 = vld [vmem:[#allocation4 + $0x70] sm:$0xff]  ;;  %2104 = vst.msk [vmem:[#allocation4 + $0x18] sm:$0xff] %vm465_vm0, %v2072_v32  ;;  %v3470_v22 = vpop.eup %3469  ;;  %v1639_v7 = vadd.f32 %v1583_v63, %v1511_v19 }
 0x2f3   : > { %v3031_v55 = vadd.f32 %v3030_v59, %v3029_v50  ;;  %v3032_v2 = vpop.f32.mrb[26].mxu1  ;;  %v4422_v40 = vmul.f32 %v3462_v39, %v2246_v24  ;;  %v1734_v50 = vmul.f32 %v3460_v5, %v1702_v52  ;;  %v3472_v59 = vpop.eup %3471  ;;  %v1735_v24 = vmul.f32 %v3466_v18, %v1703_v53 }
 0x2f4   : > { %3105 = vmatprep.mubr.msk.bf16.mxu1 %vm465_vm0, %v2296_v17  ;;  %v3033_v3 = vpop.f32.mrb[27].mxu1  ;;  %v2247_v57 = vld [vmem:[#allocation4 + $0x78] sm:$0xff]  ;;  %3483 = vrcp.f32 %v1638_v4  ;;  %v1589_v5 = vpop.xlane.xlu1 %1588  ;;  %v1199_v52 = vsub.f32 -inf, %v4274_v26  ;;  %v1705_v4 = vld [vmem:[#allocation4 + $0xa8] sm:$0xff]  ;;  %v1736_v11 = vmul.f32 %v3472_v59, %v1704_v48  ;;  %v1260_v48 = vmul.f32 1.442695, %v1200_v62 }
 0x2f5   : > { %v2085_v44 = vadd.f32 %v3031_v55, %v1732_v13  ;;  %v3034_v58 = vadd.f32 %v3033_v3, %v3032_v2  ;;  %v4424_v42 = vmul.f32 %v3464_v47, %v2247_v57  ;;  %v3474_v13 = vpop.eup %3473  ;;  %3485 = vrcp.f32 %v1639_v7  ;;  %v1592_v26 = vpop.xlane.xlu0 %1591  ;;  %v1710_v62 = vld [vmem:[#allocation4 + $0xd0] sm:$0xff] }
 0x2f6   : > { %v3476_v49 = vpop.eup %3475  ;;  %v1254_v3 = vmul.f32 1.442695, %v1197_v46  ;;  %v1512_v57 = vmul.f32 0.0, %v3472_v59  ;;  %v1513_v33 = vmul.f32 0.0, %v3474_v13  ;;  %3487 = vpow2.f32 %v1252_v21 }
 0x2f7   : > { %2117 = vst.msk [vmem:[#allocation4 + $0x80] sm:$0xff] %vm465_vm0, %v2085_v44  ;;  %v2086_v51 = vadd.f32 %v3034_v58, %v1733_v41  ;;  %v2303_v56 = vpack.c.bf16 %v4424_v42, %v4422_v40  ;;  %v2234_v6 = vld [vmem:[#allocation4 + $0x10] sm:$0xff]  ;;  %v3478_v18 = vpop.eup %3477  ;;  %v1198_v58 = vsub.f32 -inf, %v4266_v12  ;;  %v1711_v42 = vld [vmem:[#allocation4 + $0xd8] sm:$0xff] }
 0x2f8   : > { %v2266_v9 = vmul.f32 %v3468_v54, %v2234_v6  ;;  %v1640_v63 = vadd.f32 %v1586_v30, %v1512_v57  ;;  %v1641_v12 = vadd.f32 %v1589_v5, %v1513_v33  ;;  %3489 = vpow2.f32 %v1254_v3  ;;  %v1707_v30 = vld [vmem:[#allocation4 + $0xb8] sm:$0xff] }
 0x2f9   : > { %2118 = vst.msk [vmem:[#allocation4 + $0x88] sm:$0xff] %vm465_vm0, %v2086_v51  ;;  %v3035_v16 = vpop.f32.mrb[28].mxu1  ;;  %v2235_v32 = vld [vmem:[#allocation4 + $0x18] sm:$0xff]  ;;  %v1256_v25 = vmul.f32 1.442695, %v1198_v58  ;;  %v1598_v45 = vpop.xlane.xlu0 %1597 }
 0x2fa   : > { %v3036_v10 = vpop.f32.mrb[29].mxu1  ;;  %v2267_v20 = vmul.f32 %v3470_v22, %v2235_v32  ;;  %3491 = vrcp.f32 %v1640_v63 }
 0x2fb   : > { %v3037_v60 = vadd.f32 %v3036_v10, %v3035_v16  ;;  %v3038_v17 = vpop.f32.mrb[30].mxu1  ;;  %v3480_v16 = vpop.eup %3479  ;;  %v1737_v10 = vmul.f32 %v3474_v13, %v1705_v4  ;;  %3493 = vrcp.f32 %v1641_v12  ;;  %v1706_v13 = vld [vmem:[#allocation4 + $0xb0] sm:$0xff] }
 0x2fc   : > { %v3039_v39 = vpop.f32.mrb[31].mxu1  ;;  %v2297_v47 = vpack.c.bf16 %v2267_v20, %v2266_v9  ;;  %v3482_v22 = vpop.eup %3481  ;;  %v1514_v9 = vmul.f32 0.0, %v3480_v16  ;;  %3495 = vpow2.f32 %v1256_v25  ;;  %v1738_v34 = vmul.f32 %v3480_v16, %v1706_v13 }
 0x2fd   : > { %v2087_v55 = vadd.f32 %v3037_v60, %v1734_v50  ;;  %v3040_v2 = vadd.f32 %v3039_v39, %v3038_v17  ;;  %v1258_v50 = vmul.f32 1.442695, %v1199_v52  ;;  %v1595_v20 = vpop.xlane.xlu1 %1594  ;;  %v1515_v39 = vmul.f32 0.0, %v3482_v22 }
 0x2fe   : > { %v2248_v41 = vld [vmem:[#allocation4 + $0x80] sm:$0xff]  ;;  %3106 = vmatmul.mubr.msk.bf16.vlgmr.msra.gmra.mrb[56].mxu1 %vm465_vm0, %v2297_v47  ;;  %v3484_v17 = vpop.eup %3483  ;;  %v1739_v58 = vmul.f32 %v3482_v22, %v1707_v30 }
 0x2ff   : > { %2119 = vst.msk [vmem:[#allocation4 + $0x90] sm:$0xff] %vm465_vm0, %v2087_v55  ;;  %v2088_v44 = vadd.f32 %v3040_v2, %v1735_v24  ;;  %3109 = vmatprep.mubr.msk.bf16.mxu1 %vm465_vm0, %v2298_v23  ;;  %v4440_v54 = vmul.f32 %v3476_v49, %v2248_v41  ;;  %v3486_v24 = vpop.eup %3485  ;;  %v1642_v2 = vadd.f32 %v1592_v26, %v1514_v9  ;;  %3497 = vpow2.f32 %v1258_v50 }
 0x300   : > { %v2249_v28 = vld [vmem:[#allocation4 + $0x88] sm:$0xff]  ;;  %v1643_v31 = vadd.f32 %v1595_v20, %v1515_v39  ;;  %v3488_v57 = vpop.eup %3487  ;;  %v1604_v20 = vpop.xlane.xlu0 %1603  ;;  %v1266_v39 = vmul.f32 1.442695, %v1203_v61 }
 0x301   : > { %2120 = vst.msk [vmem:[#allocation4 + $0x98] sm:$0xff] %vm465_vm0, %v2088_v44  ;;  %v3041_v51 = vpop.f32.mrb[32].mxu1  ;;  %v4442_v19 = vmul.f32 %v3478_v18, %v2249_v28  ;;  %3499 = vrcp.f32 %v1642_v2  ;;  %v1516_v1 = vmul.f32 0.0, %v3488_v57  ;;  %v1601_v52 = vpop.xlane.xlu1 %1600 }
 0x302   : > { %v3042_v6 = vpop.f32.mrb[33].mxu1  ;;  %v3490_v44 = vpop.eup %3489  ;;  %3501 = vrcp.f32 %v1643_v31 }
 0x303   : > { %v3043_v15 = vadd.f32 %v3042_v6, %v3041_v51  ;;  %v3044_v23 = vpop.f32.mrb[34].mxu1  ;;  %v2304_v53 = vpack.c.bf16 %v4442_v19, %v4440_v54  ;;  %v1262_v51 = vmul.f32 1.442695, %v1201_v37  ;;  %v1708_v6 = vld [vmem:[#allocation4 + $0xc0] sm:$0xff]  ;;  %v1517_v16 = vmul.f32 0.0, %v3490_v44 }
 0x304   : > { %v3045_v46 = vpop.f32.mrb[35].mxu1  ;;  %v3492_v63 = vpop.eup %3491  ;;  %3503 = vpow2.f32 %v1260_v48 }
 0x305   : > { %v2089_v7 = vadd.f32 %v3043_v15, %v1736_v11  ;;  %v3046_v32 = vadd.f32 %v3045_v46, %v3044_v23  ;;  %v3494_v4 = vpop.eup %3493  ;;  %v1644_v15 = vadd.f32 %v1598_v45, %v1516_v1  ;;  %v1645_v36 = vadd.f32 %v1601_v52, %v1517_v16 }
 0x306   : > { %v2250_v60 = vld [vmem:[#allocation4 + $0x90] sm:$0xff]  ;;  %3110 = vmatmul.mubr.msk.bf16.gmra.mrb[60].mxu1 %vm465_vm0, %v2299_v0  ;;  %3505 = vpow2.f32 %v1262_v51 }
 0x307   : > { %2121 = vst.msk [vmem:[#allocation4 + $0xa0] sm:$0xff] %vm465_vm0, %v2089_v7  ;;  %v2090_v59 = vadd.f32 %v3046_v32, %v1737_v10  ;;  %3113 = vmatprep.mubr.msk.bf16.mxu1 %vm465_vm0, %v2300_v35  ;;  %v4457_v49 = vmul.f32 %v3484_v17, %v2250_v60  ;;  %v1709_v7 = vld [vmem:[#allocation4 + $0xc8] sm:$0xff]  ;;  %v3496_v10 = vpop.eup %3495  ;;  %3507 = vrcp.f32 %v1644_v15 }
 0x308   : > { %v2251_v55 = vld [vmem:[#allocation4 + $0x98] sm:$0xff]  ;;  %v1741_v17 = vmul.f32 %v3490_v44, %v1709_v7  ;;  %3509 = vrcp.f32 %v1645_v36  ;;  %v1518_v13 = vmul.f32 0.0, %v3496_v10 }
 0x309   : > { %2122 = vst.msk [vmem:[#allocation4 + $0xa8] sm:$0xff] %vm465_vm0, %v2090_v59  ;;  %v3047_v47 = vpop.f32.mrb[36].mxu1  ;;  %v4459_v21 = vmul.f32 %v3486_v24, %v2251_v55  ;;  %v3498_v50 = vpop.eup %3497  ;;  %3511 = vpow2.f32 %v1264_v38  ;;  %v1714_v38 = vld [vmem:[#allocation4 + $0xf0] sm:$0xff] }
 0x30a   : > { %v3048_v0 = vpop.f32.mrb[37].mxu1  ;;  %v1607_v55 = vpop.xlane.xlu1 %1606  ;;  %3513 = vpow2.f32 %v1266_v39 }
 0x30b   : > { %v3049_v35 = vadd.f32 %v3048_v0, %v3047_v47  ;;  %v3050_v41 = vpop.f32.mrb[38].mxu1  ;;  %v2305_v3 = vpack.c.bf16 %v4459_v21, %v4457_v49  ;;  %v3500_v24 = vpop.eup %3499  ;;  %v1519_v47 = vmul.f32 0.0, %v3498_v50  ;;  %v1646_v0 = vadd.f32 %v1604_v20, %v1518_v13 }
 0x30c   : > { %v3051_v5 = vpop.f32.mrb[39].mxu1  ;;  %v3502_v2 = vpop.eup %3501 }
 0x30d   : > { %v2091_v18 = vadd.f32 %v3049_v35, %v1738_v34  ;;  %v3052_v33 = vadd.f32 %v3051_v5, %v3050_v41  ;;  %v1647_v35 = vadd.f32 %v1607_v55, %v1519_v47  ;;  %3515 = vrcp.f32 %v1646_v0 }
 0x30e   : > { %v2252_v28 = vld [vmem:[#allocation4 + $0xa0] sm:$0xff]  ;;  %3114 = vmatmul.mubr.msk.bf16.gmra.mrb[64].mxu1 %vm465_vm0, %v2301_v29  ;;  %v1740_v29 = vmul.f32 %v3488_v57, %v1708_v6  ;;  %v3504_v54 = vpop.eup %3503 }
 0x30f   : > { %2123 = vst.msk [vmem:[#allocation4 + $0xb0] sm:$0xff] %vm465_vm0, %v2091_v18  ;;  %v2092_v12 = vadd.f32 %v3052_v33, %v1739_v58  ;;  %3117 = vmatprep.mubr.msk.bf16.mxu1 %vm465_vm0, %v2302_v14  ;;  %v4475_v22 = vmul.f32 %v3492_v63, %v2252_v28  ;;  %v1743_v18 = vmul.f32 %v3498_v50, %v1711_v42  ;;  %3517 = vrcp.f32 %v1647_v35  ;;  %v1610_v33 = vpop.xlane.xlu0 %1609  ;;  %v1613_v63 = vpop.xlane.xlu1 %1612 }
 0x310   : > { %v2253_v11 = vld [vmem:[#allocation4 + $0xa8] sm:$0xff]  ;;  %v1520_v28 = vmul.f32 0.0, %v3504_v54 }
 0x311   : > { %2124 = vst.msk [vmem:[#allocation4 + $0xb8] sm:$0xff] %vm465_vm0, %v2092_v12  ;;  %v3053_v23 = vpop.f32.mrb[40].mxu1  ;;  %v4477_v25 = vmul.f32 %v3494_v4, %v2253_v11  ;;  %v1712_v12 = vld [vmem:[#allocation4 + $0xe0] sm:$0xff] }
 0x312   : > { %v3054_v46 = vpop.f32.mrb[41].mxu1  ;;  %v1648_v4 = vadd.f32 %v1610_v33, %v1520_v28  ;;  %v1744_v27 = vmul.f32 %v3504_v54, %v1712_v12  ;;  %v4519_v28 = vld [vmem:[%s4715_s5] ss:$0 sm:$0xff] }
 0x313   : > { %v3055_v43 = vadd.f32 %v3054_v46, %v3053_v23  ;;  %v3056_v14 = vpop.f32.mrb[42].mxu1  ;;  %v2306_v32 = vpack.c.bf16 %v4477_v25, %v4475_v22  ;;  %v1713_v25 = vld [vmem:[#allocation4 + $0xe8] sm:$0xff]  ;;  %v2560_v12 = vld [vmem:[%s4514_s27] sm:$0xff] }
 0x314   : > { %v3057_v26 = vpop.f32.mrb[43].mxu1  ;;  %3519 = vrcp.f32 %v1648_v4 }
 0x315   : > { %v2093_v60 = vadd.f32 %v3055_v43, %v1740_v29  ;;  %v3058_v9 = vadd.f32 %v3057_v26, %v3056_v14  ;;  %v1616_v43 = vpop.xlane.xlu0 %1615  ;;  %v1619_v26 = vpop.xlane.xlu1 %1618 }
 0x316   : > { %v2254_v59 = vld [vmem:[#allocation4 + $0xb0] sm:$0xff]  ;;  %3118 = vmatmul.mubr.msk.bf16.gmra.mrb[68].mxu1 %vm465_vm0, %v2303_v56  ;;  %v1742_v56 = vmul.f32 %v3496_v10, %v1710_v62 }
 0x317   : > { %2125 = vst.msk [vmem:[#allocation4 + $0xc0] sm:$0xff] %vm465_vm0, %v2093_v60  ;;  %v2094_v8 = vadd.f32 %v3058_v9, %v1741_v17  ;;  %3121 = vmatprep.mubr.msk.bf16.mxu1 %vm465_vm0, %v2304_v53  ;;  %v2286_v37 = vmul.f32 %v3500_v24, %v2254_v59  ;;  %v3506_v53 = vpop.eup %3505 }
 0x318   : > { %v2255_v31 = vld [vmem:[#allocation4 + $0xb8] sm:$0xff]  ;;  %v3508_v45 = vpop.eup %3507  ;;  %v1521_v52 = vmul.f32 0.0, %v3506_v53  ;;  %v1745_v10 = vmul.f32 %v3506_v53, %v1713_v25 }
 0x319   : > { %2126 = vst.msk [vmem:[#allocation4 + $0xc8] sm:$0xff] %vm465_vm0, %v2094_v8  ;;  %v3059_v30 = vpop.f32.mrb[44].mxu1  ;;  %v2287_v34 = vmul.f32 %v3502_v2, %v2255_v31  ;;  %v3510_v1 = vpop.eup %3509  ;;  %v1715_v2 = vld [vmem:[#allocation4 + $0xf8] sm:$0xff] }
 0x31a   : > { %v3060_v40 = vpop.f32.mrb[45].mxu1  ;;  %v1649_v23 = vadd.f32 %v1613_v63, %v1521_v52 }
 0x31b   : > { %v3061_v41 = vadd.f32 %v3060_v40, %v3059_v30  ;;  %v3062_v57 = vpop.f32.mrb[46].mxu1  ;;  %v2307_v5 = vpack.c.bf16 %v2287_v34, %v2286_v37 }
 0x31c   : > { %v3063_v19 = vpop.f32.mrb[47].mxu1  ;;  %3521 = vrcp.f32 %v1649_v23 }
 0x31d   : > { %v2095_v44 = vadd.f32 %v3061_v41, %v1742_v56  ;;  %v3064_v58 = vadd.f32 %v3063_v19, %v3062_v57 }
 0x31e   : > { %v2256_v48 = vld [vmem:[#allocation4 + $0xc0] sm:$0xff]  ;;  %3122 = vmatmul.mubr.msk.bf16.gmra.mrb[72].mxu1 %vm465_vm0, %v2305_v3  ;;  %v3512_v3 = vpop.eup %3511 }
 0x31f   : > { %2127 = vst.msk [vmem:[#allocation4 + $0xd0] sm:$0xff] %vm465_vm0, %v2095_v44  ;;  %v2096_v51 = vadd.f32 %v3064_v58, %v1743_v18  ;;  %3125 = vmatprep.mubr.msk.bf16.mxu1 %vm465_vm0, %v2306_v32  ;;  %v2288_v11 = vmul.f32 %v3508_v45, %v2256_v48  ;;  %v3514_v46 = vpop.eup %3513  ;;  %v1522_v50 = vmul.f32 0.0, %v3512_v3  ;;  %v1746_v47 = vmul.f32 %v3512_v3, %v1714_v38  ;;  %v2566_v3 = vld [vmem:[%s4514_s27 + $0x30] sm:$0xff] }
 0x320   : > { %v2257_v6 = vld [vmem:[#allocation4 + $0xc8] sm:$0xff]  ;;  %v3516_v32 = vpop.eup %3515  ;;  %v1523_v9 = vmul.f32 0.0, %v3514_v46  ;;  %v1747_v34 = vmul.f32 %v3514_v46, %v1715_v2  ;;  %v2571_v2 = vld [vmem:[%s4514_s27 + $0x58] sm:$0xff] }
 0x321   : > { %2128 = vst.msk [vmem:[#allocation4 + $0xd8] sm:$0xff] %vm465_vm0, %v2096_v51  ;;  %v3065_v16 = vpop.f32.mrb[48].mxu1  ;;  %v2289_v15 = vmul.f32 %v3510_v1, %v2257_v6  ;;  %v3518_v17 = vpop.eup %3517  ;;  %v1650_v59 = vadd.f32 %v1616_v43, %v1522_v50  ;;  %v2562_v51 = vld [vmem:[%s4514_s27 + $0x10] sm:$0xff]  ;;  %v2567_v43 = vld [vmem:[%s4514_s27 + $0x38] sm:$0xff] }
 0x322   : > { %v3066_v22 = vpop.f32.mrb[49].mxu1  ;;  %v1651_v55 = vadd.f32 %v1619_v26, %v1523_v9  ;;  %v3520_v42 = vpop.eup %3519  ;;  %v2565_v26 = vld [vmem:[%s4514_s27 + $0x28] sm:$0xff] }
 0x323   : > { %v3067_v36 = vadd.f32 %v3066_v22, %v3065_v16  ;;  %v3068_v49 = vpop.f32.mrb[50].mxu1  ;;  %v2308_v21 = vpack.c.bf16 %v2289_v15, %v2288_v11  ;;  %3523 = vrcp.f32 %v1650_v59  ;;  %v2563_v16 = vld [vmem:[%s4514_s27 + $0x18] sm:$0xff]  ;;  %v2561_v22 = vld [vmem:[%s4514_s27 + $0x8] sm:$0xff]  ;;  %v2570_v59 = vld [vmem:[%s4514_s27 + $0x50] sm:$0xff] }
 0x324   : > { %v3069_v29 = vpop.f32.mrb[51].mxu1  ;;  %3525 = vrcp.f32 %v1651_v55 }
 0x325   : > { %v2097_v7 = vadd.f32 %v3067_v36, %v1744_v27  ;;  %v3070_v61 = vadd.f32 %v3069_v29, %v3068_v49 }
 0x326   : > { %v2258_v14 = vld [vmem:[#allocation4 + $0xd0] sm:$0xff]  ;;  %3126 = vmatmul.mubr.msk.bf16.gmra.mrb[76].mxu1 %vm465_vm0, %v2307_v5  ;;  %v3522_v41 = vpop.eup %3521 }
 0x327   : > { %2129 = vst.msk [vmem:[#allocation4 + $0xe0] sm:$0xff] %vm465_vm0, %v2097_v7  ;;  %v2098_v60 = vadd.f32 %v3070_v61, %v1745_v10  ;;  %3129 = vmatprep.mubr.msk.bf16.mxu1 %vm465_vm0, %v2308_v21  ;;  %v2290_v39 = vmul.f32 %v3516_v32, %v2258_v14  ;;  %v2564_v7 = vld [vmem:[%s4514_s27 + $0x20] sm:$0xff] }
 0x328   : > { %v2259_v20 = vld [vmem:[#allocation4 + $0xd8] sm:$0xff] }
 0x329   : > { %2130 = vst.msk [vmem:[#allocation4 + $0xe8] sm:$0xff] %vm465_vm0, %v2098_v60  ;;  %v3071_v24 = vpop.f32.mrb[52].mxu1  ;;  %v2291_v13 = vmul.f32 %v3518_v17, %v2259_v20 }
 0x32a   : > { %v3072_v8 = vpop.f32.mrb[53].mxu1 }
 0x32b   : > { %v3073_v62 = vadd.f32 %v3072_v8, %v3071_v24  ;;  %v3074_v31 = vpop.f32.mrb[54].mxu1  ;;  %v2309_v0 = vpack.c.bf16 %v2291_v13, %v2290_v39  ;;  %v2568_v13 = vld [vmem:[%s4514_s27 + $0x40] sm:$0xff] }
 0x32c   : > { %v3075_v30 = vpop.f32.mrb[55].mxu1 }
 0x32d   : > { %v2099_v37 = vadd.f32 %v3073_v62, %v1746_v47  ;;  %v3076_v35 = vadd.f32 %v3075_v30, %v3074_v31  ;;  %v3524_v44 = vpop.eup %3523 }
 0x32e   : > { %v2260_v40 = vld [vmem:[#allocation4 + $0xe0] sm:$0xff]  ;;  %3130 = vmatmul.mubr.msk.bf16.gmra.mrb[80].mxu1 %vm465_vm0, %v2309_v0  ;;  %v3526_v18 = vpop.eup %3525  ;;  %v2569_v0 = vld [vmem:[%s4514_s27 + $0x48] sm:$0xff] }
 0x32f   : > { %2131 = vst.msk [vmem:[#allocation4 + $0xf0] sm:$0xff] %vm465_vm0, %v2099_v37  ;;  %v2100_v56 = vadd.f32 %v3076_v35, %v1747_v34  ;;  %v2292_v5 = vmul.f32 %v3520_v42, %v2260_v40  ;;  %v2574_v42 = vld [vmem:[%s4514_s27 + $0x70] sm:$0xff] }
 0x330   : > { %v2261_v57 = vld [vmem:[#allocation4 + $0xe8] sm:$0xff] }
 0x331   : > { %2132 = vst.msk [vmem:[#allocation4 + $0xf8] sm:$0xff] %vm465_vm0, %v2100_v56  ;;  %v2293_v54 = vmul.f32 %v3522_v41, %v2261_v57  ;;  %v2572_v57 = vld [vmem:[%s4514_s27 + $0x60] sm:$0xff] }
 0x333   : > { %v2310_v19 = vpack.c.bf16 %v2293_v54, %v2292_v5 }
 0x335   : > { %3133 = vmatprep.mubr.msk.bf16.mxu1 %vm465_vm0, %v2310_v19  ;;  %v2575_v19 = vld [vmem:[%s4514_s27 + $0x78] sm:$0xff] }
 0x336   : > { %v2262_v53 = vld [vmem:[#allocation4 + $0xf0] sm:$0xff] }
 0x337   : > { %v2294_v33 = vmul.f32 %v3524_v44, %v2262_v53 }
 0x338   : > { %v2263_v58 = vld [vmem:[#allocation4 + $0xf8] sm:$0xff] }
 0x339   : > { %v2295_v48 = vmul.f32 %v3526_v18, %v2263_v58  ;;  %v2573_v58 = vld [vmem:[%s4514_s27 + $0x68] sm:$0xff] }
 0x33b   : > { %v2311_v45 = vpack.c.bf16 %v2295_v48, %v2294_v33 }
 0x33d   : > { %3134 = vmatmul.mubr.msk.bf16.gmra.mrb[84].mxu1 %vm465_vm0, %v2311_v45 }
 0x3d1   : > { %v3107_v63 = vpop.f32.mrb[56].mxu1 }
 0x3d2   : > { %v2442_v1 = vadd.f32 %v3107_v63, %v4519_v28  ;;  %v2433_v52 = vpop.f32.mrb[57].mxu1 }
 0x3d3   : > { %v2434_v6 = vadd.f32 %v4519_v28, %v2433_v52  ;;  %v3108_v4 = vpop.f32.mrb[58].mxu1 }
 0x3d4   : > { %v2594_v11 = vadd.f32 %v2562_v51, %v2442_v1  ;;  %v2445_v15 = vadd.f32 %v3108_v4, %v4519_v28  ;;  %v2436_v23 = vpop.f32.mrb[59].mxu1  ;;  %v2578_v1 = vld [vmem:[%s4514_s27 + $0x90] sm:$0xff] }
 0x3d5   : > { %v2592_v25 = vadd.f32 %v2560_v12, %v2434_v6  ;;  %v2437_v27 = vadd.f32 %v4519_v28, %v2436_v23  ;;  %v2576_v6 = vld [vmem:[%s4514_s27 + $0x80] sm:$0xff] }
 0x3d6   : > { %2626 = vst.msk [vmem:[%s4531_s11 + $0x10] sm:$0xff] %vm465_vm0, %v2594_v11  ;;  %v2595_v36 = vadd.f32 %v2563_v16, %v2445_v15  ;;  %v2579_v11 = vld [vmem:[%s4514_s27 + $0x98] sm:$0xff] }
 0x3d7   : > { %2624 = vst.msk [vmem:[%s4531_s11] sm:$0xff] %vm465_vm0, %v2592_v25  ;;  %v2593_v49 = vadd.f32 %v2561_v22, %v2437_v27  ;;  %v2577_v25 = vld [vmem:[%s4514_s27 + $0x88] sm:$0xff] }
 0x3d8   : > { %2627 = vst.msk [vmem:[%s4531_s11 + $0x18] sm:$0xff] %vm465_vm0, %v2595_v36 }
 0x3d9   : > { %2625 = vst.msk [vmem:[%s4531_s11 + $0x8] sm:$0xff] %vm465_vm0, %v2593_v49  ;;  %v3111_v21 = vpop.f32.mrb[60].mxu1 }
 0x3da   : > { %v2458_v29 = vadd.f32 %v3111_v21, %v4519_v28  ;;  %v2449_v46 = vpop.f32.mrb[61].mxu1 }
 0x3db   : > { %v2450_v10 = vadd.f32 %v4519_v28, %v2449_v46  ;;  %v3112_v61 = vpop.f32.mrb[62].mxu1 }
 0x3dc   : > { %v2598_v14 = vadd.f32 %v2566_v3, %v2458_v29  ;;  %v2461_v32 = vadd.f32 %v3112_v61, %v4519_v28  ;;  %v2452_v50 = vpop.f32.mrb[63].mxu1  ;;  %v2582_v29 = vld [vmem:[%s4514_s27 + $0xb0] sm:$0xff] }
 0x3dd   : > { %v2596_v60 = vadd.f32 %v2564_v7, %v2450_v10  ;;  %v2453_v17 = vadd.f32 %v4519_v28, %v2452_v50  ;;  %v2580_v10 = vld [vmem:[%s4514_s27 + $0xa0] sm:$0xff] }
 0x3de   : > { %2630 = vst.msk [vmem:[%s4531_s11 + $0x30] sm:$0xff] %vm465_vm0, %v2598_v14  ;;  %v2599_v9 = vadd.f32 %v2567_v43, %v2461_v32  ;;  %v2583_v14 = vld [vmem:[%s4514_s27 + $0xb8] sm:$0xff] }
 0x3df   : > { %2628 = vst.msk [vmem:[%s4531_s11 + $0x20] sm:$0xff] %vm465_vm0, %v2596_v60  ;;  %v2597_v38 = vadd.f32 %v2565_v26, %v2453_v17  ;;  %v2581_v60 = vld [vmem:[%s4514_s27 + $0xa8] sm:$0xff] }
 0x3e0   : > { %2631 = vst.msk [vmem:[%s4531_s11 + $0x38] sm:$0xff] %vm465_vm0, %v2599_v9 }
 0x3e1   : > { %2629 = vst.msk [vmem:[%s4531_s11 + $0x28] sm:$0xff] %vm465_vm0, %v2597_v38  ;;  %v3115_v20 = vpop.f32.mrb[64].mxu1 }
 0x3e2   : > { %v2474_v24 = vadd.f32 %v3115_v20, %v4519_v28  ;;  %v2465_v39 = vpop.f32.mrb[65].mxu1 }
 0x3e3   : > { %v2466_v55 = vadd.f32 %v4519_v28, %v2465_v39  ;;  %v3116_v8 = vpop.f32.mrb[66].mxu1 }
 0x3e4   : > { %v2602_v47 = vadd.f32 %v2570_v59, %v2474_v24  ;;  %v2477_v62 = vadd.f32 %v3116_v8, %v4519_v28  ;;  %v2468_v31 = vpop.f32.mrb[67].mxu1  ;;  %v2586_v24 = vld [vmem:[%s4514_s27 + $0xd0] sm:$0xff] }
 0x3e5   : > { %v2600_v30 = vadd.f32 %v2568_v13, %v2466_v55  ;;  %v2469_v37 = vadd.f32 %v4519_v28, %v2468_v31  ;;  %v2584_v55 = vld [vmem:[%s4514_s27 + $0xc0] sm:$0xff] }
 0x3e6   : > { %2634 = vst.msk [vmem:[%s4531_s11 + $0x50] sm:$0xff] %vm465_vm0, %v2602_v47  ;;  %v2603_v34 = vadd.f32 %v2571_v2, %v2477_v62  ;;  %v2587_v47 = vld [vmem:[%s4514_s27 + $0xd8] sm:$0xff] }
 0x3e7   : > { %2632 = vst.msk [vmem:[%s4531_s11 + $0x40] sm:$0xff] %vm465_vm0, %v2600_v30  ;;  %v2601_v35 = vadd.f32 %v2569_v0, %v2469_v37  ;;  %v2585_v30 = vld [vmem:[%s4514_s27 + $0xc8] sm:$0xff] }
 0x3e8   : > { %2635 = vst.msk [vmem:[%s4531_s11 + $0x58] sm:$0xff] %vm465_vm0, %v2603_v34 }
 0x3e9   : > { %2633 = vst.msk [vmem:[%s4531_s11 + $0x48] sm:$0xff] %vm465_vm0, %v2601_v35  ;;  %v3119_v40 = vpop.f32.mrb[68].mxu1 }
 0x3ea   : > { %v2490_v56 = vadd.f32 %v3119_v40, %v4519_v28  ;;  %v2481_v41 = vpop.f32.mrb[69].mxu1 }
 0x3eb   : > { %v2482_v5 = vadd.f32 %v4519_v28, %v2481_v41  ;;  %v3120_v54 = vpop.f32.mrb[70].mxu1 }
 0x3ec   : > { %v2606_v53 = vadd.f32 %v2574_v42, %v2490_v56  ;;  %v2493_v44 = vadd.f32 %v3120_v54, %v4519_v28  ;;  %v2484_v18 = vpop.f32.mrb[71].mxu1  ;;  %v2590_v56 = vld [vmem:[%s4514_s27 + $0xf0] sm:$0xff] }
 0x3ed   : > { %v2604_v33 = vadd.f32 %v2572_v57, %v2482_v5  ;;  %v2485_v48 = vadd.f32 %v4519_v28, %v2484_v18  ;;  %v2588_v5 = vld [vmem:[%s4514_s27 + $0xe0] sm:$0xff] }
 0x3ee   : > { %2638 = vst.msk [vmem:[%s4531_s11 + $0x70] sm:$0xff] %vm465_vm0, %v2606_v53  ;;  %v2607_v45 = vadd.f32 %v2575_v19, %v2493_v44  ;;  %v2591_v53 = vld [vmem:[%s4514_s27 + $0xf8] sm:$0xff] }
 0x3ef   : > { %2636 = vst.msk [vmem:[%s4531_s11 + $0x60] sm:$0xff] %vm465_vm0, %v2604_v33  ;;  %v2605_v63 = vadd.f32 %v2573_v58, %v2485_v48  ;;  %v2589_v33 = vld [vmem:[%s4514_s27 + $0xe8] sm:$0xff]  ;;  %s3533_s27 = scalar_lea.vmem %s3532_s20, 8192 }
 0x3f0   : > { %2639 = vst.msk [vmem:[%s4531_s11 + $0x78] sm:$0xff] %vm465_vm0, %v2607_v45  ;;  %p3535_p2 = scmp.lt.s32.totalorder %s3533_s27, %s3527_s17 }
 0x3f1   : > { %2637 = vst.msk [vmem:[%s4531_s11 + $0x68] sm:$0xff] %vm465_vm0, %v2605_v63  ;;  %v3123_v51 = vpop.f32.mrb[72].mxu1 }
 0x3f2   : > { %v2506_v52 = vadd.f32 %v3123_v51, %v4519_v28  ;;  %v2497_v12 = vpop.f32.mrb[73].mxu1  ;;  %p3536_p3 = por %p3535_p2, %p3534_p1 }
 0x3f3   : > { %v2498_v4 = vadd.f32 %v4519_v28, %v2497_v12  ;;  %v3124_v16 = vpop.f32.mrb[74].mxu1 }
 0x3f4   : > { %v2610_v15 = vadd.f32 %v2578_v1, %v2506_v52  ;;  %v2509_v23 = vadd.f32 %v3124_v16, %v4519_v28  ;;  %v2500_v22 = vpop.f32.mrb[75].mxu1  ;;  %p3537_p5 = pnand %p3536_p3, %p3530_p0 }
 0x3f5   : > { %v2608_v27 = vadd.f32 %v2576_v6, %v2498_v4  ;;  %v2501_v36 = vadd.f32 %v4519_v28, %v2500_v22 }
 0x3f6   : > { %2642 = vst.msk [vmem:[%s4531_s11 + $0x90] sm:$0xff] %vm465_vm0, %v2610_v15  ;;  %v2611_v49 = vadd.f32 %v2579_v11, %v2509_v23 }
 0x3f7   : > { %2640 = vst.msk [vmem:[%s4531_s11 + $0x80] sm:$0xff] %vm465_vm0, %v2608_v27  ;;  %v2609_v21 = vadd.f32 %v2577_v25, %v2501_v36 }
 0x3f8   : > { %2643 = vst.msk [vmem:[%s4531_s11 + $0x98] sm:$0xff] %vm465_vm0, %v2611_v49 }
 0x3f9   : > { %2641 = vst.msk [vmem:[%s4531_s11 + $0x88] sm:$0xff] %vm465_vm0, %v2609_v21  ;;  %v3127_v3 = vpop.f32.mrb[76].mxu1 }
 0x3fa   : > { %v2522_v46 = vadd.f32 %v3127_v3, %v4519_v28  ;;  %v2513_v7 = vpop.f32.mrb[77].mxu1 }
 0x3fb   : > { %v2514_v61 = vadd.f32 %v4519_v28, %v2513_v7  ;;  %v3128_v43 = vpop.f32.mrb[78].mxu1 }
 0x3fc   : > { %v2614_v32 = vadd.f32 %v2582_v29, %v2522_v46  ;;  %v2525_v50 = vadd.f32 %v3128_v43, %v4519_v28  ;;  %v2516_v26 = vpop.f32.mrb[79].mxu1 }
 0x3fd   : > { %v2612_v17 = vadd.f32 %v2580_v10, %v2514_v61  ;;  %v2517_v9 = vadd.f32 %v4519_v28, %v2516_v26 }
 0x3fe   : > { %2646 = vst.msk [vmem:[%s4531_s11 + $0xb0] sm:$0xff] %vm465_vm0, %v2614_v32  ;;  %v2615_v38 = vadd.f32 %v2583_v14, %v2525_v50 }
 0x3ff   : > { %2644 = vst.msk [vmem:[%s4531_s11 + $0xa0] sm:$0xff] %vm465_vm0, %v2612_v17  ;;  %v2613_v20 = vadd.f32 %v2581_v60, %v2517_v9 }
 0x400   : > { %2647 = vst.msk [vmem:[%s4531_s11 + $0xb8] sm:$0xff] %vm465_vm0, %v2615_v38 }
 0x401   : > { %2645 = vst.msk [vmem:[%s4531_s11 + $0xa8] sm:$0xff] %vm465_vm0, %v2613_v20  ;;  %v3131_v59 = vpop.f32.mrb[80].mxu1 }
 0x402   : > { %v2538_v39 = vadd.f32 %v3131_v59, %v4519_v28  ;;  %v2529_v13 = vpop.f32.mrb[81].mxu1 }
 0x403   : > { %v2530_v8 = vadd.f32 %v4519_v28, %v2529_v13  ;;  %v3132_v2 = vpop.f32.mrb[82].mxu1 }
 0x404   : > { %v2618_v62 = vadd.f32 %v2586_v24, %v2538_v39  ;;  %v2541_v31 = vadd.f32 %v3132_v2, %v4519_v28  ;;  %v2532_v0 = vpop.f32.mrb[83].mxu1 }
 0x405   : > { %v2616_v37 = vadd.f32 %v2584_v55, %v2530_v8  ;;  %v2533_v34 = vadd.f32 %v4519_v28, %v2532_v0 }
 0x406   : > { %2650 = vst.msk [vmem:[%s4531_s11 + $0xd0] sm:$0xff] %vm465_vm0, %v2618_v62  ;;  %v2619_v35 = vadd.f32 %v2587_v47, %v2541_v31 }
 0x407   : > { %2648 = vst.msk [vmem:[%s4531_s11 + $0xc0] sm:$0xff] %vm465_vm0, %v2616_v37  ;;  %v2617_v40 = vadd.f32 %v2585_v30, %v2533_v34 }
 0x408   : > { %2651 = vst.msk [vmem:[%s4531_s11 + $0xd8] sm:$0xff] %vm465_vm0, %v2619_v35 }
 0x409   : > { %2649 = vst.msk [vmem:[%s4531_s11 + $0xc8] sm:$0xff] %vm465_vm0, %v2617_v40 }
 0x410   : > { %v3135_v42 = vpop.f32.mrb[84].mxu1 }
 0x411   : > { %v2554_v41 = vadd.f32 %v3135_v42, %v4519_v28  ;;  %v2545_v57 = vpop.f32.mrb[85].mxu1 }
 0x412   : > { %v2546_v54 = vadd.f32 %v4519_v28, %v2545_v57  ;;  %v3136_v19 = vpop.f32.mrb[86].mxu1 }
 0x413   : > { %v2622_v44 = vadd.f32 %v2590_v56, %v2554_v41  ;;  %v2557_v18 = vadd.f32 %v3136_v19, %v4519_v28  ;;  %v2548_v58 = vpop.f32.mrb[87].mxu1 }
 0x414   : > { %v2620_v48 = vadd.f32 %v2588_v5, %v2546_v54  ;;  %v2549_v45 = vadd.f32 %v4519_v28, %v2548_v58 }
 0x415   : > { %2654 = vst.msk [vmem:[%s4531_s11 + $0xf0] sm:$0xff] %vm465_vm0, %v2622_v44  ;;  %v2623_v63 = vadd.f32 %v2591_v53, %v2557_v18 }
 0x416   : > { %2652 = vst.msk [vmem:[%s4531_s11 + $0xe0] sm:$0xff] %vm465_vm0, %v2620_v48  ;;  %v2621_v51 = vadd.f32 %v2589_v33, %v2549_v45 }
 0x417   : > { %2655 = vst.msk [vmem:[%s4531_s11 + $0xf8] sm:$0xff] %vm465_vm0, %v2623_v63 }
 0x418   : > { %2653 = vst.msk [vmem:[%s4531_s11 + $0xe8] sm:$0xff] %vm465_vm0, %v2621_v51 }
 0x419   : > { %3540 = shalt.err (!%p3537_p5)
}
 0x41a   : > { %s3541_s18 = scalar_lea.hbm %s4652_s16, 4096  ;;  %s3545_s8 = scalar_lea.hbm %s4716_s6, 8192 }
 0x41b   : > { %p3542_p6 = scmp.ne.s32.totalorder %s4652_s16, %s3541_s18  ;;  %p3546_p10 = scmp.lt.u32.totalorder %s4652_s16, %s4716_s6 }
 0x41c   : > { %p3547_p11 = scmp.lt.u32.totalorder %s3545_s8, %s3541_s18  ;;  %p3549_p13 = scmp.lt.u32.totalorder %s3541_s18, %s4652_s16 }
 0x41d   : > { %p3543_p7 = pnand %p3542_p6, %p3686_p4 }
 0x41e   : > { %p3548_p12 = por %p3547_p11, %p3546_p10 }
 0x41f   : > { %p3544_p9 = pneg %p3543_p7 }
 0x420   : > { %p3550_p0 = por %p3549_p13, %p3548_p12 }
 0x422   : > { %p3551_p1 = pnand %p3550_p0, %p3544_p9 }
 0x424   : > { %3554 = shalt.err (!%p3551_p1)
}
 0x425   : > { %s3609_s14 = smov 128   ;;  %s3610_s15 = smov 8  }
 0x426   : > { %3161 = dma.vmem_to_hbm [thread:$0]  (%p3686_p4), %s4654_s13, 4096, %s4652_s16, %s4664_s24, %s3609_s14, %s3609_s14, %s3610_s15  }
 0x427 PF: > { %p3167_p2 = scmp.ge.s32.totalorder %s3605_s26, 2  ;;  %s2687_s17 = sand.u32 1, %s3585_s21  }
 0x428   : > { %s2688_s19 = scalar_lea.sflag [#allocation6], %s2687_s17 }
 0x429   : > { %p3164_p3 = pnand %p3167_p2, %p3693_p8 }
 0x42b   : > { %3580 = dma.done.wait (!%p3164_p3), %s2688_s19, 4096  }
 0x42c   : > { %3582 = vsyncadd (!%p3164_p3), %s2688_s19, 4294963200  ;;  %s19_s26 = sadd.s32 1, %s3605_s26   ;;  %s4773_s21 = smov %s3589_s22 }
 0x42d   : > { %p16_p5 = scmp.ge.s32.totalorder %s19_s26, 4   ;;  %s4774_s22 = smov %s3593_s23 }
 0x42e   : > { %s4775_s23 = smov %s3699_s10  ;;  %s4776_s24 = smov %s3601_s25 }
 0x42f   : > { %s4777_s25 = smov %s4779_s29  ;;  %18 = sbr.rel (!%p16_p5) target bundleno = 4 (0x4), region = 96 }
 0x436   :  { %2693 = vsyncpa [#allocation6], 1 }
 0x437   :  { %2695 = vsyncpa [#allocation6 + $0x1], 1 }

</bundles_post_ra>
